<compile_context>
chip_gen: v7x
topology: tpu7x:2x2x1
jax: 0.10.0
libtpu: 0.0.40
codegen_flags: <defaults>
</compile_context>

<pallas_src>
import functools

import jax
import jax.numpy as jnp
import numpy as np
from jax.experimental import pallas as pl
from jax.experimental.pallas import tpu as pltpu


# -----------------------------------------------------------------------------
# Host-side parameter preparation (torch layout -> banded / folded kernel layout)
# -----------------------------------------------------------------------------
def _band_conv_weights(w_torch, b_torch, w_in, row_lanes=None):
    """Banded matmul weights for a 3x3 / stride-2 / pad-1 conv on a
    lane-flattened (row, col, ch) activation layout.

    Returns (Wb_top, Wb_mid, bias_row):
      Wb_top : (2*row_lanes, Wo*Co) for output row 0 (input rows 0..1)
      Wb_mid : (3*row_lanes, Wo*Co) for output row ho>=1 (input rows 2ho-1..2ho+1)
      bias_row: (1, Wo*Co) bias tiled over output columns.
    Column zero-padding is encoded by simply leaving the corresponding weight
    rows zero; row zero-padding is handled by the separate top weight.
    """
    w = np.asarray(w_torch, np.float32)            # (Co, Ci, 3, 3)
    co, ci = w.shape[0], w.shape[1]
    wo_n = w_in // 2
    if row_lanes is None:
        row_lanes = w_in * ci

    def build(kh_list):
        mat = np.zeros((len(kh_list) * row_lanes, wo_n * co), np.float32)
        for ik, kh in enumerate(kh_list):
            for wo in range(wo_n):
                for kw in range(3):
                    c = 2 * wo + kw - 1            # un-padded input column
                    if 0 <= c < w_in:
                        r0 = ik * row_lanes + c * ci
                        mat[r0:r0 + ci, wo * co:(wo + 1) * co] = w[:, :, kh, kw].T
        return jnp.asarray(mat)

    bias_row = jnp.asarray(np.tile(np.asarray(b_torch, np.float32), wo_n)[None, :])
    return build([1, 2]), build([0, 1, 2]), bias_row


def prepare_params(torch_params, input_hw):
    """torch layouts: conv weight (Co, Ci, 3, 3), conv bias (Co,),
                      linear weight (out, in), linear bias (out,).
    Kernel layouts: banded conv weights, (1, N) bias rows, FC weights as
    (in, out) with torch's NCHW channel-major flatten folded into FC1's rows
    (reordered to (h, w, c))."""
    p = torch_params
    H, W = input_hw
    H3, W3 = H // 8, W // 8
    C3 = p["w3"].shape[0]

    row_pad = ((W * 3 + 127) // 128) * 128          # lane-aligned input row stride

    wb1t, wb1m, br1 = _band_conv_weights(p["w1"], p["b1"], W, row_lanes=row_pad)
    wb2t, wb2m, br2 = _band_conv_weights(p["w2"], p["b2"], W // 2)
    wb3t, wb3m, br3 = _band_conv_weights(p["w3"], p["b3"], W // 4)

    # Fold torch's NCHW flatten (feature index c*H3*W3 + h*W3 + w) into FC1:
    # our feature buffer is in (h, w, c) order.
    wf1 = np.asarray(p["wf1"], np.float32).T                       # rows in (c,h,w)
    wf1 = wf1.reshape(C3, H3, W3, -1).transpose(1, 2, 0, 3).reshape(H3 * W3 * C3, -1)

    def b_row(b):
        return jnp.asarray(np.asarray(b, np.float32)[None, :])

    return dict(
        wb1t=wb1t, wb1m=wb1m, br1=br1,
        wb2t=wb2t, wb2m=wb2m, br2=br2,
        wb3t=wb3t, wb3m=wb3m, br3=br3,
        wf1=jnp.asarray(wf1), bf1=b_row(p["bf1"]),
        wf2=jnp.asarray(np.asarray(p["wf2"], np.float32).T), bf2=b_row(p["bf2"]),
        wf3=jnp.asarray(np.asarray(p["wf3"], np.float32).T), bf3=b_row(p["bf3"]),
    )


# -----------------------------------------------------------------------------
# Public forward pass (equivalent of SnakeModel.forward)
# -----------------------------------------------------------------------------
@functools.partial(jax.jit, static_argnames=("batch_tile",))
def snake_model_forward(state, kernel_params, *, batch_tile=8):
    """state: (B, H, W, 3) NHWC board (H, W multiples of 8) -> (B, n_actions)."""
    kp = kernel_params
    B, H, W, Cin = state.shape
    if Cin != 3 or H % 8 or W % 8:
        raise ValueError("expected NHWC input with 3 channels and H, W % 8 == 0")

    H1, W1 = H // 2, W // 2
    H2, W2 = H // 4, W // 4
    H3, W3 = H // 8, W // 8
    row_pad = kp["wb1m"].shape[0] // 3            # lane-aligned input row stride
    r1 = kp["br1"].shape[1]                       # = W1*C1 (conv1 output row lanes)
    r2 = kp["br2"].shape[1]                       # = W2*C2
    r3 = kp["br3"].shape[1]                       # = W3*C3
    A = kp["wf3"].shape[1]

    # Sublane-aligned batch tile; pad the batch up to a multiple of it.
    Bt = max(8, (int(batch_tile) // 8) * 8)
    Bp = pl.cdiv(B, Bt) * Bt
    n_in = H * row_pad

    # Lane-dense input staging: (B, H, W*3) padded to (B, H, row_pad), flattened.
    x = state.astype(jnp.float32).reshape(B, H, W * 3)
    if row_pad != W * 3:
        x = jnp.pad(x, ((0, 0), (0, 0), (0, row_pad - W * 3)))
    x = x.reshape(B, n_in)
    if Bp != B:
        x = jnp.pad(x, ((0, Bp - B), (0, 0)))

    weight_names = ("wb1t", "wb1m", "br1", "wb2t", "wb2m", "br2",
                    "wb3t", "wb3m", "br3", "wf1", "bf1", "wf2", "bf2", "wf3", "bf3")
    weights = [kp[n] for n in weight_names]

    def resident(arr):
        # Full-array block + constant index map: DMA'd to VMEM once, resident
        # across the whole batch grid.
        nd = arr.ndim
        return pl.BlockSpec(arr.shape, lambda g: (0,) * nd)

    def kernel(x_ref,
               wb1t_ref, wb1m_ref, br1_ref,
               wb2t_ref, wb2m_ref, br2_ref,
               wb3t_ref, wb3m_ref, br3_ref,
               wf1_ref, bf1_ref, wf2_ref, bf2_ref, wf3_ref, bf3_ref,
               q_ref, buf2, buf3, feat):
        f32 = jnp.float32

        def conv_rows(src, dst, wt_ref, wm_ref, brow_ref, row_in, row_out, Ho):
            """3x3/stride-2/pad-1 conv + bias + ReLU on lane-flattened layout:
            one banded matmul per output row, 128-aligned slices everywhere."""
            wt = wt_ref[...]
            wm = wm_ref[...] if Ho > 1 else None
            brow = brow_ref[...]
            for ho in range(Ho):                       # static, fully unrolled
                if ho == 0:
                    xs = src[:, pl.ds(0, 2 * row_in)]            # input rows 0..1
                    acc = jnp.dot(xs, wt, preferred_element_type=f32)
                else:
                    xs = src[:, pl.ds((2 * ho - 1) * row_in, 3 * row_in)]
                    acc = jnp.dot(xs, wm, preferred_element_type=f32)
                dst[:, pl.ds(ho * row_out, row_out)] = jnp.maximum(acc + brow, 0.0)

        # conv1: 3 -> C1, conv2: C1 -> C2, conv3: C2 -> C3 (into flat features)
        conv_rows(x_ref, buf2, wb1t_ref, wb1m_ref, br1_ref, row_pad, r1, H1)
        conv_rows(buf2, buf3, wb2t_ref, wb2m_ref, br2_ref, r1, r2, H2)
        conv_rows(buf3, feat, wb3t_ref, wb3m_ref, br3_ref, r2, r3, H3)

        # MLP head: FC1 is a single K = H3*W3*C3 matmul (flatten already folded).
        h = jnp.dot(feat[...], wf1_ref[...], preferred_element_type=f32) + bf1_ref[...]
        h = jnp.maximum(h, 0.0)
        h = jnp.dot(h, wf2_ref[...], preferred_element_type=f32) + bf2_ref[...]
        h = jnp.maximum(h, 0.0)
        q = jnp.dot(h, wf3_ref[...], preferred_element_type=f32) + bf3_ref[...]
        q_ref[...] = q.astype(q_ref.dtype)

    q = pl.pallas_call(
        kernel,
        out_shape=jax.ShapeDtypeStruct((Bp, A), jnp.float32),
        grid=(Bp // Bt,),
        in_specs=[pl.BlockSpec((Bt, n_in), lambda g: (g, 0))]
                 + [resident(w) for w in weights],
        out_specs=pl.BlockSpec((Bt, A), lambda g: (g, 0)),
        scratch_shapes=[
            pltpu.VMEM((Bt, H1 * r1), jnp.float32),   # flat conv1 output
            pltpu.VMEM((Bt, H2 * r2), jnp.float32),   # flat conv2 output
            pltpu.VMEM((Bt, H3 * r3), jnp.float32),   # flat conv3 output / FC1 input
        ],
        compiler_params=pltpu.CompilerParams(
            # Batch tiles are independent -> shards across the 2 TensorCores on
            # v7x; harmless on single-TC v5e / v6e.  ~4 MB of resident weights
            # plus <4 MB of activations even at Bt=256 fits the 32 MiB scope.
            dimension_semantics=("parallel",),
            vmem_limit_bytes=32 * 1024 * 1024,
        ),
    )(x, *weights)
    return q[:B]


# -----------------------------------------------------------------------------
# Pure-JAX replica of the PyTorch module (validation reference)
# -----------------------------------------------------------------------------
def torch_reference_forward(state, torch_params):
    p = torch_params
    hi = jax.lax.Precision.HIGHEST
    x = jnp.transpose(state, (0, 3, 1, 2))                  # NHWC -> NCHW

    def conv(x, w, b):
        y = jax.lax.conv_general_dilated(
            x, w, window_strides=(2, 2), padding=((1, 1), (1, 1)),
            dimension_numbers=("NCHW", "OIHW", "NCHW"), precision=hi)
        return jax.nn.relu(y + b[None, :, None, None])

    x = conv(x, p["w1"], p["b1"])
    x = conv(x, p["w2"], p["b2"])
    x = conv(x, p["w3"], p["b3"])
    feats = x.reshape(x.shape[0], -1)                       # NCHW channel-major flatten
    h = jax.nn.relu(jnp.dot(feats, p["wf1"].T, precision=hi) + p["bf1"])
    h = jax.nn.relu(jnp.dot(h, p["wf2"].T, precision=hi) + p["bf2"])
    return jnp.dot(h, p["wf3"].T, precision=hi) + p["bf3"]


if __name__ == "__main__":
    B, H, W = 16, 16, 16           # H, W multiples of 8 as the model assumes
    n_actions = 4
    H3, W3 = H // 8, W // 8
    conv_out_size = H3 * W3 * 64   # matches torch: input_shape[0]//8 * input_shape[1]//8 * 64

    key = jax.random.PRNGKey(0)
    ks = jax.random.split(key, 13)

    def init(k, shape, fan_in):
        bound = 1.0 / np.sqrt(fan_in)
        return jax.random.uniform(k, shape, jnp.float32, -bound, bound)

    torch_params = dict(
        w1=init(ks[0], (32, 3, 3, 3), 3 * 9),     b1=init(ks[1], (32,), 3 * 9),
        w2=init(ks[2], (64, 32, 3, 3), 32 * 9),   b2=init(ks[3], (64,), 32 * 9),
        w3=init(ks[4], (64, 64, 3, 3), 64 * 9),   b3=init(ks[5], (64,), 64 * 9),
        wf1=init(ks[6], (512, conv_out_size), conv_out_size),
        bf1=init(ks[7], (512,), conv_out_size),
        wf2=init(ks[8], (256, 512), 512),         bf2=init(ks[9], (256,), 512),
        wf3=init(ks[10], (n_actions, 256), 256),  bf3=init(ks[11], (n_actions,), 256),
    )
    state = jax.random.uniform(ks[12], (B, H, W, 3), jnp.float32)

    kernel_params = prepare_params(torch_params, (H, W))
    q = jax.block_until_ready(snake_model_forward(state, kernel_params, batch_tile=8))

    q_ref = jax.block_until_ready(torch_reference_forward(state, torch_params))
    np.testing.assert_allclose(np.asarray(q), np.asarray(q_ref), rtol=2e-2, atol=2e-2)

    print("KERNEL_OK")
</pallas_src>

<mosaic_0001>
module attributes {stable_mosaic.version = 11 : i64} {
  func.func @kernel(%arg0: i32, %arg1: memref<8x2048xf32, #tpu.memory_space<vmem>>, %arg2: memref<256x256xf32, #tpu.memory_space<vmem>>, %arg3: memref<384x256xf32, #tpu.memory_space<vmem>>, %arg4: memref<1x256xf32, #tpu.memory_space<vmem>>, %arg5: memref<512x256xf32, #tpu.memory_space<vmem>>, %arg6: memref<768x256xf32, #tpu.memory_space<vmem>>, %arg7: memref<1x256xf32, #tpu.memory_space<vmem>>, %arg8: memref<512x128xf32, #tpu.memory_space<vmem>>, %arg9: memref<768x128xf32, #tpu.memory_space<vmem>>, %arg10: memref<1x128xf32, #tpu.memory_space<vmem>>, %arg11: memref<256x512xf32, #tpu.memory_space<vmem>>, %arg12: memref<1x512xf32, #tpu.memory_space<vmem>>, %arg13: memref<512x256xf32, #tpu.memory_space<vmem>>, %arg14: memref<1x256xf32, #tpu.memory_space<vmem>>, %arg15: memref<256x4xf32, #tpu.memory_space<vmem>>, %arg16: memref<1x4xf32, #tpu.memory_space<vmem>>, %arg17: memref<8x4xf32, #tpu.memory_space<vmem>>, %arg18: memref<8x2048xf32, #tpu.memory_space<vmem>>, %arg19: memref<8x1024xf32, #tpu.memory_space<vmem>>, %arg20: memref<8x256xf32, #tpu.memory_space<vmem>>) attributes {dimension_semantics = [#tpu.dimension_semantics<parallel>], iteration_bounds = array<i64: 2>, scalar_prefetch = 0 : i64, scratch_operands = 3 : i64, tpu.core_type = #tpu.core_type<tc>, window_params = [{transform_indices = @transform_0, window_bounds = array<i64: 8, 2048>}, {pipeline_mode = #tpu.pipeline_mode<synchronous>, transform_indices = @transform_1, window_bounds = array<i64: 256, 256>}, {pipeline_mode = #tpu.pipeline_mode<synchronous>, transform_indices = @transform_2, window_bounds = array<i64: 384, 256>}, {pipeline_mode = #tpu.pipeline_mode<synchronous>, transform_indices = @transform_3, window_bounds = array<i64: 1, 256>}, {pipeline_mode = #tpu.pipeline_mode<synchronous>, transform_indices = @transform_4, window_bounds = array<i64: 512, 256>}, {pipeline_mode = #tpu.pipeline_mode<synchronous>, transform_indices = @transform_5, window_bounds = array<i64: 768, 256>}, {pipeline_mode = #tpu.pipeline_mode<synchronous>, transform_indices = @transform_6, window_bounds = array<i64: 1, 256>}, {pipeline_mode = #tpu.pipeline_mode<synchronous>, transform_indices = @transform_7, window_bounds = array<i64: 512, 128>}, {pipeline_mode = #tpu.pipeline_mode<synchronous>, transform_indices = @transform_8, window_bounds = array<i64: 768, 128>}, {pipeline_mode = #tpu.pipeline_mode<synchronous>, transform_indices = @transform_9, window_bounds = array<i64: 1, 128>}, {pipeline_mode = #tpu.pipeline_mode<synchronous>, transform_indices = @transform_10, window_bounds = array<i64: 256, 512>}, {pipeline_mode = #tpu.pipeline_mode<synchronous>, transform_indices = @transform_11, window_bounds = array<i64: 1, 512>}, {pipeline_mode = #tpu.pipeline_mode<synchronous>, transform_indices = @transform_12, window_bounds = array<i64: 512, 256>}, {pipeline_mode = #tpu.pipeline_mode<synchronous>, transform_indices = @transform_13, window_bounds = array<i64: 1, 256>}, {pipeline_mode = #tpu.pipeline_mode<synchronous>, transform_indices = @transform_14, window_bounds = array<i64: 256, 4>}, {pipeline_mode = #tpu.pipeline_mode<synchronous>, transform_indices = @transform_15, window_bounds = array<i64: 1, 4>}, {transform_indices = @transform_16, window_bounds = array<i64: 8, 4>}]} {
    %c0 = arith.constant 0 : index
    %c0_0 = arith.constant 0 : index
    %0 = vector.load %arg2[%c0, %c0_0] : memref<256x256xf32, #tpu.memory_space<vmem>>, vector<256x256xf32>
    %c0_1 = arith.constant 0 : index
    %c0_2 = arith.constant 0 : index
    %1 = vector.load %arg3[%c0_1, %c0_2] : memref<384x256xf32, #tpu.memory_space<vmem>>, vector<384x256xf32>
    %c0_3 = arith.constant 0 : index
    %c0_4 = arith.constant 0 : index
    %2 = vector.load %arg4[%c0_3, %c0_4] : memref<1x256xf32, #tpu.memory_space<vmem>>, vector<1x256xf32>
    %c0_5 = arith.constant 0 : index
    %c0_6 = arith.constant 0 : index
    %3 = vector.load %arg1[%c0_5, %c0_6] : memref<8x2048xf32, #tpu.memory_space<vmem>>, vector<8x256xf32>
    %cst = arith.constant dense<0.000000e+00> : vector<8x256xf32>
    %4 = tpu.matmul %3, %0, %cst {dimension_numbers = #tpu.dot_dimension_numbers<[1], [0], [0], [1], [0, 0, 1, 1], [], []>} : vector<8x256xf32>, vector<256x256xf32>, vector<8x256xf32> -> vector<8x256xf32>
    %5 = vector.broadcast %2 : vector<1x256xf32> to vector<8x256xf32>
    %6 = arith.addf %4, %5 : vector<8x256xf32>
    %cst_7 = arith.constant 0.000000e+00 : f32
    %7 = vector.broadcast %cst_7 : f32 to vector<8x256xf32>
    %8 = arith.maximumf %6, %7 : vector<8x256xf32>
    %c0_8 = arith.constant 0 : index
    %c0_9 = arith.constant 0 : index
    %9 = vector.load %arg18[%c0_8, %c0_9] : memref<8x2048xf32, #tpu.memory_space<vmem>>, vector<8x256xf32>
    tpu.vector_store %arg18[%c0_8, %c0_9], %8 {strides = array<i32>} : memref<8x2048xf32, #tpu.memory_space<vmem>>, vector<8x256xf32>,
    %c0_10 = arith.constant 0 : index
    %c128 = arith.constant 128 : index
    %10 = vector.load %arg1[%c0_10, %c128] : memref<8x2048xf32, #tpu.memory_space<vmem>>, vector<8x384xf32>
    %cst_11 = arith.constant dense<0.000000e+00> : vector<8x256xf32>
    %11 = tpu.matmul %10, %1, %cst_11 {dimension_numbers = #tpu.dot_dimension_numbers<[1], [0], [0], [1], [0, 0, 1, 1], [], []>} : vector<8x384xf32>, vector<384x256xf32>, vector<8x256xf32> -> vector<8x256xf32>
    %12 = vector.broadcast %2 : vector<1x256xf32> to vector<8x256xf32>
    %13 = arith.addf %11, %12 : vector<8x256xf32>
    %cst_12 = arith.constant 0.000000e+00 : f32
    %14 = vector.broadcast %cst_12 : f32 to vector<8x256xf32>
    %15 = arith.maximumf %13, %14 : vector<8x256xf32>
    %c0_13 = arith.constant 0 : index
    %c256 = arith.constant 256 : index
    %16 = vector.load %arg18[%c0_13, %c256] : memref<8x2048xf32, #tpu.memory_space<vmem>>, vector<8x256xf32>
    tpu.vector_store %arg18[%c0_13, %c256], %15 {strides = array<i32>} : memref<8x2048xf32, #tpu.memory_space<vmem>>, vector<8x256xf32>,
    %c0_14 = arith.constant 0 : index
    %c384 = arith.constant 384 : index
    %17 = vector.load %arg1[%c0_14, %c384] : memref<8x2048xf32, #tpu.memory_space<vmem>>, vector<8x384xf32>
    %cst_15 = arith.constant dense<0.000000e+00> : vector<8x256xf32>
    %18 = tpu.matmul %17, %1, %cst_15 {dimension_numbers = #tpu.dot_dimension_numbers<[1], [0], [0], [1], [0, 0, 1, 1], [], []>} : vector<8x384xf32>, vector<384x256xf32>, vector<8x256xf32> -> vector<8x256xf32>
    %19 = vector.broadcast %2 : vector<1x256xf32> to vector<8x256xf32>
    %20 = arith.addf %18, %19 : vector<8x256xf32>
    %cst_16 = arith.constant 0.000000e+00 : f32
    %21 = vector.broadcast %cst_16 : f32 to vector<8x256xf32>
    %22 = arith.maximumf %20, %21 : vector<8x256xf32>
    %c0_17 = arith.constant 0 : index
    %c512 = arith.constant 512 : index
    %23 = vector.load %arg18[%c0_17, %c512] : memref<8x2048xf32, #tpu.memory_space<vmem>>, vector<8x256xf32>
    tpu.vector_store %arg18[%c0_17, %c512], %22 {strides = array<i32>} : memref<8x2048xf32, #tpu.memory_space<vmem>>, vector<8x256xf32>,
    %c0_18 = arith.constant 0 : index
    %c640 = arith.constant 640 : index
    %24 = vector.load %arg1[%c0_18, %c640] : memref<8x2048xf32, #tpu.memory_space<vmem>>, vector<8x384xf32>
    %cst_19 = arith.constant dense<0.000000e+00> : vector<8x256xf32>
    %25 = tpu.matmul %24, %1, %cst_19 {dimension_numbers = #tpu.dot_dimension_numbers<[1], [0], [0], [1], [0, 0, 1, 1], [], []>} : vector<8x384xf32>, vector<384x256xf32>, vector<8x256xf32> -> vector<8x256xf32>
    %26 = vector.broadcast %2 : vector<1x256xf32> to vector<8x256xf32>
    %27 = arith.addf %25, %26 : vector<8x256xf32>
    %cst_20 = arith.constant 0.000000e+00 : f32
    %28 = vector.broadcast %cst_20 : f32 to vector<8x256xf32>
    %29 = arith.maximumf %27, %28 : vector<8x256xf32>
    %c0_21 = arith.constant 0 : index
    %c768 = arith.constant 768 : index
    %30 = vector.load %arg18[%c0_21, %c768] : memref<8x2048xf32, #tpu.memory_space<vmem>>, vector<8x256xf32>
    tpu.vector_store %arg18[%c0_21, %c768], %29 {strides = array<i32>} : memref<8x2048xf32, #tpu.memory_space<vmem>>, vector<8x256xf32>,
    %c0_22 = arith.constant 0 : index
    %c896 = arith.constant 896 : index
    %31 = vector.load %arg1[%c0_22, %c896] : memref<8x2048xf32, #tpu.memory_space<vmem>>, vector<8x384xf32>
    %cst_23 = arith.constant dense<0.000000e+00> : vector<8x256xf32>
    %32 = tpu.matmul %31, %1, %cst_23 {dimension_numbers = #tpu.dot_dimension_numbers<[1], [0], [0], [1], [0, 0, 1, 1], [], []>} : vector<8x384xf32>, vector<384x256xf32>, vector<8x256xf32> -> vector<8x256xf32>
    %33 = vector.broadcast %2 : vector<1x256xf32> to vector<8x256xf32>
    %34 = arith.addf %32, %33 : vector<8x256xf32>
    %cst_24 = arith.constant 0.000000e+00 : f32
    %35 = vector.broadcast %cst_24 : f32 to vector<8x256xf32>
    %36 = arith.maximumf %34, %35 : vector<8x256xf32>
    %c0_25 = arith.constant 0 : index
    %c1024 = arith.constant 1024 : index
    %37 = vector.load %arg18[%c0_25, %c1024] : memref<8x2048xf32, #tpu.memory_space<vmem>>, vector<8x256xf32>
    tpu.vector_store %arg18[%c0_25, %c1024], %36 {strides = array<i32>} : memref<8x2048xf32, #tpu.memory_space<vmem>>, vector<8x256xf32>,
    %c0_26 = arith.constant 0 : index
    %c1152 = arith.constant 1152 : index
    %38 = vector.load %arg1[%c0_26, %c1152] : memref<8x2048xf32, #tpu.memory_space<vmem>>, vector<8x384xf32>
    %cst_27 = arith.constant dense<0.000000e+00> : vector<8x256xf32>
    %39 = tpu.matmul %38, %1, %cst_27 {dimension_numbers = #tpu.dot_dimension_numbers<[1], [0], [0], [1], [0, 0, 1, 1], [], []>} : vector<8x384xf32>, vector<384x256xf32>, vector<8x256xf32> -> vector<8x256xf32>
    %40 = vector.broadcast %2 : vector<1x256xf32> to vector<8x256xf32>
    %41 = arith.addf %39, %40 : vector<8x256xf32>
    %cst_28 = arith.constant 0.000000e+00 : f32
    %42 = vector.broadcast %cst_28 : f32 to vector<8x256xf32>
    %43 = arith.maximumf %41, %42 : vector<8x256xf32>
    %c0_29 = arith.constant 0 : index
    %c1280 = arith.constant 1280 : index
    %44 = vector.load %arg18[%c0_29, %c1280] : memref<8x2048xf32, #tpu.memory_space<vmem>>, vector<8x256xf32>
    tpu.vector_store %arg18[%c0_29, %c1280], %43 {strides = array<i32>} : memref<8x2048xf32, #tpu.memory_space<vmem>>, vector<8x256xf32>,
    %c0_30 = arith.constant 0 : index
    %c1408 = arith.constant 1408 : index
    %45 = vector.load %arg1[%c0_30, %c1408] : memref<8x2048xf32, #tpu.memory_space<vmem>>, vector<8x384xf32>
    %cst_31 = arith.constant dense<0.000000e+00> : vector<8x256xf32>
    %46 = tpu.matmul %45, %1, %cst_31 {dimension_numbers = #tpu.dot_dimension_numbers<[1], [0], [0], [1], [0, 0, 1, 1], [], []>} : vector<8x384xf32>, vector<384x256xf32>, vector<8x256xf32> -> vector<8x256xf32>
    %47 = vector.broadcast %2 : vector<1x256xf32> to vector<8x256xf32>
    %48 = arith.addf %46, %47 : vector<8x256xf32>
    %cst_32 = arith.constant 0.000000e+00 : f32
    %49 = vector.broadcast %cst_32 : f32 to vector<8x256xf32>
    %50 = arith.maximumf %48, %49 : vector<8x256xf32>
    %c0_33 = arith.constant 0 : index
    %c1536 = arith.constant 1536 : index
    %51 = vector.load %arg18[%c0_33, %c1536] : memref<8x2048xf32, #tpu.memory_space<vmem>>, vector<8x256xf32>
    tpu.vector_store %arg18[%c0_33, %c1536], %50 {strides = array<i32>} : memref<8x2048xf32, #tpu.memory_space<vmem>>, vector<8x256xf32>,
    %c0_34 = arith.constant 0 : index
    %c1664 = arith.constant 1664 : index
    %52 = vector.load %arg1[%c0_34, %c1664] : memref<8x2048xf32, #tpu.memory_space<vmem>>, vector<8x384xf32>
    %cst_35 = arith.constant dense<0.000000e+00> : vector<8x256xf32>
    %53 = tpu.matmul %52, %1, %cst_35 {dimension_numbers = #tpu.dot_dimension_numbers<[1], [0], [0], [1], [0, 0, 1, 1], [], []>} : vector<8x384xf32>, vector<384x256xf32>, vector<8x256xf32> -> vector<8x256xf32>
    %54 = vector.broadcast %2 : vector<1x256xf32> to vector<8x256xf32>
    %55 = arith.addf %53, %54 : vector<8x256xf32>
    %cst_36 = arith.constant 0.000000e+00 : f32
    %56 = vector.broadcast %cst_36 : f32 to vector<8x256xf32>
    %57 = arith.maximumf %55, %56 : vector<8x256xf32>
    %c0_37 = arith.constant 0 : index
    %c1792 = arith.constant 1792 : index
    %58 = vector.load %arg18[%c0_37, %c1792] : memref<8x2048xf32, #tpu.memory_space<vmem>>, vector<8x256xf32>
    tpu.vector_store %arg18[%c0_37, %c1792], %57 {strides = array<i32>} : memref<8x2048xf32, #tpu.memory_space<vmem>>, vector<8x256xf32>,
    %c0_38 = arith.constant 0 : index
    %c0_39 = arith.constant 0 : index
    %59 = vector.load %arg5[%c0_38, %c0_39] : memref<512x256xf32, #tpu.memory_space<vmem>>, vector<512x256xf32>
    %c0_40 = arith.constant 0 : index
    %c0_41 = arith.constant 0 : index
    %60 = vector.load %arg6[%c0_40, %c0_41] : memref<768x256xf32, #tpu.memory_space<vmem>>, vector<768x256xf32>
    %c0_42 = arith.constant 0 : index
    %c0_43 = arith.constant 0 : index
    %61 = vector.load %arg7[%c0_42, %c0_43] : memref<1x256xf32, #tpu.memory_space<vmem>>, vector<1x256xf32>
    %c0_44 = arith.constant 0 : index
    %c0_45 = arith.constant 0 : index
    %62 = vector.load %arg18[%c0_44, %c0_45] : memref<8x2048xf32, #tpu.memory_space<vmem>>, vector<8x512xf32>
    %cst_46 = arith.constant dense<0.000000e+00> : vector<8x256xf32>
    %63 = tpu.matmul %62, %59, %cst_46 {dimension_numbers = #tpu.dot_dimension_numbers<[1], [0], [0], [1], [0, 0, 1, 1], [], []>} : vector<8x512xf32>, vector<512x256xf32>, vector<8x256xf32> -> vector<8x256xf32>
    %64 = vector.broadcast %61 : vector<1x256xf32> to vector<8x256xf32>
    %65 = arith.addf %63, %64 : vector<8x256xf32>
    %cst_47 = arith.constant 0.000000e+00 : f32
    %66 = vector.broadcast %cst_47 : f32 to vector<8x256xf32>
    %67 = arith.maximumf %65, %66 : vector<8x256xf32>
    %c0_48 = arith.constant 0 : index
    %c0_49 = arith.constant 0 : index
    %68 = vector.load %arg19[%c0_48, %c0_49] : memref<8x1024xf32, #tpu.memory_space<vmem>>, vector<8x256xf32>
    tpu.vector_store %arg19[%c0_48, %c0_49], %67 {strides = array<i32>} : memref<8x1024xf32, #tpu.memory_space<vmem>>, vector<8x256xf32>,
    %c0_50 = arith.constant 0 : index
    %c256_51 = arith.constant 256 : index
    %69 = vector.load %arg18[%c0_50, %c256_51] : memref<8x2048xf32, #tpu.memory_space<vmem>>, vector<8x768xf32>
    %cst_52 = arith.constant dense<0.000000e+00> : vector<8x256xf32>
    %70 = tpu.matmul %69, %60, %cst_52 {dimension_numbers = #tpu.dot_dimension_numbers<[1], [0], [0], [1], [0, 0, 1, 1], [], []>} : vector<8x768xf32>, vector<768x256xf32>, vector<8x256xf32> -> vector<8x256xf32>
    %71 = vector.broadcast %61 : vector<1x256xf32> to vector<8x256xf32>
    %72 = arith.addf %70, %71 : vector<8x256xf32>
    %cst_53 = arith.constant 0.000000e+00 : f32
    %73 = vector.broadcast %cst_53 : f32 to vector<8x256xf32>
    %74 = arith.maximumf %72, %73 : vector<8x256xf32>
    %c0_54 = arith.constant 0 : index
    %c256_55 = arith.constant 256 : index
    %75 = vector.load %arg19[%c0_54, %c256_55] : memref<8x1024xf32, #tpu.memory_space<vmem>>, vector<8x256xf32>
    tpu.vector_store %arg19[%c0_54, %c256_55], %74 {strides = array<i32>} : memref<8x1024xf32, #tpu.memory_space<vmem>>, vector<8x256xf32>,
    %c0_56 = arith.constant 0 : index
    %c768_57 = arith.constant 768 : index
    %76 = vector.load %arg18[%c0_56, %c768_57] : memref<8x2048xf32, #tpu.memory_space<vmem>>, vector<8x768xf32>
    %cst_58 = arith.constant dense<0.000000e+00> : vector<8x256xf32>
    %77 = tpu.matmul %76, %60, %cst_58 {dimension_numbers = #tpu.dot_dimension_numbers<[1], [0], [0], [1], [0, 0, 1, 1], [], []>} : vector<8x768xf32>, vector<768x256xf32>, vector<8x256xf32> -> vector<8x256xf32>
    %78 = vector.broadcast %61 : vector<1x256xf32> to vector<8x256xf32>
    %79 = arith.addf %77, %78 : vector<8x256xf32>
    %cst_59 = arith.constant 0.000000e+00 : f32
    %80 = vector.broadcast %cst_59 : f32 to vector<8x256xf32>
    %81 = arith.maximumf %79, %80 : vector<8x256xf32>
    %c0_60 = arith.constant 0 : index
    %c512_61 = arith.constant 512 : index
    %82 = vector.load %arg19[%c0_60, %c512_61] : memref<8x1024xf32, #tpu.memory_space<vmem>>, vector<8x256xf32>
    tpu.vector_store %arg19[%c0_60, %c512_61], %81 {strides = array<i32>} : memref<8x1024xf32, #tpu.memory_space<vmem>>, vector<8x256xf32>,
    %c0_62 = arith.constant 0 : index
    %c1280_63 = arith.constant 1280 : index
    %83 = vector.load %arg18[%c0_62, %c1280_63] : memref<8x2048xf32, #tpu.memory_space<vmem>>, vector<8x768xf32>
    %cst_64 = arith.constant dense<0.000000e+00> : vector<8x256xf32>
    %84 = tpu.matmul %83, %60, %cst_64 {dimension_numbers = #tpu.dot_dimension_numbers<[1], [0], [0], [1], [0, 0, 1, 1], [], []>} : vector<8x768xf32>, vector<768x256xf32>, vector<8x256xf32> -> vector<8x256xf32>
    %85 = vector.broadcast %61 : vector<1x256xf32> to vector<8x256xf32>
    %86 = arith.addf %84, %85 : vector<8x256xf32>
    %cst_65 = arith.constant 0.000000e+00 : f32
    %87 = vector.broadcast %cst_65 : f32 to vector<8x256xf32>
    %88 = arith.maximumf %86, %87 : vector<8x256xf32>
    %c0_66 = arith.constant 0 : index
    %c768_67 = arith.constant 768 : index
    %89 = vector.load %arg19[%c0_66, %c768_67] : memref<8x1024xf32, #tpu.memory_space<vmem>>, vector<8x256xf32>
    tpu.vector_store %arg19[%c0_66, %c768_67], %88 {strides = array<i32>} : memref<8x1024xf32, #tpu.memory_space<vmem>>, vector<8x256xf32>,
    %c0_68 = arith.constant 0 : index
    %c0_69 = arith.constant 0 : index
    %90 = vector.load %arg8[%c0_68, %c0_69] : memref<512x128xf32, #tpu.memory_space<vmem>>, vector<512x128xf32>
    %c0_70 = arith.constant 0 : index
    %c0_71 = arith.constant 0 : index
    %91 = vector.load %arg9[%c0_70, %c0_71] : memref<768x128xf32, #tpu.memory_space<vmem>>, vector<768x128xf32>
    %c0_72 = arith.constant 0 : index
    %c0_73 = arith.constant 0 : index
    %92 = vector.load %arg10[%c0_72, %c0_73] : memref<1x128xf32, #tpu.memory_space<vmem>>, vector<1x128xf32>
    %c0_74 = arith.constant 0 : index
    %c0_75 = arith.constant 0 : index
    %93 = vector.load %arg19[%c0_74, %c0_75] : memref<8x1024xf32, #tpu.memory_space<vmem>>, vector<8x512xf32>
    %cst_76 = arith.constant dense<0.000000e+00> : vector<8x128xf32>
    %94 = tpu.matmul %93, %90, %cst_76 {dimension_numbers = #tpu.dot_dimension_numbers<[1], [0], [0], [1], [0, 0, 1, 1], [], []>} : vector<8x512xf32>, vector<512x128xf32>, vector<8x128xf32> -> vector<8x128xf32>
    %95 = vector.broadcast %92 : vector<1x128xf32> to vector<8x128xf32>
    %96 = arith.addf %94, %95 : vector<8x128xf32>
    %cst_77 = arith.constant 0.000000e+00 : f32
    %97 = vector.broadcast %cst_77 : f32 to vector<8x128xf32>
    %98 = arith.maximumf %96, %97 : vector<8x128xf32>
    %c0_78 = arith.constant 0 : index
    %c0_79 = arith.constant 0 : index
    %99 = vector.load %arg20[%c0_78, %c0_79] : memref<8x256xf32, #tpu.memory_space<vmem>>, vector<8x128xf32>
    tpu.vector_store %arg20[%c0_78, %c0_79], %98 {strides = array<i32>} : memref<8x256xf32, #tpu.memory_space<vmem>>, vector<8x128xf32>,
    %c0_80 = arith.constant 0 : index
    %c256_81 = arith.constant 256 : index
    %100 = vector.load %arg19[%c0_80, %c256_81] : memref<8x1024xf32, #tpu.memory_space<vmem>>, vector<8x768xf32>
    %cst_82 = arith.constant dense<0.000000e+00> : vector<8x128xf32>
    %101 = tpu.matmul %100, %91, %cst_82 {dimension_numbers = #tpu.dot_dimension_numbers<[1], [0], [0], [1], [0, 0, 1, 1], [], []>} : vector<8x768xf32>, vector<768x128xf32>, vector<8x128xf32> -> vector<8x128xf32>
    %102 = vector.broadcast %92 : vector<1x128xf32> to vector<8x128xf32>
    %103 = arith.addf %101, %102 : vector<8x128xf32>
    %cst_83 = arith.constant 0.000000e+00 : f32
    %104 = vector.broadcast %cst_83 : f32 to vector<8x128xf32>
    %105 = arith.maximumf %103, %104 : vector<8x128xf32>
    %c0_84 = arith.constant 0 : index
    %c128_85 = arith.constant 128 : index
    %106 = vector.load %arg20[%c0_84, %c128_85] : memref<8x256xf32, #tpu.memory_space<vmem>>, vector<8x128xf32>
    tpu.vector_store %arg20[%c0_84, %c128_85], %105 {strides = array<i32>} : memref<8x256xf32, #tpu.memory_space<vmem>>, vector<8x128xf32>,
    %c0_86 = arith.constant 0 : index
    %c0_87 = arith.constant 0 : index
    %107 = vector.load %arg20[%c0_86, %c0_87] : memref<8x256xf32, #tpu.memory_space<vmem>>, vector<8x256xf32>
    %c0_88 = arith.constant 0 : index
    %c0_89 = arith.constant 0 : index
    %108 = vector.load %arg11[%c0_88, %c0_89] : memref<256x512xf32, #tpu.memory_space<vmem>>, vector<256x512xf32>
    %cst_90 = arith.constant dense<0.000000e+00> : vector<8x512xf32>
    %109 = tpu.matmul %107, %108, %cst_90 {dimension_numbers = #tpu.dot_dimension_numbers<[1], [0], [0], [1], [0, 0, 1, 1], [], []>} : vector<8x256xf32>, vector<256x512xf32>, vector<8x512xf32> -> vector<8x512xf32>
    %c0_91 = arith.constant 0 : index
    %c0_92 = arith.constant 0 : index
    %110 = vector.load %arg12[%c0_91, %c0_92] : memref<1x512xf32, #tpu.memory_space<vmem>>, vector<1x512xf32>
    %111 = vector.broadcast %110 : vector<1x512xf32> to vector<8x512xf32>
    %112 = arith.addf %109, %111 : vector<8x512xf32>
    %cst_93 = arith.constant 0.000000e+00 : f32
    %113 = vector.broadcast %cst_93 : f32 to vector<8x512xf32>
    %114 = arith.maximumf %112, %113 : vector<8x512xf32>
    %c0_94 = arith.constant 0 : index
    %c0_95 = arith.constant 0 : index
    %115 = vector.load %arg13[%c0_94, %c0_95] : memref<512x256xf32, #tpu.memory_space<vmem>>, vector<512x256xf32>
    %cst_96 = arith.constant dense<0.000000e+00> : vector<8x256xf32>
    %116 = tpu.matmul %114, %115, %cst_96 {dimension_numbers = #tpu.dot_dimension_numbers<[1], [0], [0], [1], [0, 0, 1, 1], [], []>} : vector<8x512xf32>, vector<512x256xf32>, vector<8x256xf32> -> vector<8x256xf32>
    %c0_97 = arith.constant 0 : index
    %c0_98 = arith.constant 0 : index
    %117 = vector.load %arg14[%c0_97, %c0_98] : memref<1x256xf32, #tpu.memory_space<vmem>>, vector<1x256xf32>
    %118 = vector.broadcast %117 : vector<1x256xf32> to vector<8x256xf32>
    %119 = arith.addf %116, %118 : vector<8x256xf32>
    %cst_99 = arith.constant 0.000000e+00 : f32
    %120 = vector.broadcast %cst_99 : f32 to vector<8x256xf32>
    %121 = arith.maximumf %119, %120 : vector<8x256xf32>
    %c0_100 = arith.constant 0 : index
    %c0_101 = arith.constant 0 : index
    %122 = vector.load %arg15[%c0_100, %c0_101] : memref<256x4xf32, #tpu.memory_space<vmem>>, vector<256x4xf32>
    %cst_102 = arith.constant dense<0.000000e+00> : vector<8x4xf32>
    %123 = tpu.matmul %121, %122, %cst_102 {dimension_numbers = #tpu.dot_dimension_numbers<[1], [0], [0], [1], [0, 0, 1, 1], [], []>} : vector<8x256xf32>, vector<256x4xf32>, vector<8x4xf32> -> vector<8x4xf32>
    %c0_103 = arith.constant 0 : index
    %c0_104 = arith.constant 0 : index
    %124 = vector.load %arg16[%c0_103, %c0_104] : memref<1x4xf32, #tpu.memory_space<vmem>>, vector<1x4xf32>
    %125 = vector.broadcast %124 : vector<1x4xf32> to vector<8x4xf32>
    %126 = arith.addf %123, %125 : vector<8x4xf32>
    %c0_105 = arith.constant 0 : index
    %c0_106 = arith.constant 0 : index
    %127 = vector.load %arg17[%c0_105, %c0_106] : memref<8x4xf32, #tpu.memory_space<vmem>>, vector<8x4xf32>
    tpu.vector_store %arg17[%c0_105, %c0_106], %126 {strides = array<i32>} : memref<8x4xf32, #tpu.memory_space<vmem>>, vector<8x4xf32>,
    return
  }
  func.func @transform_0(%arg0: i32) -> (i32, i32) {
    %c0_i32 = arith.constant 0 : i32
    %c0_i32_0 = arith.constant 0 : i32
    return %arg0, %c0_i32 : i32, i32
  }
  func.func @transform_1(%arg0: i32) -> (i32, i32) {
    %c0_i32 = arith.constant 0 : i32
    %c0_i32_0 = arith.constant 0 : i32
    %c0_i32_1 = arith.constant 0 : i32
    return %c0_i32, %c0_i32_0 : i32, i32
  }
  func.func @transform_2(%arg0: i32) -> (i32, i32) {
    %c0_i32 = arith.constant 0 : i32
    %c0_i32_0 = arith.constant 0 : i32
    %c0_i32_1 = arith.constant 0 : i32
    return %c0_i32, %c0_i32_0 : i32, i32
  }
  func.func @transform_3(%arg0: i32) -> (i32, i32) {
    %c0_i32 = arith.constant 0 : i32
    %c0_i32_0 = arith.constant 0 : i32
    %c0_i32_1 = arith.constant 0 : i32
    return %c0_i32, %c0_i32_0 : i32, i32
  }
  func.func @transform_4(%arg0: i32) -> (i32, i32) {
    %c0_i32 = arith.constant 0 : i32
    %c0_i32_0 = arith.constant 0 : i32
    %c0_i32_1 = arith.constant 0 : i32
    return %c0_i32, %c0_i32_0 : i32, i32
  }
  func.func @transform_5(%arg0: i32) -> (i32, i32) {
    %c0_i32 = arith.constant 0 : i32
    %c0_i32_0 = arith.constant 0 : i32
    %c0_i32_1 = arith.constant 0 : i32
    return %c0_i32, %c0_i32_0 : i32, i32
  }
  func.func @transform_6(%arg0: i32) -> (i32, i32) {
    %c0_i32 = arith.constant 0 : i32
    %c0_i32_0 = arith.constant 0 : i32
    %c0_i32_1 = arith.constant 0 : i32
    return %c0_i32, %c0_i32_0 : i32, i32
  }
  func.func @transform_7(%arg0: i32) -> (i32, i32) {
    %c0_i32 = arith.constant 0 : i32
    %c0_i32_0 = arith.constant 0 : i32
    %c0_i32_1 = arith.constant 0 : i32
    return %c0_i32, %c0_i32_0 : i32, i32
  }
  func.func @transform_8(%arg0: i32) -> (i32, i32) {
    %c0_i32 = arith.constant 0 : i32
    %c0_i32_0 = arith.constant 0 : i32
    %c0_i32_1 = arith.constant 0 : i32
    return %c0_i32, %c0_i32_0 : i32, i32
  }
  func.func @transform_9(%arg0: i32) -> (i32, i32) {
    %c0_i32 = arith.constant 0 : i32
    %c0_i32_0 = arith.constant 0 : i32
    %c0_i32_1 = arith.constant 0 : i32
    return %c0_i32, %c0_i32_0 : i32, i32
  }
  func.func @transform_10(%arg0: i32) -> (i32, i32) {
    %c0_i32 = arith.constant 0 : i32
    %c0_i32_0 = arith.constant 0 : i32
    %c0_i32_1 = arith.constant 0 : i32
    return %c0_i32, %c0_i32_0 : i32, i32
  }
  func.func @transform_11(%arg0: i32) -> (i32, i32) {
    %c0_i32 = arith.constant 0 : i32
    %c0_i32_0 = arith.constant 0 : i32
    %c0_i32_1 = arith.constant 0 : i32
    return %c0_i32, %c0_i32_0 : i32, i32
  }
  func.func @transform_12(%arg0: i32) -> (i32, i32) {
    %c0_i32 = arith.constant 0 : i32
    %c0_i32_0 = arith.constant 0 : i32
    %c0_i32_1 = arith.constant 0 : i32
    return %c0_i32, %c0_i32_0 : i32, i32
  }
  func.func @transform_13(%arg0: i32) -> (i32, i32) {
    %c0_i32 = arith.constant 0 : i32
    %c0_i32_0 = arith.constant 0 : i32
    %c0_i32_1 = arith.constant 0 : i32
    return %c0_i32, %c0_i32_0 : i32, i32
  }
  func.func @transform_14(%arg0: i32) -> (i32, i32) {
    %c0_i32 = arith.constant 0 : i32
    %c0_i32_0 = arith.constant 0 : i32
    %c0_i32_1 = arith.constant 0 : i32
    return %c0_i32, %c0_i32_0 : i32, i32
  }
  func.func @transform_15(%arg0: i32) -> (i32, i32) {
    %c0_i32 = arith.constant 0 : i32
    %c0_i32_0 = arith.constant 0 : i32
    %c0_i32_1 = arith.constant 0 : i32
    return %c0_i32, %c0_i32_0 : i32, i32
  }
  func.func @transform_16(%arg0: i32) -> (i32, i32) {
    %c0_i32 = arith.constant 0 : i32
    %c0_i32_0 = arith.constant 0 : i32
    return %arg0, %c0_i32 : i32, i32
  }
}

</mosaic_0001>

<bundles_post_ra>
// kernel: snake_model_forward.1
= control target key start
LH: loop header
LB: loop body
LE: loop exit
PB: predicated region body
PF: predicated region fallthrough
CT: control target
= control target key end

     0   :  { %s9634_s0 = inlined_call_operand.vmem [shape: f32[16,2048], index: 0, kind: input, shape index: {}]   ;;  %s9635_s1 = inlined_call_operand.hbm [shape: f32[256,256], index: 1, kind: input, shape index: {}]   ;;  %s9636_s2 = inlined_call_operand.hbm [shape: f32[384,256], index: 2, kind: input, shape index: {}]   ;;  %s9637_s3 = inlined_call_operand.vmem [shape: f32[1,256], index: 3, kind: input, shape index: {}]   ;;  %s9638_s4 = inlined_call_operand.vmem [shape: f32[512,256], index: 4, kind: input, shape index: {}]   ;;  %s9639_s5 = inlined_call_operand.vmem [shape: f32[768,256], index: 5, kind: input, shape index: {}]   ;;  %s9640_s6 = inlined_call_operand.vmem [shape: f32[1,256], index: 6, kind: input, shape index: {}]   ;;  %s9641_s7 = inlined_call_operand.hbm [shape: f32[512,128], index: 7, kind: input, shape index: {}]   ;;  %s9642_s8 = inlined_call_operand.hbm [shape: f32[768,128], index: 8, kind: input, shape index: {}]   ;;  %s9643_s9 = inlined_call_operand.vmem [shape: f32[1,128], index: 9, kind: input, shape index: {}]   ;;  %s9644_s10 = inlined_call_operand.vmem [shape: f32[256,512], index: 10, kind: input, shape index: {}]   ;;  %s9645_s11 = inlined_call_operand.vmem [shape: f32[1,512], index: 11, kind: input, shape index: {}]   ;;  %s9646_s12 = inlined_call_operand.hbm [shape: f32[512,256], index: 12, kind: input, shape index: {}]   ;;  %s9647_s13 = inlined_call_operand.vmem [shape: f32[1,256], index: 13, kind: input, shape index: {}]   ;;  %s9648_s14 = inlined_call_operand.vmem [shape: f32[256,4], index: 14, kind: input, shape index: {}]   ;;  %s9649_s15 = inlined_call_operand.vmem [shape: f32[1,4], index: 15, kind: input, shape index: {}]   ;;  %s9650_s16 = inlined_call_operand.vmem [shape: f32[16,4], index: 16, kind: output, shape index: {}]  }
   0x1   :  { %9732 = sst [smem:[#allocation78_spill]] %s9634_s0 }
   0x2   :  { %9733 = sst [smem:[#allocation79_spill]] %s9647_s13 }
   0x3   :  { %9734 = sst [smem:[#allocation80_spill]] %s9649_s15 }
   0x4   :  { %9735 = sst [smem:[#allocation81_spill]] %s9650_s16 }
   0x5   :  { %21 = vsyncpa [#allocation6], 0 }
   0x6   :  { %22 = vsyncpa [#allocation8], 0 }
   0x7   :  { %23 = vsyncpa [#allocation11], 0  ;;  %s6857_s21 = smov 0  }
   0x8 LB: > { %9736 = sst [smem:[#allocation16_spill]] %s6760_s21  ;;  %s6863_s22 = sadd.s32 4294967295, %s6760_s21   ;;  %s6760_s21 = sphi %s6857_s21, %s29_s21  }
   0x9   : > { %p4365_p0 = scmp.ge.s32.totalorder %s6760_s21, 1  ;;  %p401_p1 = scmp.lt.s32.totalorder %s6760_s21, 3 }
   0xa   : > { %p9656_p2 = scmp.eq.s32.totalorder %s6863_s22, 0  ;;  %s6762_s24 = smov [#allocation7]  }
   0xb   : > { %p6868_p3 = pnand %p4365_p0, %p401_p1  ;;  %s426_s25 = sshll.u32 %s6762_s24, 4  ;;  %s6872_s25 = int_to_ptr.vmem [resolvable:$true] %s426_s25 }
   0xc   : > { %s6763_s27 = smov [#allocation10]   ;;  %s6764_s29 = smov [#allocation5]  }
   0xd   : > { %s9737_s23 = scalar_select %p6868_p3, 1, 0 }
   0xe   : > { %p6558_p4 = pneg %p6868_p3  ;;  %s464_s28 = sshll.u32 %s6763_s27, 4  ;;  %s6882_s28 = int_to_ptr.vmem [resolvable:$true] %s464_s28 }
   0xf   : > { %s413_s30 = sshll.u32 %s6764_s29, 4  ;;  %s6602_s18 = scalar_lea.hbm %s9636_s2, 12288  ;;  %s6884_s30 = int_to_ptr.vmem [resolvable:$true] %s413_s30 }
  0x10   : > { %p6878_p5 = pnand %p9656_p2, %p6558_p4  ;;  %p6603_p6 = scmp.ne.s32.totalorder %s9636_s2, %s6602_s18 }
  0x11   : > { %p6609_p10 = scmp.lt.u32.totalorder %s6602_s18, %s9636_s2 }
  0x12   : > { %p6894_p7 = pneg %p6878_p5 }
  0x14   : > { %p6605_p8 = pnand %p6894_p7, %p6603_p6 }
  0x16   : > { %p6606_p9 = pneg %p6605_p8 }
  0x18   : > { %p6611_p11 = pnand %p6609_p10, %p6606_p9 }
  0x1a   : > { %6614 = shalt.err (!%p6611_p11)
}
  0x1b   : > { %s6615_s0 = scalar_lea.vmem %s6872_s25, 12288  ;;  %p6623_p1 = scmp.lt.s32.totalorder %s6872_s25, %s6872_s25 }
  0x1c   : > { %p6616_p12 = scmp.ne.s32.totalorder %s6872_s25, %s6615_s0  ;;  %p6624_p4 = scmp.lt.s32.totalorder %s6615_s0, %s6615_s0 }
  0x1e   : > { %p6618_p13 = pnand %p6616_p12, %p6894_p7  ;;  %p6625_p6 = por %p6624_p4, %p6623_p1 }
  0x20   : > { %p6619_p0 = pneg %p6618_p13 }
  0x22   : > { %p6626_p8 = pnand %p6625_p6, %p6619_p0 }
  0x24   : > { %6629 = shalt.err (!%p6626_p8)
}
  0x25   : > { %s9652_s17 = smov 256   ;;  %s9658_s18 = smov 16  }
  0x26   : > { %6564 = dma.hbm_to_vmem [thread:$0]  (!%p6878_p5), %s9636_s2, 12288, %s6872_s25, [#allocation8], %s9652_s17, %s9652_s17, %s9658_s18  }
  0x27   : > { %s6630_s0 = scalar_lea.hbm %s9642_s8, 12288 }
  0x28   : > { %p6631_p9 = scmp.ne.s32.totalorder %s9642_s8, %s6630_s0  ;;  %p6637_p12 = scmp.lt.u32.totalorder %s6630_s0, %s9642_s8 }
  0x2a   : > { %p6633_p10 = pnand %p6631_p9, %p6894_p7 }
  0x2c   : > { %p6634_p11 = pneg %p6633_p10 }
  0x2e   : > { %p6639_p13 = pnand %p6637_p12, %p6634_p11 }
  0x30   : > { %6642 = shalt.err (!%p6639_p13)
}
  0x31   : > { %s6643_s25 = scalar_lea.vmem %s6882_s28, 12288  ;;  %p6651_p6 = scmp.lt.s32.totalorder %s6882_s28, %s6882_s28 }
  0x32   : > { %p6644_p0 = scmp.ne.s32.totalorder %s6882_s28, %s6643_s25  ;;  %p6652_p8 = scmp.lt.s32.totalorder %s6643_s25, %s6643_s25 }
  0x34   : > { %p6646_p1 = pnand %p6644_p0, %p6894_p7  ;;  %p6653_p9 = por %p6652_p8, %p6651_p6 }
  0x36   : > { %p6647_p4 = pneg %p6646_p1 }
  0x38   : > { %p6654_p10 = pnand %p6653_p9, %p6647_p4 }
  0x3a   : > { %6657 = shalt.err (!%p6654_p10)
}
  0x3b   : > { %s9654_s16 = smov 128   ;;  %s9655_s13 = smov 8  }
  0x3c   : > { %6570 = dma.hbm_to_vmem [thread:$0]  (!%p6878_p5), %s9642_s8, 12288, %s6882_s28, [#allocation11], %s9654_s16, %s9654_s16, %s9655_s13  }
  0x3d   : > { %s6658_s27 = scalar_lea.hbm %s9635_s1, 8192 }
  0x3e   : > { %p6659_p11 = scmp.ne.s32.totalorder %s9635_s1, %s6658_s27  ;;  %p6665_p0 = scmp.lt.u32.totalorder %s6658_s27, %s9635_s1 }
  0x40   : > { %p6661_p12 = pnand %p6659_p11, %p6894_p7 }
  0x42   : > { %p6662_p13 = pneg %p6661_p12 }
  0x44   : > { %p6667_p1 = pnand %p6665_p0, %p6662_p13 }
  0x46   : > { %6670 = shalt.err (!%p6667_p1)
}
  0x47   : > { %s6671_s28 = scalar_lea.vmem %s6884_s30, 8192  ;;  %p6679_p9 = scmp.lt.s32.totalorder %s6884_s30, %s6884_s30 }
  0x48   : > { %p6672_p4 = scmp.ne.s32.totalorder %s6884_s30, %s6671_s28  ;;  %p6680_p10 = scmp.lt.s32.totalorder %s6671_s28, %s6671_s28 }
  0x4a   : > { %p6674_p6 = pnand %p6672_p4, %p6894_p7  ;;  %p6681_p11 = por %p6680_p10, %p6679_p9 }
  0x4c   : > { %p6675_p8 = pneg %p6674_p6 }
  0x4e   : > { %p6682_p12 = pnand %p6681_p11, %p6675_p8 }
  0x50   : > { %6685 = shalt.err (!%p6682_p12)
}
  0x51   : > { %s9740_s17 = smov 256   ;;  %s6769_s19 = smov [#allocation9]  }
  0x52   : > { %6561 = dma.hbm_to_vmem [thread:$0]  (!%p6878_p5), %s9635_s1, 8192, %s6884_s30, [#allocation6], %s9740_s17, %s9740_s17, %s9658_s18  }
  0x53   : > { %s451_s20 = sshll.u32 %s6769_s19, 4  ;;  %s6770_s27 = smov [#allocation12]   ;;  %s452_s20 = int_to_ptr.vmem [resolvable:$true] %s451_s20 }
  0x54   : > { %s486_s29 = sshll.u32 %s6770_s27, 4  ;;  %s6686_s28 = scalar_lea.hbm %s9641_s7, 8192  ;;  %s6970_s29 = int_to_ptr.vmem [resolvable:$true] %s486_s29 }
  0x55   : > { %p6687_p13 = scmp.ne.s32.totalorder %s9641_s7, %s6686_s28  ;;  %p6693_p4 = scmp.lt.u32.totalorder %s6686_s28, %s9641_s7 }
  0x57   : > { %p6689_p0 = pnand %p6687_p13, %p6894_p7 }
  0x59   : > { %p6690_p1 = pneg %p6689_p0 }
  0x5b   : > { %p6695_p6 = pnand %p6693_p4, %p6690_p1 }
  0x5d   : > { %6698 = shalt.err (!%p6695_p6)
}
  0x5e   : > { %s6699_s21 = scalar_lea.vmem %s452_s20, 8192  ;;  %p6707_p11 = scmp.lt.s32.totalorder %s452_s20, %s452_s20 }
  0x5f   : > { %p6700_p8 = scmp.ne.s32.totalorder %s452_s20, %s6699_s21  ;;  %p6708_p12 = scmp.lt.s32.totalorder %s6699_s21, %s6699_s21 }
  0x61   : > { %p6702_p9 = pnand %p6700_p8, %p6894_p7  ;;  %p6709_p2 = por %p6708_p12, %p6707_p11 }
  0x63   : > { %p6703_p10 = pneg %p6702_p9 }
  0x65   : > { %p6710_p3 = pnand %p6709_p2, %p6703_p10 }
  0x67   : > { %6713 = shalt.err (!%p6710_p3)
}
  0x68   : > { %s9741_s16 = smov 8   ;;  %s9742_s13 = smov 128  }
  0x69   : > { %6567 = dma.hbm_to_vmem [thread:$0]  (!%p6878_p5), %s9641_s7, 8192, %s452_s20, [#allocation8], %s9742_s13, %s9742_s13, %s9741_s16  }
  0x6a   : > { %s6714_s28 = scalar_lea.hbm %s9646_s12, 16384 }
  0x6b   : > { %p6715_p13 = scmp.ne.s32.totalorder %s9646_s12, %s6714_s28  ;;  %p6721_p0 = scmp.lt.u32.totalorder %s6714_s28, %s9646_s12 }
  0x6d   : > { %p6717_p2 = pnand %p6715_p13, %p6894_p7 }
  0x6f   : > { %p6718_p3 = pneg %p6717_p2 }
  0x71   : > { %p6723_p1 = pnand %p6721_p0, %p6718_p3 }
  0x73   : > { %6726 = shalt.err (!%p6723_p1)
}
  0x74   : > { %s6727_s20 = scalar_lea.vmem %s6970_s29, 16384  ;;  %p6735_p9 = scmp.lt.s32.totalorder %s6970_s29, %s6970_s29 }
  0x75   : > { %p6728_p4 = scmp.ne.s32.totalorder %s6970_s29, %s6727_s20  ;;  %p6736_p10 = scmp.lt.s32.totalorder %s6727_s20, %s6727_s20 }
  0x77   : > { %p6730_p6 = pnand %p6728_p4, %p6894_p7  ;;  %p6737_p11 = por %p6736_p10, %p6735_p9 }
  0x79   : > { %p6731_p8 = pneg %p6730_p6 }
  0x7b   : > { %p6738_p12 = pnand %p6737_p11, %p6731_p8 }
  0x7d   : > { %6741 = shalt.err (!%p6738_p12)
}
  0x7e   : > { %s9743_s18 = smov 16   ;;  %p9744_p13 = scmp.ne.s32.totalorder %s9737_s23, 0 }
  0x7f   : > { %6573 = dma.hbm_to_vmem [thread:$0]  (!%p6878_p5), %s9646_s12, 16384, %s6970_s29, [#allocation11], %s9740_s17, %s9740_s17, %s9743_s18  }
  0x80   : > { %519 = sbr.rel (%p9744_p13) target bundleno = 2137 (0x859), region = 84 }
  0x87   : > { %p9745_p7 = scmp.eq.s32.totalorder %s6863_s22, 0 }
  0x89   : > { %6747 = dma.done.wait (%p9745_p7), [#allocation6], 8192   ;;  %p9746_p2 = pmov %p9745_p7 }
  0x8b   : > { %6749 = vsyncadd (%p9746_p2), [#allocation6], 4294959104  ;;  %p9747_p3 = pmov %p9746_p2 }
  0x8c   : > { %p9748_p0 = pmov %p9746_p2 }
  0x8d   : > { %6751 = dma.done.wait (%p9747_p3), [#allocation8], 20480  }
  0x8e   : > { %6753 = vsyncadd (%p9748_p0), [#allocation8], 4294946816  ;;  %p9749_p1 = pmov %p9748_p0 }
  0x8f   : > { %p9750_p5 = pmov %p9748_p0 }
  0x90   : > { %6755 = dma.done.wait (%p9749_p1), [#allocation11], 28672  }
  0x91   : > { %6757 = vsyncadd (%p9750_p5), [#allocation11], 4294938624  ;;  %v594_v0 = vld [vmem:[#allocation5 + $0x8] sm:$0xff]  ;;  %v596_v1 = vld [vmem:[#allocation5 + $0x18] sm:$0xff]  ;;  %p584_p4 = scmp.lt.s32.totalorder %s6863_s22, 1  ;;  %s9755_s17 = sld [smem:[#allocation78_spill]] }
  0x92   : > { %v658_v2 = vld [vmem:[#allocation7 + $0x8] sm:$0xff]  ;;  %v4596_v3 = vpack.c.bf16 %v596_v1, %v594_v0  ;;  %v660_v4 = vld [vmem:[#allocation7 + $0x18] sm:$0xff]  ;;  %v593_v5 = vld [vmem:[#allocation5] sm:$0xff]  ;;  %s9889_s28 = sld [smem:[#allocation79_spill]]  ;;  %s9890_s20 = sld [smem:[#allocation80_spill]]  ;;  %vm4258_vm0 = vcmask 31744  }
  0x93   : > { %v595_v6 = vld [vmem:[#allocation5 + $0x10] sm:$0xff]  ;;  %v7033_v7 = vpack.c.bf16 %v660_v4, %v658_v2  ;;  %v657_v9 = vld [vmem:[#allocation7] sm:$0xff]  ;;  %v598_v11 = vld [vmem:[#allocation5 + $0x28] sm:$0xff]  ;;  %s9894_s22 = smov (!%p584_p4, %s6863_s22), 1  ;;  %s9891_s13 = sld [smem:[#allocation81_spill]] }
  0x94   : > { %v4598_v8 = vpack.c.bf16 %v595_v6, %v593_v5  ;;  %v659_v10 = vld [vmem:[#allocation7 + $0x10] sm:$0xff]  ;;  %4597 = vmatprep.subr.bf16.mxu1 %v4596_v3  ;;  %v600_v13 = vld [vmem:[#allocation5 + $0x38] sm:$0xff]  ;;  %v662_v14 = vld [vmem:[#allocation7 + $0x28] sm:$0xff]  ;;  %s4385_s23 = sshll.u32 %s9894_s22, 7  ;;  %s4380_s15 = sshll.u32 %s9894_s22, 3 }
  0x95   : > { %v7035_v12 = vpack.c.bf16 %v659_v10, %v657_v9  ;;  %v664_v15 = vld [vmem:[#allocation7 + $0x38] sm:$0xff]  ;;  %4757 = vmatprep.subr.bf16.mxu0 %v7033_v7  ;;  %v4600_v16 = vpack.c.bf16 %v600_v13, %v598_v11  ;;  %v597_v18 = vld [vmem:[#allocation5 + $0x20] sm:$0xff]  ;;  %v599_v19 = vld [vmem:[#allocation5 + $0x30] sm:$0xff] }
  0x96   : > { %4599 = vmatpush1.bf16.msra.mxu1 %v4598_v8  ;;  %v7038_v17 = vpack.c.bf16 %v664_v15, %v662_v14  ;;  %v661_v20 = vld [vmem:[#allocation7 + $0x20] sm:$0xff]  ;;  %v4602_v21 = vpack.c.bf16 %v599_v19, %v597_v18  ;;  %v663_v22 = vld [vmem:[#allocation7 + $0x30] sm:$0xff]  ;;  %v602_v23 = vld [vmem:[#allocation5 + $0x48] sm:$0xff] }
  0x97   : > { %4759 = vmatpush1.bf16.msra.mxu0 %v7035_v12  ;;  %v604_v24 = vld [vmem:[#allocation5 + $0x58] sm:$0xff]  ;;  %4601 = vmatprep.subr.bf16.mxu1 %v4600_v16  ;;  %v7042_v25 = vpack.c.bf16 %v663_v22, %v661_v20  ;;  %v666_v27 = vld [vmem:[#allocation7 + $0x48] sm:$0xff]  ;;  %v601_v29 = vld [vmem:[#allocation5 + $0x40] sm:$0xff]  ;;  %s7104_s29 = scalar_lea.vmem %s9755_s17, %s4385_s23 }
  0x98   : > { %4761 = vmatprep.subr.bf16.mxu0 %v7038_v17  ;;  %v4604_v26 = vpack.c.bf16 %v604_v24, %v602_v23  ;;  %v668_v28 = vld [vmem:[#allocation7 + $0x58] sm:$0xff]  ;;  %v603_v31 = vld [vmem:[#allocation5 + $0x50] sm:$0xff]  ;;  %v665_v32 = vld [vmem:[#allocation7 + $0x40] sm:$0xff] }
  0x99   : > { %v7044_v30 = vpack.c.bf16 %v668_v28, %v666_v27  ;;  %v667_v33 = vld [vmem:[#allocation7 + $0x50] sm:$0xff]  ;;  %v4606_v34 = vpack.c.bf16 %v603_v31, %v601_v29  ;;  %v606_v35 = vld [vmem:[#allocation5 + $0x68] sm:$0xff]  ;;  %v608_v36 = vld [vmem:[#allocation5 + $0x78] sm:$0xff]  ;;  %s592_s23 = scalar_lea.vmem %s9891_s13, %s4380_s15 }
  0x9a   : > { %4603 = vmatpush1.bf16.msra.mxu1 %v4602_v21  ;;  %v670_v37 = vld [vmem:[#allocation7 + $0x68] sm:$0xff]  ;;  %v7047_v38 = vpack.c.bf16 %v667_v33, %v665_v32  ;;  %v4608_v39 = vpack.c.bf16 %v608_v36, %v606_v35  ;;  %v672_v40 = vld [vmem:[#allocation7 + $0x78] sm:$0xff]  ;;  %v605_v41 = vld [vmem:[#allocation5 + $0x60] sm:$0xff] }
  0x9b   : > { %4763 = vmatpush1.bf16.msra.mxu0 %v7042_v25  ;;  %4605 = vmatprep.subr.bf16.mxu1 %v4604_v26  ;;  %v607_v42 = vld [vmem:[#allocation5 + $0x70] sm:$0xff]  ;;  %v7050_v43 = vpack.c.bf16 %v672_v40, %v670_v37  ;;  %v669_v44 = vld [vmem:[#allocation7 + $0x60] sm:$0xff]  ;;  %v610_v46 = vld [vmem:[#allocation5 + $0x88] sm:$0xff] }
  0x9c   : > { %4765 = vmatprep.subr.bf16.mxu0 %v7044_v30  ;;  %v671_v45 = vld [vmem:[#allocation7 + $0x70] sm:$0xff]  ;;  %v612_v47 = vld [vmem:[#allocation5 + $0x98] sm:$0xff]  ;;  %v674_v48 = vld [vmem:[#allocation7 + $0x88] sm:$0xff]  ;;  %v4610_v50 = vpack.c.bf16 %v607_v42, %v605_v41 }
  0x9d   : > { %v676_v49 = vld [vmem:[#allocation7 + $0x98] sm:$0xff]  ;;  %v7053_v51 = vpack.c.bf16 %v671_v45, %v669_v44  ;;  %v4612_v52 = vpack.c.bf16 %v612_v47, %v610_v46  ;;  %v609_v53 = vld [vmem:[#allocation5 + $0x80] sm:$0xff]  ;;  %v611_v54 = vld [vmem:[#allocation5 + $0x90] sm:$0xff] }
  0x9e   : > { %4607 = vmatpush1.bf16.msra.mxu1 %v4606_v34  ;;  %v673_v55 = vld [vmem:[#allocation7 + $0x80] sm:$0xff]  ;;  %v7056_v56 = vpack.c.bf16 %v676_v49, %v674_v48  ;;  %v675_v57 = vld [vmem:[#allocation7 + $0x90] sm:$0xff]  ;;  %v614_v58 = vld [vmem:[#allocation5 + $0xa8] sm:$0xff]  ;;  %v4614_v62 = vpack.c.bf16 %v611_v54, %v609_v53 }
  0x9f   : > { %4767 = vmatpush1.bf16.msra.mxu0 %v7047_v38  ;;  %4609 = vmatprep.subr.bf16.mxu1 %v4608_v39  ;;  %v616_v59 = vld [vmem:[#allocation5 + $0xb8] sm:$0xff]  ;;  %v678_v60 = vld [vmem:[#allocation7 + $0xa8] sm:$0xff]  ;;  %v7059_v63 = vpack.c.bf16 %v675_v57, %v673_v55  ;;  %v613_v1 = vld [vmem:[#allocation5 + $0xa0] sm:$0xff] }
  0xa0   : > { %4769 = vmatprep.subr.bf16.mxu0 %v7050_v43  ;;  %v680_v61 = vld [vmem:[#allocation7 + $0xb8] sm:$0xff]  ;;  %v4616_v0 = vpack.c.bf16 %v616_v59, %v614_v58  ;;  %v615_v2 = vld [vmem:[#allocation5 + $0xb0] sm:$0xff]  ;;  %v677_v3 = vld [vmem:[#allocation7 + $0xa0] sm:$0xff] }
  0xa1   : > { %v7062_v4 = vpack.c.bf16 %v680_v61, %v678_v60  ;;  %v679_v5 = vld [vmem:[#allocation7 + $0xb0] sm:$0xff]  ;;  %v618_v6 = vld [vmem:[#allocation5 + $0xc8] sm:$0xff]  ;;  %v620_v8 = vld [vmem:[#allocation5 + $0xd8] sm:$0xff]  ;;  %v4618_v11 = vpack.c.bf16 %v615_v2, %v613_v1 }
  0xa2   : > { %4611 = vmatpush1.bf16.msra.mxu1 %v4610_v50  ;;  %v682_v9 = vld [vmem:[#allocation7 + $0xc8] sm:$0xff]  ;;  %v684_v10 = vld [vmem:[#allocation7 + $0xd8] sm:$0xff]  ;;  %v7065_v13 = vpack.c.bf16 %v679_v5, %v677_v3  ;;  %v4620_v14 = vpack.c.bf16 %v620_v8, %v618_v6  ;;  %v617_v15 = vld [vmem:[#allocation5 + $0xc0] sm:$0xff] }
  0xa3   : > { %4771 = vmatpush1.bf16.msra.mxu0 %v7053_v51  ;;  %4613 = vmatprep.subr.bf16.mxu1 %v4612_v52  ;;  %v619_v16 = vld [vmem:[#allocation5 + $0xd0] sm:$0xff]  ;;  %v681_v18 = vld [vmem:[#allocation7 + $0xc0] sm:$0xff]  ;;  %v7068_v19 = vpack.c.bf16 %v684_v10, %v682_v9  ;;  %v622_v21 = vld [vmem:[#allocation5 + $0xe8] sm:$0xff] }
  0xa4   : > { %4773 = vmatprep.subr.bf16.mxu0 %v7056_v56  ;;  %v683_v20 = vld [vmem:[#allocation7 + $0xd0] sm:$0xff]  ;;  %v624_v22 = vld [vmem:[#allocation5 + $0xf8] sm:$0xff]  ;;  %v686_v23 = vld [vmem:[#allocation7 + $0xe8] sm:$0xff]  ;;  %v4622_v26 = vpack.c.bf16 %v619_v16, %v617_v15 }
  0xa5   : > { %v688_v24 = vld [vmem:[#allocation7 + $0xf8] sm:$0xff]  ;;  %v7071_v27 = vpack.c.bf16 %v683_v20, %v681_v18  ;;  %v4624_v28 = vpack.c.bf16 %v624_v22, %v622_v21  ;;  %v621_v29 = vld [vmem:[#allocation5 + $0xe0] sm:$0xff]  ;;  %v623_v31 = vld [vmem:[#allocation5 + $0xf0] sm:$0xff] }
  0xa6   : > { %4615 = vmatpush1.bf16.msra.mxu1 %v4614_v62  ;;  %v685_v32 = vld [vmem:[#allocation7 + $0xe0] sm:$0xff]  ;;  %v7074_v33 = vpack.c.bf16 %v688_v24, %v686_v23  ;;  %v687_v34 = vld [vmem:[#allocation7 + $0xf0] sm:$0xff]  ;;  %v626_v35 = vld [vmem:[#allocation5 + $0x108] sm:$0xff]  ;;  %v4626_v40 = vpack.c.bf16 %v623_v31, %v621_v29 }
  0xa7   : > { %4775 = vmatpush1.bf16.msra.mxu0 %v7059_v63  ;;  %4617 = vmatprep.subr.bf16.mxu1 %v4616_v0  ;;  %9751 = vst [vmem:[#allocation17_spill] sm:$0xff] %v7071_v27  ;;  %v628_v36 = vld [vmem:[#allocation5 + $0x118] sm:$0xff]  ;;  %v690_v37 = vld [vmem:[#allocation7 + $0x108] sm:$0xff]  ;;  %v7078_v41 = vpack.c.bf16 %v687_v34, %v685_v32  ;;  %v625_v44 = vld [vmem:[#allocation5 + $0x100] sm:$0xff] }
  0xa8   : > { %4777 = vmatprep.subr.bf16.mxu0 %v7062_v4  ;;  %9752 = vst [vmem:[#allocation18_spill] sm:$0xff] %v7074_v33  ;;  %v692_v39 = vld [vmem:[#allocation7 + $0x118] sm:$0xff]  ;;  %v4628_v42 = vpack.c.bf16 %v628_v36, %v626_v35  ;;  %v627_v45 = vld [vmem:[#allocation5 + $0x110] sm:$0xff]  ;;  %v689_v46 = vld [vmem:[#allocation7 + $0x100] sm:$0xff] }
  0xa9   : > { %9753 = vst [vmem:[#allocation19_spill] sm:$0xff] %v7078_v41  ;;  %v7081_v47 = vpack.c.bf16 %v692_v39, %v690_v37  ;;  %v691_v48 = vld [vmem:[#allocation7 + $0x110] sm:$0xff]  ;;  %v630_v49 = vld [vmem:[#allocation5 + $0x128] sm:$0xff]  ;;  %v632_v50 = vld [vmem:[#allocation5 + $0x138] sm:$0xff]  ;;  %v4630_v54 = vpack.c.bf16 %v627_v45, %v625_v44 }
  0xaa   : > { %4619 = vmatpush1.bf16.msra.mxu1 %v4618_v11  ;;  %v694_v52 = vld [vmem:[#allocation7 + $0x128] sm:$0xff]  ;;  %v696_v53 = vld [vmem:[#allocation7 + $0x138] sm:$0xff]  ;;  %v7089_v55 = vpack.c.bf16 %v691_v48, %v689_v46  ;;  %v4632_v57 = vpack.c.bf16 %v632_v50, %v630_v49  ;;  %v629_v58 = vld [vmem:[#allocation5 + $0x120] sm:$0xff] }
  0xab   : > { %4779 = vmatpush1.bf16.msra.mxu0 %v7065_v13  ;;  %4621 = vmatprep.subr.bf16.mxu1 %v4620_v14  ;;  %9754 = vst [vmem:[#allocation20_spill] sm:$0xff] %v7081_v47  ;;  %v631_v59 = vld [vmem:[#allocation5 + $0x130] sm:$0xff]  ;;  %v693_v60 = vld [vmem:[#allocation7 + $0x120] sm:$0xff]  ;;  %v7092_v61 = vpack.c.bf16 %v696_v53, %v694_v52  ;;  %v634_v0 = vld [vmem:[#allocation5 + $0x148] sm:$0xff] }
  0xac   : > { %4781 = vmatprep.subr.bf16.mxu0 %v7068_v19  ;;  %v695_v62 = vld [vmem:[#allocation7 + $0x130] sm:$0xff]  ;;  %v636_v1 = vld [vmem:[#allocation5 + $0x158] sm:$0xff]  ;;  %v698_v2 = vld [vmem:[#allocation7 + $0x148] sm:$0xff]  ;;  %v4634_v5 = vpack.c.bf16 %v631_v59, %v629_v58 }
  0xad   : > { %v700_v3 = vld [vmem:[#allocation7 + $0x158] sm:$0xff]  ;;  %v7096_v6 = vpack.c.bf16 %v695_v62, %v693_v60  ;;  %v4636_v8 = vpack.c.bf16 %v636_v1, %v634_v0  ;;  %v633_v9 = vld [vmem:[#allocation5 + $0x140] sm:$0xff]  ;;  %v635_v10 = vld [vmem:[#allocation5 + $0x150] sm:$0xff] }
  0xae   : > { %4623 = vmatpush1.bf16.msra.mxu1 %v4622_v26  ;;  %v697_v11 = vld [vmem:[#allocation7 + $0x140] sm:$0xff]  ;;  %v7099_v14 = vpack.c.bf16 %v700_v3, %v698_v2  ;;  %v699_v15 = vld [vmem:[#allocation7 + $0x150] sm:$0xff]  ;;  %v638_v16 = vld [vmem:[#allocation5 + $0x168] sm:$0xff]  ;;  %v4638_v22 = vpack.c.bf16 %v635_v10, %v633_v9 }
  0xaf   : > { %4783 = vmatpush1.bf16.msra.mxu0 %v7071_v27  ;;  %4625 = vmatprep.subr.bf16.mxu1 %v4624_v28  ;;  %v640_v18 = vld [vmem:[#allocation5 + $0x178] sm:$0xff]  ;;  %v702_v20 = vld [vmem:[#allocation7 + $0x168] sm:$0xff]  ;;  %v637_v23 = vld [vmem:[#allocation5 + $0x160] sm:$0xff]  ;;  %v7107_v24 = vpack.c.bf16 %v699_v15, %v697_v11 }
  0xb0   : > { %4785 = vmatprep.subr.bf16.mxu0 %v7074_v33  ;;  %v704_v21 = vld [vmem:[#allocation7 + $0x178] sm:$0xff]  ;;  %v4640_v26 = vpack.c.bf16 %v640_v18, %v638_v16  ;;  %v639_v28 = vld [vmem:[#allocation5 + $0x170] sm:$0xff]  ;;  %v701_v29 = vld [vmem:[#allocation7 + $0x160] sm:$0xff] }
  0xb1   : > { %v703_v31 = vld [vmem:[#allocation7 + $0x170] sm:$0xff]  ;;  %v7110_v32 = vpack.c.bf16 %v704_v21, %v702_v20  ;;  %v642_v34 = vld [vmem:[#allocation5 + $0x188] sm:$0xff]  ;;  %v644_v35 = vld [vmem:[#allocation5 + $0x198] sm:$0xff] }
  0xb2   : > { %4627 = vmatpush1.bf16.msra.mxu1 %v4626_v40  ;;  %v7113_v36 = vld [vmem:[%s7104_s29 + $0x8] sm:$0xff]  ;;  %v708_v39 = vld [vmem:[#allocation7 + $0x198] sm:$0xff]  ;;  %v992_v40 = vld [vmem:[%s7104_s29 + $0x20] sm:$0xff]  ;;  %v7118_v44 = vpack.c.bf16 %v703_v31, %v701_v29  ;;  %v4644_v45 = vpack.c.bf16 %v644_v35, %v642_v34 }
  0xb3   : > { %4787 = vmatpush1.bf16.msra.mxu0 %v7078_v41  ;;  %4629 = vmatprep.subr.bf16.mxu1 %v4628_v42  ;;  %v706_v37 = vld [vmem:[#allocation7 + $0x188] sm:$0xff]  ;;  %v4642_v42 = vpack.c.bf16 %v639_v28, %v637_v23  ;;  %v641_v46 = vld [vmem:[#allocation5 + $0x180] sm:$0xff]  ;;  %v643_v48 = vld [vmem:[#allocation5 + $0x190] sm:$0xff] }
  0xb4   : > { %4789 = vmatprep.subr.bf16.mxu0 %v7081_v47  ;;  %831 = vmatprep.mubr.f32.mxu1 %v7113_v36  ;;  %v705_v49 = vld [vmem:[#allocation7 + $0x180] sm:$0xff]  ;;  %v7121_v50 = vpack.c.bf16 %v708_v39, %v706_v37  ;;  %v707_v52 = vld [vmem:[#allocation7 + $0x190] sm:$0xff]  ;;  %v646_v53 = vld [vmem:[#allocation5 + $0x1a8] sm:$0xff]  ;;  %v4646_v59 = vpack.c.bf16 %v643_v48, %v641_v46 }
  0xb5   : > { %1058 = vmatprep.mubr.f32.mxu0 %v992_v40  ;;  %v712_v58 = vld [vmem:[#allocation7 + $0x1b8] sm:$0xff]  ;;  %v7124_v60 = vpack.c.bf16 %v707_v52, %v705_v49  ;;  %v645_v0 = vld [vmem:[#allocation5 + $0x1a0] sm:$0xff]  ;;  %v647_v1 = vld [vmem:[#allocation5 + $0x1b0] sm:$0xff] }
  0xb6   : > { %4631 = vmatpush1.bf16.msra.mxu1 %v4630_v54  ;;  %v648_v54 = vld [vmem:[#allocation5 + $0x1b8] sm:$0xff]  ;;  %v709_v2 = vld [vmem:[#allocation7 + $0x1a0] sm:$0xff]  ;;  %v714_v10 = vld [vmem:[#allocation7 + $0x1c8] sm:$0xff]  ;;  %v4650_v15 = vpack.c.bf16 %v647_v1, %v645_v0 }
  0xb7   : > { %4791 = vmatpush1.bf16.msra.mxu0 %v7089_v55  ;;  %4633 = vmatprep.subr.bf16.mxu1 %v4632_v57  ;;  %v710_v57 = vld [vmem:[#allocation7 + $0x1a8] sm:$0xff]  ;;  %v4648_v62 = vpack.c.bf16 %v648_v54, %v646_v53  ;;  %v652_v9 = vld [vmem:[#allocation5 + $0x1d8] sm:$0xff]  ;;  %v649_v20 = vld [vmem:[#allocation5 + $0x1c0] sm:$0xff] }
  0xb8   : > { %4793 = vmatprep.subr.bf16.mxu0 %v7092_v61  ;;  %v7127_v3 = vpack.c.bf16 %v712_v58, %v710_v57  ;;  %v716_v11 = vld [vmem:[#allocation7 + $0x1d8] sm:$0xff]  ;;  %v651_v21 = vld [vmem:[#allocation5 + $0x1d0] sm:$0xff]  ;;  %v654_v28 = vld [vmem:[#allocation5 + $0x1e8] sm:$0xff] }
  0xb9   : > { %v7133_v23 = vpack.c.bf16 %v716_v11, %v714_v10  ;;  %v656_v29 = vld [vmem:[#allocation5 + $0x1f8] sm:$0xff]  ;;  %v718_v31 = vld [vmem:[#allocation7 + $0x1e8] sm:$0xff]  ;;  %v4654_v35 = vpack.c.bf16 %v651_v21, %v649_v20  ;;  %v653_v40 = vld [vmem:[#allocation5 + $0x1e0] sm:$0xff] }
  0xba   : > { %4635 = vmatpush1.bf16.msra.mxu1 %v4634_v5  ;;  %v711_v5 = vld [vmem:[#allocation7 + $0x1b0] sm:$0xff]  ;;  %v720_v34 = vld [vmem:[#allocation7 + $0x1f8] sm:$0xff]  ;;  %v4656_v39 = vpack.c.bf16 %v656_v29, %v654_v28  ;;  %v717_v46 = vld [vmem:[#allocation7 + $0x1e0] sm:$0xff]  ;;  %v9659_v28 = vmov 0.0  }
  0xbb   : > { %4795 = vmatpush1.bf16.msra.mxu0 %v7096_v6  ;;  %4637 = vmatprep.subr.bf16.mxu1 %v4636_v8  ;;  %v650_v8 = vld [vmem:[#allocation5 + $0x1c8] sm:$0xff]  ;;  %v7130_v16 = vpack.c.bf16 %v711_v5, %v709_v2  ;;  %v719_v48 = vld [vmem:[#allocation7 + $0x1f0] sm:$0xff]  ;;  %v724_v52 = vld [vmem:[#allocation7 + $0x218] sm:$0xff] }
  0xbc   : > { %4797 = vmatprep.subr.bf16.mxu0 %v7099_v14  ;;  %v4652_v18 = vpack.c.bf16 %v652_v9, %v650_v8  ;;  %v722_v49 = vld [vmem:[#allocation7 + $0x208] sm:$0xff]  ;;  %v7142_v54 = vpack.c.bf16 %v719_v48, %v717_v46  ;;  %v721_v58 = vld [vmem:[#allocation7 + $0x200] sm:$0xff]  ;;  %v728_v0 = vld [vmem:[#allocation7 + $0x238] sm:$0xff] }
  0xbd   : > { %v7145_v57 = vpack.c.bf16 %v724_v52, %v722_v49  ;;  %v754_v1 = vld [vmem:[%s7104_s29] sm:$0xff]  ;;  %v7151_v2 = vld [vmem:[%s7104_s29 + $0x18] sm:$0xff]  ;;  %v727_v10 = vld [vmem:[#allocation7 + $0x230] sm:$0xff] }
  0xbe   : > { %4639 = vmatpush1.bf16.msra.mxu1 %v4638_v22  ;;  %v713_v22 = vld [vmem:[#allocation7 + $0x1c0] sm:$0xff]  ;;  %v730_v11 = vld [vmem:[#allocation7 + $0x248] sm:$0xff]  ;;  %v740_v46 = vld [vmem:[#allocation7 + $0x298] sm:$0xff] }
  0xbf   : > { %4799 = vmatpush1.bf16.msra.mxu0 %v7107_v24  ;;  %4641 = vmatprep.subr.bf16.mxu1 %v4640_v26  ;;  %v715_v26 = vld [vmem:[#allocation7 + $0x1d0] sm:$0xff]  ;;  %v725_v9 = vld [vmem:[#allocation7 + $0x220] sm:$0xff]  ;;  %v734_v29 = vld [vmem:[#allocation7 + $0x268] sm:$0xff] }
  0xc0   : > { %4801 = vmatprep.subr.bf16.mxu0 %v7110_v32  ;;  %v7136_v37 = vpack.c.bf16 %v715_v26, %v713_v22  ;;  %v7163_v20 = vpack.c.bf16 %v727_v10, %v725_v9  ;;  %v729_v22 = vld [vmem:[#allocation7 + $0x240] sm:$0xff]  ;;  %v731_v26 = vld [vmem:[#allocation7 + $0x250] sm:$0xff]  ;;  %v746_v10 = vld [vmem:[#allocation7 + $0x2c8] sm:$0xff] }
  0xc1   : > { %v737_v52 = vld [vmem:[#allocation7 + $0x280] sm:$0xff]  ;;  %v743_v9 = vld [vmem:[#allocation7 + $0x2b0] sm:$0xff] }
  0xc2   : > { %4643 = vmatpush1.bf16.msra.mxu1 %v4642_v42  ;;  %v655_v42 = vld [vmem:[#allocation5 + $0x1f0] sm:$0xff] }
  0xc3   : > { %4803 = vmatpush1.bf16.msra.mxu0 %v7118_v44  ;;  %4645 = vmatprep.subr.bf16.mxu1 %v4644_v45  ;;  %v7139_v45 = vpack.c.bf16 %v720_v34, %v718_v31  ;;  %v4658_v53 = vpack.c.bf16 %v655_v42, %v653_v40  ;;  %v736_v31 = vld [vmem:[#allocation7 + $0x278] sm:$0xff]  ;;  %v7172_v34 = vpack.c.bf16 %v731_v26, %v729_v22  ;;  %v735_v40 = vld [vmem:[#allocation7 + $0x270] sm:$0xff]  ;;  %v738_v42 = vld [vmem:[#allocation7 + $0x288] sm:$0xff] }
  0xc4   : > { %4805 = vmatprep.subr.bf16.mxu0 %v7121_v50  ;;  %v7183_v49 = vpack.c.bf16 %v740_v46, %v738_v42  ;;  %v745_v22 = vld [vmem:[#allocation7 + $0x2c0] sm:$0xff]  ;;  %v747_v26 = vld [vmem:[#allocation7 + $0x2d0] sm:$0xff] }
  0xc5   : > { %v749_v42 = vld [vmem:[#allocation7 + $0x2e0] sm:$0xff]  ;;  %v751_v46 = vld [vmem:[#allocation7 + $0x2f0] sm:$0xff] }
  0xc6   : > { %4647 = vmatpush1.bf16.msra.mxu1 %v4646_v59  ;;  %v723_v59 = vld [vmem:[#allocation7 + $0x210] sm:$0xff] }
  0xc7   : > { %4807 = vmatpush1.bf16.msra.mxu0 %v7124_v60  ;;  %4649 = vmatprep.subr.bf16.mxu1 %v4648_v62  ;;  %v726_v62 = vld [vmem:[#allocation7 + $0x228] sm:$0xff]  ;;  %v7153_v5 = vpack.c.bf16 %v723_v59, %v721_v58  ;;  %v744_v59 = vld [vmem:[#allocation7 + $0x2b8] sm:$0xff] }
  0xc8   : > { %4809 = vmatprep.subr.bf16.mxu0 %v7127_v3  ;;  %v7156_v8 = vpack.c.bf16 %v728_v0, %v726_v62  ;;  %v742_v58 = vld [vmem:[#allocation7 + $0x2a8] sm:$0xff] }
  0xc9   : > { %v7191_v0 = vpack.c.bf16 %v744_v59, %v742_v58  ;;  %v1290_v58 = vld [vmem:[%s7104_s29 + $0x40] sm:$0xff]  ;;  %v1141_v59 = vld [vmem:[%s7104_s29 + $0x30] sm:$0xff] }
  0xca   : > { %4651 = vmatpush1.bf16.msra.mxu1 %v4650_v15  ;;  %v732_v15 = vld [vmem:[#allocation7 + $0x258] sm:$0xff] }
  0xcb   : > { %4811 = vmatpush1.bf16.msra.mxu0 %v7130_v16  ;;  %4653 = vmatprep.subr.bf16.mxu1 %v4652_v18  ;;  %v843_v18 = vld [vmem:[%s7104_s29 + $0x10] sm:$0xff]  ;;  %v7166_v21 = vpack.c.bf16 %v732_v15, %v730_v11  ;;  %v748_v11 = vld [vmem:[#allocation7 + $0x2d8] sm:$0xff] }
  0xcc   : > { %4813 = vmatprep.subr.bf16.mxu0 %v7133_v23 }
  0xce   : > { %4655 = vmatpush1.bf16.msra.mxu1 %v4654_v35  ;;  %v7175_v35 = vpack.c.bf16 %v736_v31, %v734_v29  ;;  %v750_v29 = vld [vmem:[#allocation7 + $0x2e8] sm:$0xff]  ;;  %v752_v31 = vld [vmem:[#allocation7 + $0x2f8] sm:$0xff] }
  0xcf   : > { %4815 = vmatpush1.bf16.msra.mxu0 %v7136_v37  ;;  %4657 = vmatprep.subr.bf16.mxu1 %v4656_v39  ;;  %v733_v39 = vld [vmem:[#allocation7 + $0x260] sm:$0xff] }
  0xd0   : > { %4817 = vmatprep.subr.bf16.mxu0 %v7139_v45  ;;  %v7180_v48 = vpack.c.bf16 %v735_v40, %v733_v39  ;;  %v7204_v39 = vpack.c.bf16 %v747_v26, %v745_v22  ;;  %v7207_v40 = vpack.c.bf16 %v752_v31, %v750_v29 }
  0xd2   : > { %4659 = vmatpush1.bf16.msra.mxu1 %v4658_v53  ;;  %v739_v53 = vld [vmem:[#allocation7 + $0x290] sm:$0xff] }
  0xd3   : > { %4819 = vmatpush1.bf16.msra.mxu0 %v7142_v54  ;;  %4661 = vmatprep.subr.bf16.mxu1 %v7033_v7  ;;  %v7188_v62 = vpack.c.bf16 %v739_v53, %v737_v52  ;;  %v7212_v52 = vpack.c.bf16 %v751_v46, %v749_v42  ;;  %v7219_v53 = vld [vmem:[%s7104_s29 + $0x28] sm:$0xff]  ;;  %v7437_v42 = vld [vmem:[%s9637_s3] sm:$0x3] }
  0xd4   : > { %4821 = vmatprep.subr.bf16.mxu0 %v7145_v57 }
  0xd5   : > { %832 = vmatmul.mubr.f32.vlgmr.msra.gmra.mrb[0].mxu1 %v754_v1  ;;  %v741_v1 = vld [vmem:[#allocation7 + $0x2a0] sm:$0xff] }
  0xd6   : > { %4663 = vmatpush1.bf16.msra.mxu1 %v7035_v12  ;;  %1059 = vmatmul.mubr.f32.vlgmr.msra.gmra.mrb[0].mxu0 %v7151_v2  ;;  %v7196_v15 = vpack.c.bf16 %v743_v9, %v741_v1  ;;  %v1588_v1 = vld [vmem:[%s7104_s29 + $0x60] sm:$0xff]  ;;  %v7400_v9 = vld [vmem:[%s7104_s29 + $0x58] sm:$0xff] }
  0xd7   : > { %4823 = vmatpush1.bf16.msra.mxu0 %v7153_v5  ;;  %4665 = vmatprep.subr.bf16.mxu1 %v7038_v17 }
  0xd8   : > { %4825 = vmatprep.subr.bf16.mxu0 %v7156_v8  ;;  %1129 = vmatprep.mubr.f32.mxu0 %v9659_v28 }
  0xd9   : > { %909 = vmatprep.mubr.f32.mxu1 %v843_v18  ;;  %v7199_v18 = vpack.c.bf16 %v748_v11, %v746_v10  ;;  %v1439_v10 = vld [vmem:[%s7104_s29 + $0x50] sm:$0xff]  ;;  %v757_v11 = vlaneseq }
  0xda   : > { %4667 = vmatpush1.bf16.msra.mxu1 %v7042_v25 }
  0xdb   : > { %4827 = vmatpush1.bf16.msra.mxu0 %v7163_v20  ;;  %4669 = vmatprep.subr.bf16.mxu1 %v7044_v30  ;;  %v7423_v22 = vshrl.u32 %v757_v11, 7  ;;  %v1890_v11 = vld [vmem:[%s9638_s4 + $0x28] sm:$0xff] }
  0xdc   : > { %4829 = vmatprep.subr.bf16.mxu0 %v7166_v21 }
  0xdd   : > { %9756 = vst [vmem:[#allocation21_spill] sm:$0xff] %v7423_v22  ;;  %v7432_v29 = vsub.s32 1, %v7423_v22 }
  0xde   : > { %4671 = vmatpush1.bf16.msra.mxu1 %v7047_v38 }
  0xdf   : > { %4831 = vmatpush1.bf16.msra.mxu0 %v7172_v34  ;;  %4673 = vmatprep.subr.bf16.mxu1 %v7050_v43  ;;  %9757 = vst [vmem:[#allocation22_spill] sm:$0xff] %v7432_v29  ;;  %v7445_v46 = vrot.slane %v7437_v42, %v7432_v29 }
  0xe0   : > { %4833 = vmatprep.subr.bf16.mxu0 %v7175_v35 }
  0xe2   : > { %4675 = vmatpush1.bf16.msra.mxu1 %v7053_v51 }
  0xe3   : > { %4835 = vmatpush1.bf16.msra.mxu0 %v7180_v48  ;;  %4677 = vmatprep.subr.bf16.mxu1 %v7056_v56 }
  0xe4   : > { %4837 = vmatprep.subr.bf16.mxu0 %v7183_v49 }
  0xe6   : > { %4679 = vmatpush1.bf16.msra.mxu1 %v7059_v63 }
  0xe7   : > { %4839 = vmatpush1.bf16.msra.mxu0 %v7188_v62  ;;  %4681 = vmatprep.subr.bf16.mxu1 %v7062_v4 }
  0xe8   : > { %4841 = vmatprep.subr.bf16.mxu0 %v7191_v0 }
  0xea   : > { %4683 = vmatpush1.bf16.msra.mxu1 %v7065_v13 }
  0xeb   : > { %4843 = vmatpush1.bf16.msra.mxu0 %v7196_v15  ;;  %4685 = vmatprep.subr.bf16.mxu1 %v7068_v19 }
  0xec   : > { %4845 = vmatprep.subr.bf16.mxu0 %v7199_v18 }
  0xee   : > { %4687 = vmatpush1.bf16.msra.mxu1 %v7071_v27 }
  0xef   : > { %4847 = vmatpush1.bf16.msra.mxu0 %v7204_v39  ;;  %4689 = vmatprep.subr.bf16.mxu1 %v7074_v33 }
  0xf0   : > { %4849 = vmatprep.subr.bf16.mxu0 %v7207_v40 }
  0xf2   : > { %4691 = vmatpush1.bf16.msra.mxu1 %v7078_v41 }
  0xf3   : > { %4851 = vmatpush1.bf16.msra.mxu0 %v7212_v52  ;;  %4693 = vmatprep.subr.bf16.mxu1 %v7081_v47 }
  0xf4   : > { %4949 = vmatprep.subr.bf16.mxu0 %v7033_v7 }
  0xf6   : > { %4695 = vmatpush1.bf16.msra.mxu1 %v7089_v55  ;;  %1130 = vmatmul.mubr.f32.vlgmr.msra.gmra.mrb[0].mxu0 %v7219_v53 }
  0xf7   : > { %4951 = vmatpush1.bf16.msra.mxu0 %v7035_v12  ;;  %4697 = vmatprep.subr.bf16.mxu1 %v7092_v61 }
  0xf8   : > { %4953 = vmatprep.subr.bf16.mxu0 %v7038_v17  ;;  %1356 = vmatprep.mubr.f32.mxu0 %v1290_v58  ;;  %v1888_v58 = vld [vmem:[%s9638_s4 + $0x18] sm:$0xff] }
  0xfa   : > { %4699 = vmatpush1.bf16.msra.mxu1 %v7096_v6 }
  0xfb   : > { %4955 = vmatpush1.bf16.msra.mxu0 %v7042_v25  ;;  %4701 = vmatprep.subr.bf16.mxu1 %v7099_v14 }
  0xfc   : > { %4957 = vmatprep.subr.bf16.mxu0 %v7044_v30 }
  0xfe   : > { %4703 = vmatpush1.bf16.msra.mxu1 %v7107_v24 }
  0xff   : > { %4959 = vmatpush1.bf16.msra.mxu0 %v7047_v38  ;;  %4705 = vmatprep.subr.bf16.mxu1 %v7110_v32 }
 0x100   : > { %4961 = vmatprep.subr.bf16.mxu0 %v7050_v43 }
 0x102   : > { %4707 = vmatpush1.bf16.msra.mxu1 %v7118_v44 }
 0x103   : > { %4963 = vmatpush1.bf16.msra.mxu0 %v7053_v51  ;;  %4709 = vmatprep.subr.bf16.mxu1 %v7121_v50 }
 0x104   : > { %4965 = vmatprep.subr.bf16.mxu0 %v7056_v56 }
 0x106   : > { %4711 = vmatpush1.bf16.msra.mxu1 %v7124_v60 }
 0x107   : > { %4967 = vmatpush1.bf16.msra.mxu0 %v7059_v63  ;;  %4713 = vmatprep.subr.bf16.mxu1 %v7127_v3 }
 0x108   : > { %4969 = vmatprep.subr.bf16.mxu0 %v7062_v4 }
 0x10a   : > { %4715 = vmatpush1.bf16.msra.mxu1 %v7130_v16 }
 0x10b   : > { %4971 = vmatpush1.bf16.msra.mxu0 %v7065_v13  ;;  %4717 = vmatprep.subr.bf16.mxu1 %v7133_v23 }
 0x10c   : > { %4973 = vmatprep.subr.bf16.mxu0 %v7068_v19 }
 0x10e   : > { %4719 = vmatpush1.bf16.msra.mxu1 %v7136_v37 }
 0x10f   : > { %4975 = vmatpush1.bf16.msra.mxu0 %v7071_v27  ;;  %4721 = vmatprep.subr.bf16.mxu1 %v7139_v45 }
 0x110   : > { %4977 = vmatprep.subr.bf16.mxu0 %v7074_v33 }
 0x112   : > { %4723 = vmatpush1.bf16.msra.mxu1 %v7142_v54 }
 0x113   : > { %4979 = vmatpush1.bf16.msra.mxu0 %v7078_v41  ;;  %4725 = vmatprep.subr.bf16.mxu1 %v7145_v57 }
 0x114   : > { %4981 = vmatprep.subr.bf16.mxu0 %v7081_v47 }
 0x115   : > { %910 = vmatmul.mubr.f32.vlgmr.msra.gmra.mrb[2].mxu1 %v7113_v36  ;;  %v7290_v36 = vld [vmem:[%s7104_s29 + $0x38] sm:$0xff] }
 0x116   : > { %4727 = vmatpush1.bf16.msra.mxu1 %v7153_v5  ;;  %980 = vmatprep.mubr.f32.mxu1 %v9659_v28 }
 0x117   : > { %4983 = vmatpush1.bf16.msra.mxu0 %v7089_v55  ;;  %4729 = vmatprep.subr.bf16.mxu1 %v7156_v8 }
 0x118   : > { %4985 = vmatprep.subr.bf16.mxu0 %v7092_v61 }
 0x11a   : > { %4731 = vmatpush1.bf16.msra.mxu1 %v7163_v20 }
 0x11b   : > { %4987 = vmatpush1.bf16.msra.mxu0 %v7096_v6  ;;  %4733 = vmatprep.subr.bf16.mxu1 %v7166_v21 }
 0x11c   : > { %4989 = vmatprep.subr.bf16.mxu0 %v7099_v14 }
 0x11e   : > { %4735 = vmatpush1.bf16.msra.mxu1 %v7172_v34 }
 0x11f   : > { %4991 = vmatpush1.bf16.msra.mxu0 %v7107_v24  ;;  %4737 = vmatprep.subr.bf16.mxu1 %v7175_v35 }
 0x120   : > { %4993 = vmatprep.subr.bf16.mxu0 %v7110_v32 }
 0x122   : > { %4739 = vmatpush1.bf16.msra.mxu1 %v7180_v48 }
 0x123   : > { %4995 = vmatpush1.bf16.msra.mxu0 %v7118_v44  ;;  %4741 = vmatprep.subr.bf16.mxu1 %v7183_v49 }
 0x124   : > { %4997 = vmatprep.subr.bf16.mxu0 %v7121_v50 }
 0x126   : > { %4743 = vmatpush1.bf16.msra.mxu1 %v7188_v62 }
 0x127   : > { %4999 = vmatpush1.bf16.msra.mxu0 %v7124_v60  ;;  %4745 = vmatprep.subr.bf16.mxu1 %v7191_v0 }
 0x128   : > { %5001 = vmatprep.subr.bf16.mxu0 %v7127_v3 }
 0x12a   : > { %4747 = vmatpush1.bf16.msra.mxu1 %v7196_v15 }
 0x12b   : > { %5003 = vmatpush1.bf16.msra.mxu0 %v7130_v16  ;;  %4749 = vmatprep.subr.bf16.mxu1 %v7199_v18 }
 0x12c   : > { %5005 = vmatprep.subr.bf16.mxu0 %v7133_v23 }
 0x12e   : > { %4751 = vmatpush1.bf16.msra.mxu1 %v7204_v39 }
 0x12f   : > { %5007 = vmatpush1.bf16.msra.mxu0 %v7136_v37  ;;  %4753 = vmatprep.subr.bf16.mxu1 %v7207_v40 }
 0x130   : > { %5009 = vmatprep.subr.bf16.mxu0 %v7139_v45 }
 0x132   : > { %4755 = vmatpush1.bf16.msra.mxu1 %v7212_v52 }
 0x133   : > { %5011 = vmatpush1.bf16.msra.mxu0 %v7142_v54  ;;  %4853 = vmatprep.subr.bf16.mxu1 %v7033_v7 }
 0x134   : > { %5013 = vmatprep.subr.bf16.mxu0 %v7145_v57 }
 0x135   : > { %981 = vmatmul.mubr.f32.vlgmr.msra.gmra.mrb[2].mxu1 %v7151_v2  ;;  %v7329_v2 = vld [vmem:[%s7104_s29 + $0x48] sm:$0xff] }
 0x136   : > { %4855 = vmatpush1.bf16.msra.mxu1 %v7035_v12  ;;  %1357 = vmatmul.mubr.f32.vlgmr.msra.gmra.mrb[2].mxu0 %v7290_v36 }
 0x137   : > { %5015 = vmatpush1.bf16.msra.mxu0 %v7153_v5  ;;  %4857 = vmatprep.subr.bf16.mxu1 %v7038_v17 }
 0x138   : > { %5017 = vmatprep.subr.bf16.mxu0 %v7156_v8  ;;  %1427 = vmatprep.mubr.f32.mxu0 %v9659_v28 }
 0x139   : > { %1207 = vmatprep.mubr.f32.mxu1 %v1141_v59  ;;  %v1885_v59 = vld [vmem:[%s9638_s4] sm:$0xff] }
 0x13a   : > { %4859 = vmatpush1.bf16.msra.mxu1 %v7042_v25 }
 0x13b   : > { %5019 = vmatpush1.bf16.msra.mxu0 %v7163_v20  ;;  %4861 = vmatprep.subr.bf16.mxu1 %v7044_v30 }
 0x13c   : > { %5021 = vmatprep.subr.bf16.mxu0 %v7166_v21 }
 0x13e   : > { %4863 = vmatpush1.bf16.msra.mxu1 %v7047_v38 }
 0x13f   : > { %5023 = vmatpush1.bf16.msra.mxu0 %v7172_v34  ;;  %4865 = vmatprep.subr.bf16.mxu1 %v7050_v43 }
 0x140   : > { %5025 = vmatprep.subr.bf16.mxu0 %v7175_v35 }
 0x142   : > { %4867 = vmatpush1.bf16.msra.mxu1 %v7053_v51 }
 0x143   : > { %5027 = vmatpush1.bf16.msra.mxu0 %v7180_v48  ;;  %4869 = vmatprep.subr.bf16.mxu1 %v7056_v56 }
 0x144   : > { %5029 = vmatprep.subr.bf16.mxu0 %v7183_v49 }
 0x146   : > { %4871 = vmatpush1.bf16.msra.mxu1 %v7059_v63 }
 0x147   : > { %5031 = vmatpush1.bf16.msra.mxu0 %v7188_v62  ;;  %4873 = vmatprep.subr.bf16.mxu1 %v7062_v4 }
 0x148   : > { %5033 = vmatprep.subr.bf16.mxu0 %v7191_v0 }
 0x14a   : > { %4875 = vmatpush1.bf16.msra.mxu1 %v7065_v13 }
 0x14b   : > { %5035 = vmatpush1.bf16.msra.mxu0 %v7196_v15  ;;  %4877 = vmatprep.subr.bf16.mxu1 %v7068_v19 }
 0x14c   : > { %5037 = vmatprep.subr.bf16.mxu0 %v7199_v18 }
 0x14e   : > { %4879 = vmatpush1.bf16.msra.mxu1 %v7071_v27 }
 0x14f   : > { %5039 = vmatpush1.bf16.msra.mxu0 %v7204_v39  ;;  %4881 = vmatprep.subr.bf16.mxu1 %v7074_v33 }
 0x150   : > { %5041 = vmatprep.subr.bf16.mxu0 %v7207_v40 }
 0x152   : > { %4883 = vmatpush1.bf16.msra.mxu1 %v7078_v41 }
 0x153   : > { %5043 = vmatpush1.bf16.msra.mxu0 %v7212_v52  ;;  %4885 = vmatprep.subr.bf16.mxu1 %v7081_v47 }
 0x154   : > { %5141 = vmatprep.subr.bf16.mxu0 %v7033_v7 }
 0x156   : > { %4887 = vmatpush1.bf16.msra.mxu1 %v7089_v55  ;;  %1428 = vmatmul.mubr.f32.vlgmr.msra.gmra.mrb[2].mxu0 %v7329_v2 }
 0x157   : > { %5143 = vmatpush1.bf16.msra.mxu0 %v7035_v12  ;;  %4889 = vmatprep.subr.bf16.mxu1 %v7092_v61 }
 0x158   : > { %5145 = vmatprep.subr.bf16.mxu0 %v7038_v17  ;;  %1654 = vmatprep.mubr.f32.mxu0 %v1588_v1  ;;  %v1887_v1 = vld [vmem:[%s9638_s4 + $0x10] sm:$0xff] }
 0x15a   : > { %4891 = vmatpush1.bf16.msra.mxu1 %v7096_v6 }
 0x15b   : > { %5147 = vmatpush1.bf16.msra.mxu0 %v7042_v25  ;;  %4893 = vmatprep.subr.bf16.mxu1 %v7099_v14 }
 0x15c   : > { %5149 = vmatprep.subr.bf16.mxu0 %v7044_v30 }
 0x15e   : > { %4895 = vmatpush1.bf16.msra.mxu1 %v7107_v24 }
 0x15f   : > { %5151 = vmatpush1.bf16.msra.mxu0 %v7047_v38  ;;  %4897 = vmatprep.subr.bf16.mxu1 %v7110_v32 }
 0x160   : > { %5153 = vmatprep.subr.bf16.mxu0 %v7050_v43 }
 0x162   : > { %4899 = vmatpush1.bf16.msra.mxu1 %v7118_v44 }
 0x163   : > { %5155 = vmatpush1.bf16.msra.mxu0 %v7053_v51  ;;  %4901 = vmatprep.subr.bf16.mxu1 %v7121_v50 }
 0x164   : > { %5157 = vmatprep.subr.bf16.mxu0 %v7056_v56 }
 0x166   : > { %4903 = vmatpush1.bf16.msra.mxu1 %v7124_v60 }
 0x167   : > { %5159 = vmatpush1.bf16.msra.mxu0 %v7059_v63  ;;  %4905 = vmatprep.subr.bf16.mxu1 %v7127_v3 }
 0x168   : > { %5161 = vmatprep.subr.bf16.mxu0 %v7062_v4 }
 0x16a   : > { %4907 = vmatpush1.bf16.msra.mxu1 %v7130_v16 }
 0x16b   : > { %5163 = vmatpush1.bf16.msra.mxu0 %v7065_v13  ;;  %4909 = vmatprep.subr.bf16.mxu1 %v7133_v23 }
 0x16c   : > { %5165 = vmatprep.subr.bf16.mxu0 %v7068_v19 }
 0x16e   : > { %4911 = vmatpush1.bf16.msra.mxu1 %v7136_v37 }
 0x16f   : > { %5167 = vmatpush1.bf16.msra.mxu0 %v7071_v27  ;;  %4913 = vmatprep.subr.bf16.mxu1 %v7139_v45 }
 0x170   : > { %5169 = vmatprep.subr.bf16.mxu0 %v7074_v33 }
 0x172   : > { %4915 = vmatpush1.bf16.msra.mxu1 %v7142_v54 }
 0x173   : > { %5171 = vmatpush1.bf16.msra.mxu0 %v7078_v41  ;;  %4917 = vmatprep.subr.bf16.mxu1 %v7145_v57 }
 0x174   : > { %5173 = vmatprep.subr.bf16.mxu0 %v7081_v47 }
 0x175   : > { %1208 = vmatmul.mubr.f32.vlgmr.msra.gmra.mrb[4].mxu1 %v7219_v53  ;;  %v1886_v53 = vld [vmem:[%s9638_s4 + $0x8] sm:$0xff] }
 0x176   : > { %4919 = vmatpush1.bf16.msra.mxu1 %v7153_v5  ;;  %1278 = vmatprep.mubr.f32.mxu1 %v9659_v28 }
 0x177   : > { %5175 = vmatpush1.bf16.msra.mxu0 %v7089_v55  ;;  %4921 = vmatprep.subr.bf16.mxu1 %v7156_v8 }
 0x178   : > { %5177 = vmatprep.subr.bf16.mxu0 %v7092_v61 }
 0x17a   : > { %4923 = vmatpush1.bf16.msra.mxu1 %v7163_v20 }
 0x17b   : > { %5179 = vmatpush1.bf16.msra.mxu0 %v7096_v6  ;;  %4925 = vmatprep.subr.bf16.mxu1 %v7166_v21 }
 0x17c   : > { %5181 = vmatprep.subr.bf16.mxu0 %v7099_v14 }
 0x17e   : > { %4927 = vmatpush1.bf16.msra.mxu1 %v7172_v34 }
 0x17f   : > { %5183 = vmatpush1.bf16.msra.mxu0 %v7107_v24  ;;  %4929 = vmatprep.subr.bf16.mxu1 %v7175_v35 }
 0x180   : > { %5185 = vmatprep.subr.bf16.mxu0 %v7110_v32 }
 0x182   : > { %4931 = vmatpush1.bf16.msra.mxu1 %v7180_v48 }
 0x183   : > { %5187 = vmatpush1.bf16.msra.mxu0 %v7118_v44  ;;  %4933 = vmatprep.subr.bf16.mxu1 %v7183_v49 }
 0x184   : > { %5189 = vmatprep.subr.bf16.mxu0 %v7121_v50 }
 0x186   : > { %4935 = vmatpush1.bf16.msra.mxu1 %v7188_v62 }
 0x187   : > { %5191 = vmatpush1.bf16.msra.mxu0 %v7124_v60  ;;  %4937 = vmatprep.subr.bf16.mxu1 %v7191_v0 }
 0x188   : > { %5193 = vmatprep.subr.bf16.mxu0 %v7127_v3 }
 0x18a   : > { %4939 = vmatpush1.bf16.msra.mxu1 %v7196_v15 }
 0x18b   : > { %5195 = vmatpush1.bf16.msra.mxu0 %v7130_v16  ;;  %4941 = vmatprep.subr.bf16.mxu1 %v7199_v18 }
 0x18c   : > { %5197 = vmatprep.subr.bf16.mxu0 %v7133_v23 }
 0x18e   : > { %4943 = vmatpush1.bf16.msra.mxu1 %v7204_v39 }
 0x18f   : > { %5199 = vmatpush1.bf16.msra.mxu0 %v7136_v37  ;;  %4945 = vmatprep.subr.bf16.mxu1 %v7207_v40 }
 0x190   : > { %5201 = vmatprep.subr.bf16.mxu0 %v7139_v45 }
 0x192   : > { %4947 = vmatpush1.bf16.msra.mxu1 %v7212_v52 }
 0x193   : > { %5203 = vmatpush1.bf16.msra.mxu0 %v7142_v54  ;;  %5045 = vmatprep.subr.bf16.mxu1 %v7033_v7 }
 0x194   : > { %5205 = vmatprep.subr.bf16.mxu0 %v7145_v57 }
 0x195   : > { %1279 = vmatmul.mubr.f32.vlgmr.msra.gmra.mrb[4].mxu1 %v7290_v36  ;;  %v5332_v36 = vpack.c.bf16 %v1888_v58, %v1886_v53  ;;  %v7474_v53 = vld [vmem:[%s7104_s29 + $0x68] sm:$0xff]  ;;  %v5334_v58 = vpack.c.bf16 %v1887_v1, %v1885_v59  ;;  %v1893_v59 = vld [vmem:[%s9638_s4 + $0x40] sm:$0xff]  ;;  %v1895_v1 = vld [vmem:[%s9638_s4 + $0x50] sm:$0xff] }
 0x196   : > { %5047 = vmatpush1.bf16.msra.mxu1 %v7035_v12  ;;  %1655 = vmatmul.mubr.f32.vlgmr.msra.gmra.mrb[4].mxu0 %v7400_v9 }
 0x197   : > { %5207 = vmatpush1.bf16.msra.mxu0 %v7153_v5  ;;  %5049 = vmatprep.subr.bf16.mxu1 %v7038_v17 }
 0x198   : > { %5209 = vmatprep.subr.bf16.mxu0 %v7156_v8  ;;  %1725 = vmatprep.mubr.f32.mxu0 %v9659_v28  ;;  %v1892_v28 = vld [vmem:[%s9638_s4 + $0x38] sm:$0xff] }
 0x199   : > { %1505 = vmatprep.mubr.f32.mxu1 %v1439_v10  ;;  %v5336_v29 = vpack.c.bf16 %v1892_v28, %v1890_v11  ;;  %v1902_v11 = vld [vmem:[%s9638_s4 + $0x88] sm:$0xff] }
 0x19a   : > { %5051 = vmatpush1.bf16.msra.mxu1 %v7042_v25 }
 0x19b   : > { %5211 = vmatpush1.bf16.msra.mxu0 %v7163_v20  ;;  %5053 = vmatprep.subr.bf16.mxu1 %v7044_v30 }
 0x19c   : > { %5213 = vmatprep.subr.bf16.mxu0 %v7166_v21 }
 0x19e   : > { %5055 = vmatpush1.bf16.msra.mxu1 %v7047_v38 }
 0x19f   : > { %5215 = vmatpush1.bf16.msra.mxu0 %v7172_v34  ;;  %5057 = vmatprep.subr.bf16.mxu1 %v7050_v43 }
 0x1a0   : > { %5217 = vmatprep.subr.bf16.mxu0 %v7175_v35 }
 0x1a2   : > { %5059 = vmatpush1.bf16.msra.mxu1 %v7053_v51 }
 0x1a3   : > { %5219 = vmatpush1.bf16.msra.mxu0 %v7180_v48  ;;  %5061 = vmatprep.subr.bf16.mxu1 %v7056_v56 }
 0x1a4   : > { %5221 = vmatprep.subr.bf16.mxu0 %v7183_v49 }
 0x1a6   : > { %5063 = vmatpush1.bf16.msra.mxu1 %v7059_v63 }
 0x1a7   : > { %5223 = vmatpush1.bf16.msra.mxu0 %v7188_v62  ;;  %5065 = vmatprep.subr.bf16.mxu1 %v7062_v4 }
 0x1a8   : > { %v7428_v26 = vpop.f32.mrb[0].mxu1  ;;  %5225 = vmatprep.subr.bf16.mxu0 %v7191_v0 }
 0x1a9   : > { %v835_v31 = vpop.f32.mrb[1].mxu1 }
 0x1aa   : > { %5067 = vmatpush1.bf16.msra.mxu1 %v7065_v13  ;;  %v836_v10 = vadd.f32 %v835_v31, %v7445_v46  ;;  %v1889_v31 = vld [vmem:[%s9638_s4 + $0x20] sm:$0xff] }
 0x1ab   : > { %5227 = vmatpush1.bf16.msra.mxu0 %v7196_v15  ;;  %5069 = vmatprep.subr.bf16.mxu1 %v7068_v19 }
 0x1ac   : > { %5229 = vmatprep.subr.bf16.mxu0 %v7199_v18 }
 0x1ae   : > { %5071 = vmatpush1.bf16.msra.mxu1 %v7071_v27  ;;  %v839_v27 = vmax.f32 %v836_v10, 0.0  ;;  %v1898_v10 = vld [vmem:[%s9638_s4 + $0x68] sm:$0xff] }
 0x1af   : > { %5231 = vmatpush1.bf16.msra.mxu0 %v7204_v39  ;;  %5073 = vmatprep.subr.bf16.mxu1 %v7074_v33  ;;  %v1891_v33 = vld [vmem:[%s9638_s4 + $0x30] sm:$0xff] }
 0x1b0   : > { %5233 = vmatprep.subr.bf16.mxu0 %v7207_v40  ;;  %v5338_v28 = vpack.c.bf16 %v1891_v33, %v1889_v31  ;;  %v5342_v33 = vpack.c.bf16 %v1895_v1, %v1893_v59  ;;  %v1903_v59 = vld [vmem:[%s9638_s4 + $0x90] sm:$0xff]  ;;  %v1906_v1 = vld [vmem:[%s9638_s4 + $0xa8] sm:$0xff] }
 0x1b2   : > { %5075 = vmatpush1.bf16.msra.mxu1 %v7078_v41  ;;  %v1894_v41 = vld [vmem:[%s9638_s4 + $0x48] sm:$0xff] }
 0x1b3   : > { %5235 = vmatpush1.bf16.msra.mxu0 %v7212_v52  ;;  %5077 = vmatprep.subr.bf16.mxu1 %v7081_v47  ;;  %v1896_v47 = vld [vmem:[%s9638_s4 + $0x58] sm:$0xff] }
 0x1b4   : > { %5333 = vmatprep.subr.bf16.mxu0 %v5332_v36  ;;  %v5340_v36 = vpack.c.bf16 %v1896_v47, %v1894_v41  ;;  %v1897_v47 = vld [vmem:[%s9638_s4 + $0x60] sm:$0xff] }
 0x1b6   : > { %1726 = vmatmul.mubr.f32.vlgmr.msra.gmra.mrb[4].mxu0 %v7474_v53  ;;  %5079 = vmatpush1.bf16.msra.mxu1 %v7089_v55 }
 0x1b7   : > { %5335 = vmatpush1.bf16.msra.mxu0 %v5334_v58  ;;  %2285 = vmatprep.mubr.f32.mxu0 %v839_v27  ;;  %v1900_v27 = vld [vmem:[%s9638_s4 + $0x78] sm:$0xff] }
 0x1b8   : > { %5081 = vmatprep.subr.bf16.mxu1 %v7092_v61  ;;  %5337 = vmatprep.subr.bf16.mxu0 %v5336_v29  ;;  %v5344_v41 = vpack.c.bf16 %v1900_v27, %v1898_v10  ;;  %v1899_v29 = vld [vmem:[%s9638_s4 + $0x70] sm:$0xff]  ;;  %v1904_v58 = vld [vmem:[%s9638_s4 + $0x98] sm:$0xff] }
 0x1b9   : > { %v5346_v31 = vpack.c.bf16 %v1899_v29, %v1897_v47  ;;  %v1908_v10 = vld [vmem:[%s9638_s4 + $0xb8] sm:$0xff]  ;;  %v1907_v47 = vld [vmem:[%s9638_s4 + $0xb0] sm:$0xff]  ;;  %v1910_v29 = vld [vmem:[%s9638_s4 + $0xc8] sm:$0xff] }
 0x1ba   : > { %5083 = vmatpush1.bf16.msra.mxu1 %v7096_v6 }
 0x1bb   : > { %5339 = vmatpush1.bf16.msra.mxu0 %v5338_v28  ;;  %5085 = vmatprep.subr.bf16.mxu1 %v7099_v14  ;;  %v5348_v28 = vpack.c.bf16 %v1904_v58, %v1902_v11  ;;  %v1912_v11 = vld [vmem:[%s9638_s4 + $0xd8] sm:$0xff] }
 0x1bc   : > { %5341 = vmatprep.subr.bf16.mxu0 %v5340_v36  ;;  %v1901_v36 = vld [vmem:[%s9638_s4 + $0x80] sm:$0xff] }
 0x1bd   : > { %v5350_v27 = vpack.c.bf16 %v1903_v59, %v1901_v36  ;;  %v1911_v36 = vld [vmem:[%s9638_s4 + $0xd0] sm:$0xff]  ;;  %v1914_v59 = vld [vmem:[%s9638_s4 + $0xe8] sm:$0xff] }
 0x1be   : > { %5087 = vmatpush1.bf16.msra.mxu1 %v7107_v24 }
 0x1bf   : > { %5343 = vmatpush1.bf16.msra.mxu0 %v5342_v33  ;;  %5089 = vmatprep.subr.bf16.mxu1 %v7110_v32  ;;  %v5352_v33 = vpack.c.bf16 %v1908_v10, %v1906_v1  ;;  %v1916_v1 = vld [vmem:[%s9638_s4 + $0xf8] sm:$0xff] }
 0x1c0   : > { %5345 = vmatprep.subr.bf16.mxu0 %v5344_v41  ;;  %v1905_v41 = vld [vmem:[%s9638_s4 + $0xa0] sm:$0xff] }
 0x1c1   : > { %v5354_v58 = vpack.c.bf16 %v1907_v47, %v1905_v41  ;;  %v1915_v41 = vld [vmem:[%s9638_s4 + $0xf0] sm:$0xff]  ;;  %v1918_v47 = vld [vmem:[%s9638_s4 + $0x108] sm:$0xff] }
 0x1c2   : > { %5091 = vmatpush1.bf16.msra.mxu1 %v7118_v44 }
 0x1c3   : > { %5347 = vmatpush1.bf16.msra.mxu0 %v5346_v31  ;;  %5093 = vmatprep.subr.bf16.mxu1 %v7121_v50  ;;  %v5356_v31 = vpack.c.bf16 %v1912_v11, %v1910_v29  ;;  %v1920_v29 = vld [vmem:[%s9638_s4 + $0x118] sm:$0xff] }
 0x1c4   : > { %5349 = vmatprep.subr.bf16.mxu0 %v5348_v28  ;;  %v1909_v28 = vld [vmem:[%s9638_s4 + $0xc0] sm:$0xff] }
 0x1c5   : > { %v5358_v10 = vpack.c.bf16 %v1911_v36, %v1909_v28  ;;  %v1919_v28 = vld [vmem:[%s9638_s4 + $0x110] sm:$0xff]  ;;  %v1922_v36 = vld [vmem:[%s9638_s4 + $0x128] sm:$0xff] }
 0x1c6   : > { %5095 = vmatpush1.bf16.msra.mxu1 %v7124_v60 }
 0x1c7   : > { %5351 = vmatpush1.bf16.msra.mxu0 %v5350_v27  ;;  %5097 = vmatprep.subr.bf16.mxu1 %v7127_v3  ;;  %v5360_v27 = vpack.c.bf16 %v1916_v1, %v1914_v59  ;;  %v1924_v59 = vld [vmem:[%s9638_s4 + $0x138] sm:$0xff] }
 0x1c8   : > { %5353 = vmatprep.subr.bf16.mxu0 %v5352_v33  ;;  %v1913_v33 = vld [vmem:[%s9638_s4 + $0xe0] sm:$0xff] }
 0x1c9   : > { %v5362_v11 = vpack.c.bf16 %v1915_v41, %v1913_v33  ;;  %v1923_v33 = vld [vmem:[%s9638_s4 + $0x130] sm:$0xff]  ;;  %v1926_v41 = vld [vmem:[%s9638_s4 + $0x148] sm:$0xff] }
 0x1ca   : > { %5099 = vmatpush1.bf16.msra.mxu1 %v7130_v16 }
 0x1cb   : > { %5355 = vmatpush1.bf16.msra.mxu0 %v5354_v58  ;;  %5101 = vmatprep.subr.bf16.mxu1 %v7133_v23  ;;  %v5364_v58 = vpack.c.bf16 %v1920_v29, %v1918_v47  ;;  %v1928_v47 = vld [vmem:[%s9638_s4 + $0x158] sm:$0xff]  ;;  %v9758_v29 = vmov 0.0  }
 0x1cc   : > { %5357 = vmatprep.subr.bf16.mxu0 %v5356_v31  ;;  %v1917_v31 = vld [vmem:[%s9638_s4 + $0x100] sm:$0xff] }
 0x1cd   : > { %v5366_v1 = vpack.c.bf16 %v1919_v28, %v1917_v31  ;;  %v1927_v31 = vld [vmem:[%s9638_s4 + $0x150] sm:$0xff]  ;;  %v1930_v28 = vld [vmem:[%s9638_s4 + $0x168] sm:$0xff] }
 0x1ce   : > { %5103 = vmatpush1.bf16.msra.mxu1 %v7136_v37 }
 0x1cf   : > { %5359 = vmatpush1.bf16.msra.mxu0 %v5358_v10  ;;  %5105 = vmatprep.subr.bf16.mxu1 %v7139_v45  ;;  %v5368_v10 = vpack.c.bf16 %v1924_v59, %v1922_v36  ;;  %v1932_v36 = vld [vmem:[%s9638_s4 + $0x178] sm:$0xff] }
 0x1d0   : > { %5361 = vmatprep.subr.bf16.mxu0 %v5360_v27  ;;  %v1921_v27 = vld [vmem:[%s9638_s4 + $0x120] sm:$0xff] }
 0x1d2   : > { %5107 = vmatpush1.bf16.msra.mxu1 %v7142_v54 }
 0x1d3   : > { %5363 = vmatpush1.bf16.msra.mxu0 %v5362_v11  ;;  %5109 = vmatprep.subr.bf16.mxu1 %v7145_v57  ;;  %v5370_v11 = vpack.c.bf16 %v1923_v33, %v1921_v27  ;;  %v1931_v27 = vld [vmem:[%s9638_s4 + $0x170] sm:$0xff]  ;;  %v1934_v33 = vld [vmem:[%s9638_s4 + $0x188] sm:$0xff] }
 0x1d4   : > { %5365 = vmatprep.subr.bf16.mxu0 %v5364_v58  ;;  %v5372_v58 = vpack.c.bf16 %v1928_v47, %v1926_v41  ;;  %v1936_v41 = vld [vmem:[%s9638_s4 + $0x198] sm:$0xff] }
 0x1d5   : > { %1506 = vmatmul.mubr.f32.vlgmr.msra.gmra.mrb[6].mxu1 %v7329_v2  ;;  %v1925_v2 = vld [vmem:[%s9638_s4 + $0x140] sm:$0xff] }
 0x1d6   : > { %5111 = vmatpush1.bf16.msra.mxu1 %v7153_v5  ;;  %1576 = vmatprep.mubr.f32.mxu1 %v9758_v29  ;;  %v5374_v59 = vpack.c.bf16 %v1927_v31, %v1925_v2  ;;  %v1935_v2 = vld [vmem:[%s9638_s4 + $0x190] sm:$0xff]  ;;  %v1938_v31 = vld [vmem:[%s9638_s4 + $0x1a8] sm:$0xff] }
 0x1d7   : > { %5367 = vmatpush1.bf16.msra.mxu0 %v5366_v1  ;;  %5113 = vmatprep.subr.bf16.mxu1 %v7156_v8  ;;  %v5376_v1 = vpack.c.bf16 %v1932_v36, %v1930_v28  ;;  %v1940_v28 = vld [vmem:[%s9638_s4 + $0x1b8] sm:$0xff] }
 0x1d8   : > { %5369 = vmatprep.subr.bf16.mxu0 %v5368_v10  ;;  %v1929_v10 = vld [vmem:[%s9638_s4 + $0x160] sm:$0xff] }
 0x1d9   : > { %v5378_v47 = vpack.c.bf16 %v1931_v27, %v1929_v10  ;;  %v1939_v10 = vld [vmem:[%s9638_s4 + $0x1b0] sm:$0xff]  ;;  %v1942_v27 = vld [vmem:[%s9638_s4 + $0x1c8] sm:$0xff] }
 0x1da   : > { %5115 = vmatpush1.bf16.msra.mxu1 %v7163_v20 }
 0x1db   : > { %5371 = vmatpush1.bf16.msra.mxu0 %v5370_v11  ;;  %5117 = vmatprep.subr.bf16.mxu1 %v7166_v21  ;;  %v5380_v11 = vpack.c.bf16 %v1936_v41, %v1934_v33  ;;  %v1944_v33 = vld [vmem:[%s9638_s4 + $0x1d8] sm:$0xff] }
 0x1dc   : > { %5373 = vmatprep.subr.bf16.mxu0 %v5372_v58  ;;  %v1933_v58 = vld [vmem:[%s9638_s4 + $0x180] sm:$0xff] }
 0x1dd   : > { %v5382_v36 = vpack.c.bf16 %v1935_v2, %v1933_v58  ;;  %v1941_v58 = vld [vmem:[%s9638_s4 + $0x1c0] sm:$0xff]  ;;  %v1943_v2 = vld [vmem:[%s9638_s4 + $0x1d0] sm:$0xff] }
 0x1de   : > { %5119 = vmatpush1.bf16.msra.mxu1 %v7172_v34 }
 0x1df   : > { %5375 = vmatpush1.bf16.msra.mxu0 %v5374_v59  ;;  %5121 = vmatprep.subr.bf16.mxu1 %v7175_v35  ;;  %v5384_v59 = vpack.c.bf16 %v1940_v28, %v1938_v31  ;;  %v1946_v31 = vld [vmem:[%s9638_s4 + $0x1e8] sm:$0xff]  ;;  %v1948_v28 = vld [vmem:[%s9638_s4 + $0x1f8] sm:$0xff] }
 0x1e0   : > { %5377 = vmatprep.subr.bf16.mxu0 %v5376_v1  ;;  %v1937_v1 = vld [vmem:[%s9638_s4 + $0x1a0] sm:$0xff] }
 0x1e1   : > { %v5386_v41 = vpack.c.bf16 %v1939_v10, %v1937_v1  ;;  %v5392_v1 = vpack.c.bf16 %v1948_v28, %v1946_v31  ;;  %v1945_v10 = vld [vmem:[%s9638_s4 + $0x1e0] sm:$0xff]  ;;  %v1951_v31 = vld [vmem:[%s9638_s4 + $0x210] sm:$0xff]  ;;  %v1954_v28 = vld [vmem:[%s9638_s4 + $0x228] sm:$0xff] }
 0x1e2   : > { %5123 = vmatpush1.bf16.msra.mxu1 %v7180_v48 }
 0x1e3   : > { %5379 = vmatpush1.bf16.msra.mxu0 %v5378_v47  ;;  %5125 = vmatprep.subr.bf16.mxu1 %v7183_v49  ;;  %v7662_v47 = vsub.s32 0, %v7423_v22  ;;  %v2107_v22 = vld [vmem:[%s9639_s5 + $0x2f0] sm:$0xff] }
 0x1e4   : > { %5381 = vmatprep.subr.bf16.mxu0 %v5380_v11  ;;  %v5388_v11 = vpack.c.bf16 %v1944_v33, %v1942_v27  ;;  %v1947_v27 = vld [vmem:[%s9638_s4 + $0x1f0] sm:$0xff]  ;;  %v1950_v33 = vld [vmem:[%s9638_s4 + $0x208] sm:$0xff] }
 0x1e6   : > { %5127 = vmatpush1.bf16.msra.mxu1 %v7188_v62 }
 0x1e7   : > { %5383 = vmatpush1.bf16.msra.mxu0 %v5382_v36  ;;  %5129 = vmatprep.subr.bf16.mxu1 %v7191_v0  ;;  %v5390_v36 = vpack.c.bf16 %v1943_v2, %v1941_v58  ;;  %v1949_v2 = vld [vmem:[%s9638_s4 + $0x200] sm:$0xff] }
 0x1e8   : > { %5385 = vmatprep.subr.bf16.mxu0 %v5384_v59  ;;  %v7680_v59 = vrot.slane %v7437_v42, %v7662_v47  ;;  %v5394_v42 = vpack.c.bf16 %v1947_v27, %v1945_v10  ;;  %v1953_v27 = vld [vmem:[%s9638_s4 + $0x220] sm:$0xff] }
 0x1ea   : > { %5131 = vmatpush1.bf16.msra.mxu1 %v7196_v15  ;;  %9759 = vst [vmem:[#allocation23_spill] sm:$0xff] %v7680_v59 }
 0x1eb   : > { %5387 = vmatpush1.bf16.msra.mxu0 %v5386_v41  ;;  %5133 = vmatprep.subr.bf16.mxu1 %v7199_v18  ;;  %v1952_v41 = vld [vmem:[%s9638_s4 + $0x218] sm:$0xff] }
 0x1ec   : > { %5389 = vmatprep.subr.bf16.mxu0 %v5388_v11  ;;  %v834_v11 = vadd.f32 %v7428_v26, %v7680_v59  ;;  %v5396_v58 = vpack.c.bf16 %v1952_v41, %v1950_v33  ;;  %v5398_v26 = vpack.c.bf16 %v1951_v31, %v1949_v2  ;;  %v1955_v33 = vld [vmem:[%s9638_s4 + $0x230] sm:$0xff]  ;;  %v1958_v41 = vld [vmem:[%s9638_s4 + $0x248] sm:$0xff] }
 0x1ed   : > { %v1959_v2 = vld [vmem:[%s9638_s4 + $0x250] sm:$0xff]  ;;  %v1962_v31 = vld [vmem:[%s9638_s4 + $0x268] sm:$0xff] }
 0x1ee   : > { %5135 = vmatpush1.bf16.msra.mxu1 %v7204_v39 }
 0x1ef   : > { %5391 = vmatpush1.bf16.msra.mxu0 %v5390_v36  ;;  %5137 = vmatprep.subr.bf16.mxu1 %v7207_v40  ;;  %v1956_v36 = vld [vmem:[%s9638_s4 + $0x238] sm:$0xff] }
 0x1f0   : > { %5393 = vmatprep.subr.bf16.mxu0 %v5392_v1  ;;  %v838_v1 = vmax.f32 %v834_v11, 0.0  ;;  %v5400_v10 = vpack.c.bf16 %v1956_v36, %v1954_v28  ;;  %v5402_v11 = vpack.c.bf16 %v1955_v33, %v1953_v27  ;;  %v1961_v36 = vld [vmem:[%s9638_s4 + $0x260] sm:$0xff]  ;;  %v1967_v33 = vld [vmem:[%s9638_s4 + $0x290] sm:$0xff] }
 0x1f1   : > { %v1965_v27 = vld [vmem:[%s9638_s4 + $0x280] sm:$0xff] }
 0x1f2   : > { %5139 = vmatpush1.bf16.msra.mxu1 %v7212_v52 }
 0x1f3   : > { %5395 = vmatpush1.bf16.msra.mxu0 %v5394_v42  ;;  %5237 = vmatprep.subr.bf16.mxu1 %v7033_v7  ;;  %v1960_v7 = vld [vmem:[%s9638_s4 + $0x258] sm:$0xff]  ;;  %v1737_v42 = vld [vmem:[%s7104_s29 + $0x70] sm:$0xff] }
 0x1f4   : > { %5397 = vmatprep.subr.bf16.mxu0 %v5396_v58  ;;  %v5404_v58 = vpack.c.bf16 %v1960_v7, %v1958_v41  ;;  %v1970_v41 = vld [vmem:[%s9638_s4 + $0x2a8] sm:$0xff] }
 0x1f5   : > { %1577 = vmatmul.mubr.f32.vlgmr.msra.gmra.mrb[6].mxu1 %v7400_v9  ;;  %v1957_v9 = vld [vmem:[%s9638_s4 + $0x240] sm:$0xff] }
 0x1f6   : > { %2286 = vmatmul.mubr.f32.vlgmr.msra.gmra.mrb[6].mxu0 %v838_v1  ;;  %5239 = vmatpush1.bf16.msra.mxu1 %v7035_v12  ;;  %v1964_v12 = vld [vmem:[%s9638_s4 + $0x278] sm:$0xff]  ;;  %v1966_v1 = vld [vmem:[%s9638_s4 + $0x288] sm:$0xff] }
 0x1f7   : > { %5399 = vmatpush1.bf16.msra.mxu0 %v5398_v26  ;;  %5241 = vmatprep.subr.bf16.mxu1 %v7038_v17  ;;  %v5406_v17 = vpack.c.bf16 %v1959_v2, %v1957_v9  ;;  %v5408_v28 = vpack.c.bf16 %v1964_v12, %v1962_v31  ;;  %v1963_v26 = vld [vmem:[%s9638_s4 + $0x270] sm:$0xff] }
 0x1f8   : > { %5401 = vmatprep.subr.bf16.mxu0 %v5400_v10  ;;  %1803 = vmatprep.mubr.f32.mxu1 %v1737_v42  ;;  %v1969_v42 = vld [vmem:[%s9638_s4 + $0x2a0] sm:$0xff] }
 0x1fa   : > { %5243 = vmatpush1.bf16.msra.mxu1 %v7042_v25  ;;  %v1968_v25 = vld [vmem:[%s9638_s4 + $0x298] sm:$0xff] }
 0x1fb   : > { %5403 = vmatpush1.bf16.msra.mxu0 %v5402_v11  ;;  %5245 = vmatprep.subr.bf16.mxu1 %v7044_v30  ;;  %v5410_v30 = vpack.c.bf16 %v1963_v26, %v1961_v36  ;;  %v5412_v10 = vpack.c.bf16 %v1968_v25, %v1966_v1  ;;  %v1971_v11 = vld [vmem:[%s9638_s4 + $0x2b0] sm:$0xff] }
 0x1fc   : > { %5405 = vmatprep.subr.bf16.mxu0 %v5404_v58  ;;  %v7776_v58 = vpop.f32.mrb[0].mxu0  ;;  %v5418_v9 = vpack.c.bf16 %v1971_v11, %v1969_v42  ;;  %v1983_v42 = vld [vmem:[%s9638_s4 + $0x310] sm:$0xff]  ;;  %v1986_v11 = vld [vmem:[%s9638_s4 + $0x328] sm:$0xff] }
 0x1fd   : > { %v7786_v2 = vpop.f32.mrb[1].mxu0 }
 0x1fe   : > { %5247 = vmatpush1.bf16.msra.mxu1 %v7047_v38  ;;  %v1972_v38 = vld [vmem:[%s9638_s4 + $0x2b8] sm:$0xff] }
 0x1ff   : > { %5407 = vmatpush1.bf16.msra.mxu0 %v5406_v17  ;;  %5249 = vmatprep.subr.bf16.mxu1 %v7050_v43  ;;  %v5414_v43 = vpack.c.bf16 %v1967_v33, %v1965_v27  ;;  %v5416_v7 = vpack.c.bf16 %v1972_v38, %v1970_v41  ;;  %v1973_v17 = vld [vmem:[%s9638_s4 + $0x2c0] sm:$0xff]  ;;  %v1979_v27 = vld [vmem:[%s9638_s4 + $0x2f0] sm:$0xff]  ;;  %v9761_v41 = vld [vmem:[#allocation18_spill] sm:$0xff] }
 0x200   : > { %5409 = vmatprep.subr.bf16.mxu0 %v5408_v28  ;;  %v1975_v28 = vld [vmem:[%s9638_s4 + $0x2d0] sm:$0xff]  ;;  %v9760_v33 = vld [vmem:[#allocation17_spill] sm:$0xff] }
 0x201   : > { %v5422_v1 = vpack.c.bf16 %v1975_v28, %v1973_v17  ;;  %v1985_v28 = vld [vmem:[%s9638_s4 + $0x320] sm:$0xff] }
 0x202   : > { %5251 = vmatpush1.bf16.msra.mxu1 %v7053_v51  ;;  %v1974_v51 = vld [vmem:[%s9638_s4 + $0x2c8] sm:$0xff] }
 0x203   : > { %5411 = vmatpush1.bf16.msra.mxu0 %v5410_v30  ;;  %5253 = vmatprep.subr.bf16.mxu1 %v7056_v56  ;;  %v1976_v56 = vld [vmem:[%s9638_s4 + $0x2d8] sm:$0xff] }
 0x204   : > { %5413 = vmatprep.subr.bf16.mxu0 %v5412_v10  ;;  %v5420_v12 = vpack.c.bf16 %v1976_v56, %v1974_v51  ;;  %v1977_v10 = vld [vmem:[%s9638_s4 + $0x2e0] sm:$0xff]  ;;  %v1988_v51 = vld [vmem:[%s9638_s4 + $0x338] sm:$0xff]  ;;  %v9762_v56 = vld [vmem:[#allocation19_spill] sm:$0xff] }
 0x205   : > { %v5426_v38 = vpack.c.bf16 %v1979_v27, %v1977_v10  ;;  %v5432_v17 = vpack.c.bf16 %v1988_v51, %v1986_v11  ;;  %v1989_v10 = vld [vmem:[%s9638_s4 + $0x340] sm:$0xff]  ;;  %v1991_v27 = vld [vmem:[%s9638_s4 + $0x350] sm:$0xff]  ;;  %v2002_v11 = vld [vmem:[%s9638_s4 + $0x3a8] sm:$0xff] }
 0x206   : > { %5255 = vmatpush1.bf16.msra.mxu1 %v7059_v63  ;;  %v1978_v63 = vld [vmem:[%s9638_s4 + $0x2e8] sm:$0xff] }
 0x207   : > { %5415 = vmatpush1.bf16.msra.mxu0 %v5414_v43  ;;  %5257 = vmatprep.subr.bf16.mxu1 %v7062_v4  ;;  %v1980_v4 = vld [vmem:[%s9638_s4 + $0x2f8] sm:$0xff] }
 0x208   : > { %v7788_v31 = vpop.f32.mrb[2].mxu1  ;;  %5417 = vmatprep.subr.bf16.mxu0 %v5416_v7  ;;  %v5424_v30 = vpack.c.bf16 %v1980_v4, %v1978_v63  ;;  %v1981_v7 = vld [vmem:[%s9638_s4 + $0x300] sm:$0xff]  ;;  %v1990_v63 = vld [vmem:[%s9638_s4 + $0x348] sm:$0xff]  ;;  %v1992_v4 = vld [vmem:[%s9638_s4 + $0x358] sm:$0xff] }
 0x209   : > { %v984_v36 = vpop.f32.mrb[3].mxu1 }
 0x20a   : > { %v7803_v26 = vadd.f32 %v984_v36, %v7445_v46  ;;  %5259 = vmatpush1.bf16.msra.mxu1 %v7065_v13  ;;  %v1982_v13 = vld [vmem:[%s9638_s4 + $0x308] sm:$0xff]  ;;  %v1987_v36 = vld [vmem:[%s9638_s4 + $0x330] sm:$0xff] }
 0x20b   : > { %5419 = vmatpush1.bf16.msra.mxu0 %v5418_v9  ;;  %5261 = vmatprep.subr.bf16.mxu1 %v7068_v19  ;;  %v1984_v19 = vld [vmem:[%s9638_s4 + $0x318] sm:$0xff] }
 0x20c   : > { %v988_v25 = vmax.f32 %v7803_v26, 0.0  ;;  %5421 = vmatprep.subr.bf16.mxu0 %v5420_v12  ;;  %v5428_v43 = vpack.c.bf16 %v1984_v19, %v1982_v13  ;;  %v9763_v9 = vld [vmem:[#allocation20_spill] sm:$0xff]  ;;  %v5430_v12 = vpack.c.bf16 %v1983_v42, %v1981_v7  ;;  %v1994_v13 = vld [vmem:[%s9638_s4 + $0x368] sm:$0xff]  ;;  %v1997_v7 = vld [vmem:[%s9638_s4 + $0x380] sm:$0xff] }
 0x20d   : > { %v1999_v42 = vld [vmem:[%s9638_s4 + $0x390] sm:$0xff]  ;;  %v2058_v26 = vld [vmem:[%s9639_s5 + $0x168] sm:$0xff] }
 0x20e   : > { %5263 = vmatpush1.bf16.msra.mxu1 %v9760_v33  ;;  %2356 = vmatprep.mubr.f32.mxu0 %v988_v25  ;;  %v1993_v33 = vld [vmem:[%s9638_s4 + $0x360] sm:$0xff] }
 0x20f   : > { %5423 = vmatpush1.bf16.msra.mxu0 %v5422_v1  ;;  %5265 = vmatprep.subr.bf16.mxu1 %v9761_v41  ;;  %v5434_v1 = vpack.c.bf16 %v1987_v36, %v1985_v28  ;;  %v1995_v41 = vld [vmem:[%s9638_s4 + $0x370] sm:$0xff]  ;;  %v2005_v28 = vld [vmem:[%s9638_s4 + $0x3c0] sm:$0xff] }
 0x210   : > { %5425 = vmatprep.subr.bf16.mxu0 %v5424_v30  ;;  %v5436_v30 = vpack.c.bf16 %v1992_v4, %v1990_v63  ;;  %v2007_v36 = vld [vmem:[%s9638_s4 + $0x3d0] sm:$0xff]  ;;  %v2010_v63 = vld [vmem:[%s9638_s4 + $0x3e8] sm:$0xff] }
 0x212   : > { %5267 = vmatpush1.bf16.msra.mxu1 %v9762_v56  ;;  %v2001_v56 = vld [vmem:[%s9638_s4 + $0x3a0] sm:$0xff] }
 0x213   : > { %5427 = vmatpush1.bf16.msra.mxu0 %v5426_v38  ;;  %5269 = vmatprep.subr.bf16.mxu1 %v9763_v9  ;;  %v1998_v38 = vld [vmem:[%s9638_s4 + $0x388] sm:$0xff]  ;;  %v2003_v9 = vld [vmem:[%s9638_s4 + $0x3b0] sm:$0xff] }
 0x214   : > { %5429 = vmatprep.subr.bf16.mxu0 %v5428_v43 }
 0x216   : > { %5271 = vmatpush1.bf16.msra.mxu1 %v7089_v55  ;;  %v1996_v55 = vld [vmem:[%s9638_s4 + $0x378] sm:$0xff] }
 0x217   : > { %5431 = vmatpush1.bf16.msra.mxu0 %v5430_v12  ;;  %5273 = vmatprep.subr.bf16.mxu1 %v7092_v61  ;;  %v5438_v61 = vpack.c.bf16 %v1991_v27, %v1989_v10  ;;  %v5440_v19 = vpack.c.bf16 %v1996_v55, %v1994_v13  ;;  %v2006_v12 = vld [vmem:[%s9638_s4 + $0x3c8] sm:$0xff]  ;;  %v7940_v13 = vadd.f32 %v7788_v31, %v7680_v59  ;;  %v2020_v31 = vld [vmem:[%s9639_s5 + $0x38] sm:$0xff] }
 0x218   : > { %5433 = vmatprep.subr.bf16.mxu0 %v5432_v17  ;;  %v2014_v10 = vld [vmem:[%s9639_s5 + $0x8] sm:$0xff] }
 0x21a   : > { %5275 = vmatpush1.bf16.msra.mxu1 %v7096_v6  ;;  %v2000_v6 = vld [vmem:[%s9638_s4 + $0x398] sm:$0xff] }
 0x21b   : > { %5435 = vmatpush1.bf16.msra.mxu0 %v5434_v1  ;;  %5277 = vmatprep.subr.bf16.mxu1 %v7099_v14  ;;  %v5442_v14 = vpack.c.bf16 %v1995_v41, %v1993_v33  ;;  %v5444_v43 = vpack.c.bf16 %v2000_v6, %v1998_v38  ;;  %v2009_v1 = vld [vmem:[%s9638_s4 + $0x3e0] sm:$0xff]  ;;  %v9669_v41 = vmax.f32 %v7940_v13, 0.0 }
 0x21c   : > { %5437 = vmatprep.subr.bf16.mxu0 %v5436_v30  ;;  %v2011_v30 = vld [vmem:[%s9638_s4 + $0x3f0] sm:$0xff]  ;;  %v2017_v6 = vld [vmem:[%s9639_s5 + $0x20] sm:$0xff] }
 0x21e   : > { %5279 = vmatpush1.bf16.msra.mxu1 %v7107_v24  ;;  %v2004_v24 = vld [vmem:[%s9638_s4 + $0x3b8] sm:$0xff] }
 0x21f   : > { %5439 = vmatpush1.bf16.msra.mxu0 %v5438_v61  ;;  %5281 = vmatprep.subr.bf16.mxu1 %v7110_v32  ;;  %v5446_v32 = vpack.c.bf16 %v1999_v42, %v1997_v7  ;;  %v5448_v51 = vpack.c.bf16 %v2004_v24, %v2002_v11  ;;  %v2013_v61 = vld [vmem:[%s9639_s5] sm:$0xff]  ;;  %v2023_v42 = vld [vmem:[%s9639_s5 + $0x50] sm:$0xff] }
 0x220   : > { %5441 = vmatprep.subr.bf16.mxu0 %v5440_v19  ;;  %v2021_v7 = vld [vmem:[%s9639_s5 + $0x40] sm:$0xff] }
 0x221   : > { %v8005_v11 = vpack.c.bf16 %v2023_v42, %v2021_v7 }
 0x222   : > { %5283 = vmatpush1.bf16.msra.mxu1 %v7118_v44  ;;  %v2008_v44 = vld [vmem:[%s9638_s4 + $0x3d8] sm:$0xff] }
 0x223   : > { %5443 = vmatpush1.bf16.msra.mxu0 %v5442_v14  ;;  %5285 = vmatprep.subr.bf16.mxu1 %v7121_v50  ;;  %v5450_v50 = vpack.c.bf16 %v2003_v9, %v2001_v56  ;;  %v5452_v17 = vpack.c.bf16 %v2008_v44, %v2006_v12  ;;  %v2019_v14 = vld [vmem:[%s9639_s5 + $0x30] sm:$0xff]  ;;  %v2029_v9 = vld [vmem:[%s9639_s5 + $0x80] sm:$0xff] }
 0x224   : > { %5445 = vmatprep.subr.bf16.mxu0 %v5444_v43  ;;  %v7984_v43 = vpack.c.bf16 %v2019_v14, %v2017_v6  ;;  %v2031_v12 = vld [vmem:[%s9639_s5 + $0x90] sm:$0xff]  ;;  %v2049_v14 = vld [vmem:[%s9639_s5 + $0x120] sm:$0xff] }
 0x225   : > { %v8045_v44 = vpack.c.bf16 %v2031_v12, %v2029_v9  ;;  %v2062_v9 = vld [vmem:[%s9639_s5 + $0x188] sm:$0xff]  ;;  %v2064_v12 = vld [vmem:[%s9639_s5 + $0x198] sm:$0xff] }
 0x226   : > { %5287 = vmatpush1.bf16.msra.mxu1 %v7124_v60  ;;  %v2012_v60 = vld [vmem:[%s9638_s4 + $0x3f8] sm:$0xff] }
 0x227   : > { %5447 = vmatpush1.bf16.msra.mxu0 %v5446_v32  ;;  %5289 = vmatprep.subr.bf16.mxu1 %v7127_v3  ;;  %v5454_v3 = vpack.c.bf16 %v2007_v36, %v2005_v28  ;;  %v5456_v4 = vpack.c.bf16 %v2012_v60, %v2010_v63  ;;  %v2027_v32 = vld [vmem:[%s9639_s5 + $0x70] sm:$0xff]  ;;  %v2037_v60 = vld [vmem:[%s9639_s5 + $0xc0] sm:$0xff] }
 0x228   : > { %5449 = vmatprep.subr.bf16.mxu0 %v5448_v51  ;;  %v2035_v28 = vld [vmem:[%s9639_s5 + $0xb0] sm:$0xff] }
 0x229   : > { %v7936_v27 = vpop.f32.mrb[2].mxu0 }
 0x22a   : > { %5291 = vmatpush1.bf16.msra.mxu1 %v7130_v16  ;;  %v2016_v16 = vld [vmem:[%s9639_s5 + $0x18] sm:$0xff]  ;;  %v7950_v19 = vpop.f32.mrb[3].mxu0 }
 0x22b   : > { %5451 = vmatpush1.bf16.msra.mxu0 %v5450_v50  ;;  %5293 = vmatprep.subr.bf16.mxu1 %v7133_v23  ;;  %v5458_v23 = vpack.c.bf16 %v2011_v30, %v2009_v1  ;;  %v7942_v55 = vpack.c.bf16 %v2016_v16, %v2014_v10  ;;  %v2041_v30 = vld [vmem:[%s9639_s5 + $0xe0] sm:$0xff]  ;;  %v2043_v10 = vld [vmem:[%s9639_s5 + $0xf0] sm:$0xff] }
 0x22c   : > { %5453 = vmatprep.subr.bf16.mxu0 %v5452_v17  ;;  %v2033_v17 = vld [vmem:[%s9639_s5 + $0xa0] sm:$0xff]  ;;  %v8105_v16 = vpack.c.bf16 %v2043_v10, %v2041_v30  ;;  %v2070_v30 = vld [vmem:[%s9639_s5 + $0x1c8] sm:$0xff]  ;;  %v2072_v10 = vld [vmem:[%s9639_s5 + $0x1d8] sm:$0xff] }
 0x22d   : > { %v8065_v36 = vpack.c.bf16 %v2035_v28, %v2033_v17  ;;  %v2061_v17 = vld [vmem:[%s9639_s5 + $0x180] sm:$0xff]  ;;  %v2063_v28 = vld [vmem:[%s9639_s5 + $0x190] sm:$0xff] }
 0x22e   : > { %5295 = vmatpush1.bf16.msra.mxu1 %v7136_v37  ;;  %v2015_v37 = vld [vmem:[%s9639_s5 + $0x10] sm:$0xff] }
 0x22f   : > { %5455 = vmatpush1.bf16.msra.mxu0 %v5454_v3  ;;  %5297 = vmatprep.subr.bf16.mxu1 %v7139_v45  ;;  %v2018_v45 = vld [vmem:[%s9639_s5 + $0x28] sm:$0xff]  ;;  %v7960_v33 = vpack.c.bf16 %v2015_v37, %v2013_v61  ;;  %v2039_v3 = vld [vmem:[%s9639_s5 + $0xd0] sm:$0xff]  ;;  %v2045_v61 = vld [vmem:[%s9639_s5 + $0x100] sm:$0xff] }
 0x230   : > { %5457 = vmatprep.subr.bf16.mxu0 %v5456_v4  ;;  %v7964_v38 = vpack.c.bf16 %v2020_v31, %v2018_v45  ;;  %v8085_v4 = vpack.c.bf16 %v2039_v3, %v2037_v60  ;;  %v2047_v37 = vld [vmem:[%s9639_s5 + $0x110] sm:$0xff]  ;;  %v1738_v45 = vld [vmem:[%s7104_s29 + $0x78] sm:$0xff]  ;;  %v8208_v60 = vpack.c.bf16 %v2063_v28, %v2061_v17  ;;  %v2077_v17 = vld [vmem:[%s9639_s5 + $0x200] sm:$0xff] }
 0x231   : > { %v8126_v31 = vpack.c.bf16 %v2047_v37, %v2045_v61  ;;  %v8231_v61 = vpack.c.bf16 %v2072_v10, %v2070_v30  ;;  %v2069_v37 = vld [vmem:[%s9639_s5 + $0x1c0] sm:$0xff]  ;;  %v2079_v28 = vld [vmem:[%s9639_s5 + $0x210] sm:$0xff] }
 0x232   : > { %5299 = vmatpush1.bf16.msra.mxu1 %v7142_v54  ;;  %v2022_v54 = vld [vmem:[%s9639_s5 + $0x48] sm:$0xff]  ;;  %v2081_v10 = vld [vmem:[%s9639_s5 + $0x220] sm:$0xff] }
 0x233   : > { %5459 = vmatpush1.bf16.msra.mxu0 %v5458_v23  ;;  %5301 = vmatprep.subr.bf16.mxu1 %v7145_v57  ;;  %v2024_v57 = vld [vmem:[%s9639_s5 + $0x58] sm:$0xff]  ;;  %9764 = vst [vmem:[#allocation17_spill] sm:$0xff] %v8231_v61 }
 0x234   : > { %5653 = vmatprep.subr.bf16.mxu0 %v7942_v55 }
 0x235   : > { %1804 = vmatmul.mubr.f32.vlgmr.msra.gmra.mrb[8].mxu1 %v7474_v53  ;;  %v7987_v53 = vpack.c.bf16 %v2024_v57, %v2022_v54  ;;  %v2051_v54 = vld [vmem:[%s9639_s5 + $0x130] sm:$0xff]  ;;  %v2056_v57 = vld [vmem:[%s9639_s5 + $0x158] sm:$0xff] }
 0x236   : > { %2357 = vmatmul.mubr.f32.vlgmr.msra.gmra.mrb[6].mxu0 %v9669_v41  ;;  %5303 = vmatpush1.bf16.msra.mxu1 %v7153_v5  ;;  %v2026_v5 = vld [vmem:[%s9639_s5 + $0x68] sm:$0xff]  ;;  %v8148_v7 = vpack.c.bf16 %v2051_v54, %v2049_v14  ;;  %v2076_v14 = vld [vmem:[%s9639_s5 + $0x1f8] sm:$0xff]  ;;  %v2105_v41 = vld [vmem:[%s9639_s5 + $0x2e0] sm:$0xff] }
 0x237   : > { %5655 = vmatpush1.bf16.msra.mxu0 %v7960_v33  ;;  %5305 = vmatprep.subr.bf16.mxu1 %v7156_v8  ;;  %v2028_v8 = vld [vmem:[%s9639_s5 + $0x78] sm:$0xff] }
 0x238   : > { %5657 = vmatprep.subr.bf16.mxu0 %v7964_v38  ;;  %1874 = vmatprep.mubr.f32.mxu1 %v9758_v29  ;;  %v8008_v24 = vpack.c.bf16 %v2028_v8, %v2026_v5  ;;  %v2025_v29 = vld [vmem:[%s9639_s5 + $0x60] sm:$0xff]  ;;  %v2055_v8 = vld [vmem:[%s9639_s5 + $0x150] sm:$0xff] }
 0x239   : > { %v8025_v51 = vpack.c.bf16 %v2027_v32, %v2025_v29  ;;  %v2053_v5 = vld [vmem:[%s9639_s5 + $0x140] sm:$0xff] }
 0x23a   : > { %5307 = vmatpush1.bf16.msra.mxu1 %v7163_v20  ;;  %v2030_v20 = vld [vmem:[%s9639_s5 + $0x88] sm:$0xff]  ;;  %v8168_v29 = vpack.c.bf16 %v2055_v8, %v2053_v5  ;;  %v2073_v8 = vld [vmem:[%s9639_s5 + $0x1e0] sm:$0xff] }
 0x23b   : > { %5659 = vmatpush1.bf16.msra.mxu0 %v7984_v43  ;;  %5309 = vmatprep.subr.bf16.mxu1 %v7166_v21  ;;  %v2032_v21 = vld [vmem:[%s9639_s5 + $0x98] sm:$0xff] }
 0x23c   : > { %5661 = vmatprep.subr.bf16.mxu0 %v7987_v53  ;;  %v8028_v56 = vpack.c.bf16 %v2032_v21, %v2030_v20  ;;  %v2057_v20 = vld [vmem:[%s9639_s5 + $0x160] sm:$0xff]  ;;  %v2059_v21 = vld [vmem:[%s9639_s5 + $0x170] sm:$0xff] }
 0x23e   : > { %5311 = vmatpush1.bf16.msra.mxu1 %v7172_v34  ;;  %v2034_v34 = vld [vmem:[%s9639_s5 + $0xa8] sm:$0xff] }
 0x23f   : > { %5663 = vmatpush1.bf16.msra.mxu0 %v8005_v11  ;;  %5313 = vmatprep.subr.bf16.mxu1 %v7175_v35  ;;  %v2036_v35 = vld [vmem:[%s9639_s5 + $0xb8] sm:$0xff] }
 0x240   : > { %5665 = vmatprep.subr.bf16.mxu0 %v8008_v24  ;;  %v8048_v50 = vpack.c.bf16 %v2036_v35, %v2034_v34  ;;  %v8188_v34 = vpack.c.bf16 %v2059_v21, %v2057_v20  ;;  %v8191_v35 = vpack.c.bf16 %v2064_v12, %v2062_v9  ;;  %v2080_v20 = vld [vmem:[%s9639_s5 + $0x218] sm:$0xff] }
 0x242   : > { %5315 = vmatpush1.bf16.msra.mxu1 %v7180_v48  ;;  %v2038_v48 = vld [vmem:[%s9639_s5 + $0xc8] sm:$0xff] }
 0x243   : > { %5667 = vmatpush1.bf16.msra.mxu0 %v8025_v51  ;;  %5317 = vmatprep.subr.bf16.mxu1 %v7183_v49  ;;  %v2040_v49 = vld [vmem:[%s9639_s5 + $0xd8] sm:$0xff] }
 0x244   : > { %5669 = vmatprep.subr.bf16.mxu0 %v8028_v56  ;;  %v8068_v63 = vpack.c.bf16 %v2040_v49, %v2038_v48  ;;  %v2066_v48 = vld [vmem:[%s9639_s5 + $0x1a8] sm:$0xff]  ;;  %v2068_v49 = vld [vmem:[%s9639_s5 + $0x1b8] sm:$0xff] }
 0x245   : > { %v8211_v3 = vpack.c.bf16 %v2068_v49, %v2066_v48  ;;  %v6491_v48 = vadd.f32 %v7950_v19, %v7445_v46  ;;  %v2082_v49 = vld [vmem:[%s9639_s5 + $0x228] sm:$0xff] }
 0x246   : > { %5319 = vmatpush1.bf16.msra.mxu1 %v7188_v62  ;;  %v2042_v62 = vld [vmem:[%s9639_s5 + $0xe8] sm:$0xff] }
 0x247   : > { %5671 = vmatpush1.bf16.msra.mxu0 %v8045_v44  ;;  %5321 = vmatprep.subr.bf16.mxu1 %v7191_v0  ;;  %v2044_v0 = vld [vmem:[%s9639_s5 + $0xf8] sm:$0xff] }
 0x248   : > { %5673 = vmatprep.subr.bf16.mxu0 %v8048_v50  ;;  %v8088_v1 = vpack.c.bf16 %v2044_v0, %v2042_v62  ;;  %v2065_v62 = vld [vmem:[%s9639_s5 + $0x1a0] sm:$0xff]  ;;  %v2067_v0 = vld [vmem:[%s9639_s5 + $0x1b0] sm:$0xff] }
 0x24a   : > { %5323 = vmatpush1.bf16.msra.mxu1 %v7196_v15  ;;  %v2046_v15 = vld [vmem:[%s9639_s5 + $0x108] sm:$0xff] }
 0x24b   : > { %5675 = vmatpush1.bf16.msra.mxu0 %v8065_v36  ;;  %5325 = vmatprep.subr.bf16.mxu1 %v7199_v18  ;;  %v2048_v18 = vld [vmem:[%s9639_s5 + $0x118] sm:$0xff] }
 0x24c   : > { %5677 = vmatprep.subr.bf16.mxu0 %v8068_v63  ;;  %v8108_v23 = vpack.c.bf16 %v2048_v18, %v2046_v15  ;;  %v8228_v15 = vpack.c.bf16 %v2067_v0, %v2065_v62  ;;  %v2084_v62 = vld [vmem:[%s9639_s5 + $0x238] sm:$0xff]  ;;  %v8299_v0 = vpack.c.bf16 %v2079_v28, %v2077_v17 }
 0x24d   : > { %v8303_v19 = vpack.c.bf16 %v2084_v62, %v2082_v49  ;;  %v2091_v49 = vld [vmem:[%s9639_s5 + $0x270] sm:$0xff]  ;;  %v2094_v62 = vld [vmem:[%s9639_s5 + $0x288] sm:$0xff] }
 0x24e   : > { %5327 = vmatpush1.bf16.msra.mxu1 %v7204_v39  ;;  %v2050_v39 = vld [vmem:[%s9639_s5 + $0x128] sm:$0xff]  ;;  %9769 = vst [vmem:[#allocation25_spill] sm:$0xff] %v8299_v0 }
 0x24f   : > { %5679 = vmatpush1.bf16.msra.mxu0 %v8085_v4  ;;  %5329 = vmatprep.subr.bf16.mxu1 %v7207_v40  ;;  %v2052_v40 = vld [vmem:[%s9639_s5 + $0x138] sm:$0xff]  ;;  %9770 = vst [vmem:[#allocation26_spill] sm:$0xff] %v8303_v19 }
 0x250   : > { %5681 = vmatprep.subr.bf16.mxu0 %v8088_v1  ;;  %v8129_v6 = vpack.c.bf16 %v2052_v40, %v2050_v39  ;;  %v2071_v39 = vld [vmem:[%s9639_s5 + $0x1d0] sm:$0xff] }
 0x252   : > { %5331 = vmatpush1.bf16.msra.mxu1 %v7212_v52  ;;  %v2054_v52 = vld [vmem:[%s9639_s5 + $0x148] sm:$0xff] }
 0x253   : > { %5683 = vmatpush1.bf16.msra.mxu0 %v8105_v16  ;;  %5461 = vmatprep.subr.bf16.mxu1 %v7942_v55  ;;  %v8151_v42 = vpack.c.bf16 %v2056_v57, %v2054_v52  ;;  %v8251_v52 = vpack.c.bf16 %v2071_v39, %v2069_v37  ;;  %v1435_v37 = vmax.f32 %v6491_v48, 0.0  ;;  %v2086_v39 = vld [vmem:[%s9639_s5 + $0x248] sm:$0xff]  ;;  %v2089_v48 = vld [vmem:[%s9639_s5 + $0x260] sm:$0xff] }
 0x254   : > { %5685 = vmatprep.subr.bf16.mxu0 %v8108_v23 }
 0x255   : > { %1875 = vmatmul.mubr.f32.vlgmr.msra.gmra.mrb[8].mxu1 %v1738_v45  ;;  %v2074_v45 = vld [vmem:[%s9639_s5 + $0x1e8] sm:$0xff]  ;;  %9765 = vst [vmem:[#allocation18_spill] sm:$0xff] %v8251_v52 }
 0x256   : > { %5463 = vmatpush1.bf16.msra.mxu1 %v7960_v33  ;;  %2437 = vmatprep.mubr.f32.mxu1 %v988_v25  ;;  %v2060_v25 = vld [vmem:[%s9639_s5 + $0x178] sm:$0xff]  ;;  %v8255_v5 = vpack.c.bf16 %v2076_v14, %v2074_v45 }
 0x257   : > { %5687 = vmatpush1.bf16.msra.mxu0 %v8126_v31  ;;  %5465 = vmatprep.subr.bf16.mxu1 %v7964_v38  ;;  %v8171_v32 = vpack.c.bf16 %v2060_v25, %v2058_v26  ;;  %v2075_v26 = vld [vmem:[%s9639_s5 + $0x1f0] sm:$0xff]  ;;  %v2078_v25 = vld [vmem:[%s9639_s5 + $0x208] sm:$0xff] }
 0x258   : > { %5689 = vmatprep.subr.bf16.mxu0 %v8129_v6  ;;  %9766 = vst [vmem:[#allocation19_spill] sm:$0xff] %v8255_v5  ;;  %v8274_v21 = vpack.c.bf16 %v2075_v26, %v2073_v8  ;;  %v8280_v12 = vpack.c.bf16 %v2080_v20, %v2078_v25  ;;  %v2085_v8 = vld [vmem:[%s9639_s5 + $0x240] sm:$0xff]  ;;  %v2087_v26 = vld [vmem:[%s9639_s5 + $0x250] sm:$0xff]  ;;  %v2090_v25 = vld [vmem:[%s9639_s5 + $0x268] sm:$0xff] }
 0x259   : > { %v2092_v20 = vld [vmem:[%s9639_s5 + $0x278] sm:$0xff]  ;;  %v8342_v17 = vpack.c.bf16 %v2087_v26, %v2085_v8  ;;  %v2098_v8 = vld [vmem:[%s9639_s5 + $0x2a8] sm:$0xff] }
 0x25a   : > { %5467 = vmatpush1.bf16.msra.mxu1 %v7984_v43  ;;  %9767 = vst [vmem:[#allocation20_spill] sm:$0xff] %v8274_v21  ;;  %9768 = vst [vmem:[#allocation24_spill] sm:$0xff] %v8280_v12  ;;  %v8345_v28 = vpack.c.bf16 %v2092_v20, %v2090_v25  ;;  %v2100_v26 = vld [vmem:[%s9639_s5 + $0x2b8] sm:$0xff] }
 0x25b   : > { %5691 = vmatpush1.bf16.msra.mxu0 %v8148_v7  ;;  %5469 = vmatprep.subr.bf16.mxu1 %v7987_v53  ;;  %9773 = vst [vmem:[#allocation29_spill] sm:$0xff] %v8342_v17  ;;  %v8385_v20 = vpack.c.bf16 %v2100_v26, %v2098_v8  ;;  %v2101_v8 = vld [vmem:[%s9639_s5 + $0x2c0] sm:$0xff]  ;;  %v2103_v26 = vld [vmem:[%s9639_s5 + $0x2d0] sm:$0xff] }
 0x25c   : > { %5693 = vmatprep.subr.bf16.mxu0 %v8151_v42  ;;  %9774 = vst [vmem:[#allocation30_spill] sm:$0xff] %v8345_v28 }
 0x25d   : > { %9778 = vst [vmem:[#allocation34_spill] sm:$0xff] %v8385_v20 }
 0x25e   : > { %5471 = vmatpush1.bf16.msra.mxu1 %v8005_v11 }
 0x25f   : > { %5695 = vmatpush1.bf16.msra.mxu0 %v8168_v29  ;;  %5473 = vmatprep.subr.bf16.mxu1 %v8008_v24 }
 0x260   : > { %5697 = vmatprep.subr.bf16.mxu0 %v8171_v32 }
 0x262   : > { %5475 = vmatpush1.bf16.msra.mxu1 %v8025_v51 }
 0x263   : > { %5699 = vmatpush1.bf16.msra.mxu0 %v8188_v34  ;;  %5477 = vmatprep.subr.bf16.mxu1 %v8028_v56 }
 0x264   : > { %5701 = vmatprep.subr.bf16.mxu0 %v8191_v35 }
 0x266   : > { %5479 = vmatpush1.bf16.msra.mxu1 %v8045_v44 }
 0x267   : > { %5703 = vmatpush1.bf16.msra.mxu0 %v8208_v60  ;;  %5481 = vmatprep.subr.bf16.mxu1 %v8048_v50 }
 0x268   : > { %v1280_v18 = vpop.f32.mrb[4].mxu1  ;;  %5705 = vmatprep.subr.bf16.mxu0 %v8211_v3 }
 0x269   : > { %v1282_v40 = vpop.f32.mrb[5].mxu1  ;;  %v8277_v9 = vadd.f32 %v1280_v18, %v7680_v59  ;;  %v2083_v18 = vld [vmem:[%s9639_s5 + $0x230] sm:$0xff] }
 0x26a   : > { %v8246_v54 = vadd.f32 %v1282_v40, %v7445_v46  ;;  %5483 = vmatpush1.bf16.msra.mxu1 %v8065_v36  ;;  %v2088_v40 = vld [vmem:[%s9639_s5 + $0x258] sm:$0xff]  ;;  %v8322_v45 = vpack.c.bf16 %v2083_v18, %v2081_v10  ;;  %v8362_v18 = vpack.c.bf16 %v2091_v49, %v2089_v48  ;;  %v2097_v48 = vld [vmem:[%s9639_s5 + $0x2a0] sm:$0xff]  ;;  %v2099_v49 = vld [vmem:[%s9639_s5 + $0x2b0] sm:$0xff] }
 0x26b   : > { %5707 = vmatpush1.bf16.msra.mxu0 %v8228_v15  ;;  %5485 = vmatprep.subr.bf16.mxu1 %v8068_v63  ;;  %v9667_v30 = vmax.f32 %v8277_v9, 0.0  ;;  %v8325_v14 = vpack.c.bf16 %v2088_v40, %v2086_v39  ;;  %v2096_v10 = vld [vmem:[%s9639_s5 + $0x298] sm:$0xff]  ;;  %v2093_v39 = vld [vmem:[%s9639_s5 + $0x280] sm:$0xff]  ;;  %v2095_v40 = vld [vmem:[%s9639_s5 + $0x290] sm:$0xff] }
 0x26c   : > { %v9668_v57 = vmax.f32 %v8246_v54, 0.0  ;;  %5709 = vmatprep.subr.bf16.mxu0 %v8231_v61  ;;  %9771 = vst [vmem:[#allocation27_spill] sm:$0xff] %v8322_v45  ;;  %9775 = vst [vmem:[#allocation31_spill] sm:$0xff] %v8362_v18  ;;  %v8382_v25 = vpack.c.bf16 %v2095_v40, %v2093_v39  ;;  %v8402_v39 = vpack.c.bf16 %v2099_v49, %v2097_v48  ;;  %v2108_v48 = vld [vmem:[%s9639_s5 + $0x2f8] sm:$0xff] }
 0x26d   : > { %9772 = vst [vmem:[#allocation28_spill] sm:$0xff] %v8325_v14 }
 0x26e   : > { %5487 = vmatpush1.bf16.msra.mxu1 %v8085_v4  ;;  %2660 = vmatprep.mubr.f32.mxu0 %v9668_v57  ;;  %9777 = vst [vmem:[#allocation33_spill] sm:$0xff] %v8382_v25  ;;  %9779 = vst [vmem:[#allocation35_spill] sm:$0xff] %v8402_v39 }
 0x26f   : > { %5711 = vmatpush1.bf16.msra.mxu0 %v8251_v52  ;;  %5489 = vmatprep.subr.bf16.mxu1 %v8088_v1 }
 0x270   : > { %5713 = vmatprep.subr.bf16.mxu0 %v8255_v5 }
 0x272   : > { %5491 = vmatpush1.bf16.msra.mxu1 %v8105_v16 }
 0x273   : > { %5715 = vmatpush1.bf16.msra.mxu0 %v8274_v21  ;;  %5493 = vmatprep.subr.bf16.mxu1 %v8108_v23 }
 0x274   : > { %5717 = vmatprep.subr.bf16.mxu0 %v8280_v12 }
 0x276   : > { %2661 = vmatmul.mubr.f32.vlgmr.msra.gmra.mrb[8].mxu0 %v9667_v30  ;;  %5495 = vmatpush1.bf16.msra.mxu1 %v8126_v31  ;;  %v2106_v30 = vld [vmem:[%s9639_s5 + $0x2e8] sm:$0xff] }
 0x277   : > { %5719 = vmatpush1.bf16.msra.mxu0 %v8299_v0  ;;  %5497 = vmatprep.subr.bf16.mxu1 %v8129_v6  ;;  %v8429_v57 = vpack.c.bf16 %v2108_v48, %v2106_v30  ;;  %v8446_v30 = vpack.c.bf16 %v2107_v22, %v2105_v41  ;;  %v2114_v22 = vld [vmem:[%s9639_s5 + $0x328] sm:$0xff] }
 0x278   : > { %5721 = vmatprep.subr.bf16.mxu0 %v8303_v19  ;;  %2731 = vmatprep.mubr.f32.mxu0 %v1435_v37  ;;  %v8365_v37 = vpack.c.bf16 %v2096_v10, %v2094_v62  ;;  %v2102_v62 = vld [vmem:[%s9639_s5 + $0x2c8] sm:$0xff]  ;;  %v2104_v10 = vld [vmem:[%s9639_s5 + $0x2d8] sm:$0xff] }
 0x279   : > { %v8405_v40 = vpack.c.bf16 %v2104_v10, %v2102_v62  ;;  %v8426_v10 = vpack.c.bf16 %v2103_v26, %v2101_v8  ;;  %9784 = vst [vmem:[#allocation40_spill] sm:$0xff] %v8429_v57  ;;  %v2112_v8 = vld [vmem:[%s9639_s5 + $0x318] sm:$0xff]  ;;  %9785 = vst [vmem:[#allocation41_spill] sm:$0xff] %v8446_v30  ;;  %v6487_v26 = vadd.f32 %v7786_v2, %v7445_v46 }
 0x27a   : > { %5499 = vmatpush1.bf16.msra.mxu1 %v8148_v7  ;;  %9776 = vst [vmem:[#allocation32_spill] sm:$0xff] %v8365_v37  ;;  %v2116_v2 = vld [vmem:[%s9639_s5 + $0x338] sm:$0xff] }
 0x27b   : > { %5723 = vmatpush1.bf16.msra.mxu0 %v8322_v45  ;;  %5501 = vmatprep.subr.bf16.mxu1 %v8151_v42  ;;  %9780 = vst [vmem:[#allocation36_spill] sm:$0xff] %v8405_v40  ;;  %9783 = vst [vmem:[#allocation39_spill] sm:$0xff] %v8426_v10 }
 0x27c   : > { %5725 = vmatprep.subr.bf16.mxu0 %v8325_v14 }
 0x27e   : > { %5503 = vmatpush1.bf16.msra.mxu1 %v8168_v29 }
 0x27f   : > { %5727 = vmatpush1.bf16.msra.mxu0 %v8342_v17  ;;  %5505 = vmatprep.subr.bf16.mxu1 %v8171_v32 }
 0x280   : > { %5729 = vmatprep.subr.bf16.mxu0 %v8345_v28 }
 0x282   : > { %5507 = vmatpush1.bf16.msra.mxu1 %v8188_v34 }
 0x283   : > { %5731 = vmatpush1.bf16.msra.mxu0 %v8362_v18  ;;  %5509 = vmatprep.subr.bf16.mxu1 %v8191_v35 }
 0x284   : > { %5733 = vmatprep.subr.bf16.mxu0 %v8365_v37 }
 0x286   : > { %5511 = vmatpush1.bf16.msra.mxu1 %v8208_v60 }
 0x287   : > { %5735 = vmatpush1.bf16.msra.mxu0 %v8382_v25  ;;  %5513 = vmatprep.subr.bf16.mxu1 %v8211_v3 }
 0x288   : > { %5737 = vmatprep.subr.bf16.mxu0 %v8385_v20 }
 0x289   : > { %v8419_v49 = vpop.f32.mrb[4].mxu0 }
 0x28a   : > { %9781 = vst [vmem:[#allocation37_spill] sm:$0xff] %v8419_v49  ;;  %5515 = vmatpush1.bf16.msra.mxu1 %v8228_v15  ;;  %v8422_v62 = vpop.f32.mrb[5].mxu0  ;;  %v2110_v49 = vld [vmem:[%s9639_s5 + $0x308] sm:$0xff] }
 0x28b   : > { %9782 = vst [vmem:[#allocation38_spill] sm:$0xff] %v8422_v62  ;;  %5739 = vmatpush1.bf16.msra.mxu0 %v8402_v39  ;;  %5517 = vmatprep.subr.bf16.mxu1 %v8231_v61  ;;  %v8451_v48 = vpack.c.bf16 %v2112_v8, %v2110_v49  ;;  %v2109_v62 = vld [vmem:[%s9639_s5 + $0x300] sm:$0xff]  ;;  %v1137_v49 = vmax.f32 %v6487_v26, 0.0  ;;  %v8471_v8 = vpack.c.bf16 %v2116_v2, %v2114_v22  ;;  %v2115_v61 = vld [vmem:[%s9639_s5 + $0x330] sm:$0xff]  ;;  %v2122_v2 = vld [vmem:[%s9639_s5 + $0x368] sm:$0xff] }
 0x28c   : > { %5741 = vmatprep.subr.bf16.mxu0 %v8405_v40  ;;  %v2119_v22 = vld [vmem:[%s9639_s5 + $0x350] sm:$0xff] }
 0x28d   : > { %9786 = vst [vmem:[#allocation42_spill] sm:$0xff] %v8451_v48  ;;  %9788 = vst [vmem:[#allocation44_spill] sm:$0xff] %v8471_v8 }
 0x28e   : > { %5519 = vmatpush1.bf16.msra.mxu1 %v8251_v52  ;;  %v2111_v52 = vld [vmem:[%s9639_s5 + $0x310] sm:$0xff] }
 0x28f   : > { %5743 = vmatpush1.bf16.msra.mxu0 %v8426_v10  ;;  %5521 = vmatprep.subr.bf16.mxu1 %v8255_v5  ;;  %v8468_v41 = vpack.c.bf16 %v2111_v52, %v2109_v62  ;;  %v2113_v5 = vld [vmem:[%s9639_s5 + $0x320] sm:$0xff]  ;;  %v2118_v52 = vld [vmem:[%s9639_s5 + $0x348] sm:$0xff]  ;;  %v2120_v62 = vld [vmem:[%s9639_s5 + $0x358] sm:$0xff] }
 0x290   : > { %5745 = vmatprep.subr.bf16.mxu0 %v8429_v57  ;;  %v8490_v26 = vpack.c.bf16 %v2115_v61, %v2113_v5  ;;  %v2124_v61 = vld [vmem:[%s9639_s5 + $0x378] sm:$0xff] }
 0x291   : > { %9787 = vst [vmem:[#allocation43_spill] sm:$0xff] %v8468_v41 }
 0x292   : > { %5523 = vmatpush1.bf16.msra.mxu1 %v8274_v21  ;;  %v9789_v21 = vmax.f32 %v7940_v13, 0.0  ;;  %9790 = vst [vmem:[#allocation45_spill] sm:$0xff] %v8490_v26  ;;  %v8493_v13 = vpack.c.bf16 %v2120_v62, %v2118_v52  ;;  %v2121_v52 = vld [vmem:[%s9639_s5 + $0x360] sm:$0xff]  ;;  %v2123_v62 = vld [vmem:[%s9639_s5 + $0x370] sm:$0xff] }
 0x293   : > { %5747 = vmatpush1.bf16.msra.mxu0 %v8446_v30  ;;  %5525 = vmatprep.subr.bf16.mxu1 %v8280_v12  ;;  %v3057_v12 = vld [vmem:[#allocation9 + $0xa8] sm:$0xff] }
 0x294   : > { %5749 = vmatprep.subr.bf16.mxu0 %v8451_v48  ;;  %9791 = vst [vmem:[#allocation46_spill] sm:$0xff] %v8493_v13 }
 0x295   : > { %2438 = vmatmul.mubr.f32.vlgmr.msra.gmra.mrb[10].mxu1 %v9789_v21  ;;  %v2117_v21 = vld [vmem:[%s9639_s5 + $0x340] sm:$0xff] }
 0x296   : > { %5527 = vmatpush1.bf16.msra.mxu1 %v8299_v0  ;;  %2508 = vmatprep.mubr.f32.mxu1 %v1137_v49  ;;  %v8510_v5 = vpack.c.bf16 %v2119_v22, %v2117_v21  ;;  %v8513_v49 = vpack.c.bf16 %v2124_v61, %v2122_v2  ;;  %v2128_v21 = vld [vmem:[%s9639_s5 + $0x398] sm:$0xff]  ;;  %v8530_v22 = vpack.c.bf16 %v2123_v62, %v2121_v52  ;;  %v2125_v61 = vld [vmem:[%s9639_s5 + $0x380] sm:$0xff] }
 0x297   : > { %5751 = vmatpush1.bf16.msra.mxu0 %v8468_v41  ;;  %5529 = vmatprep.subr.bf16.mxu1 %v8303_v19  ;;  %v2132_v52 = vld [vmem:[%s9639_s5 + $0x3b8] sm:$0xff]  ;;  %v2169_v0 = vld [vmem:[%s9639_s5 + $0x4e0] sm:$0xff] }
 0x298   : > { %5753 = vmatprep.subr.bf16.mxu0 %v8471_v8  ;;  %9792 = vst [vmem:[#allocation47_spill] sm:$0xff] %v8510_v5  ;;  %9793 = vst [vmem:[#allocation48_spill] sm:$0xff] %v8513_v49 }
 0x299   : > { %9794 = vst [vmem:[#allocation49_spill] sm:$0xff] %v8530_v22 }
 0x29a   : > { %5531 = vmatpush1.bf16.msra.mxu1 %v8322_v45  ;;  %v2126_v45 = vld [vmem:[%s9639_s5 + $0x388] sm:$0xff] }
 0x29b   : > { %5755 = vmatpush1.bf16.msra.mxu0 %v8490_v26  ;;  %5533 = vmatprep.subr.bf16.mxu1 %v8325_v14  ;;  %v8533_v2 = vpack.c.bf16 %v2128_v21, %v2126_v45  ;;  %v2127_v14 = vld [vmem:[%s9639_s5 + $0x390] sm:$0xff]  ;;  %v2129_v21 = vld [vmem:[%s9639_s5 + $0x3a0] sm:$0xff] }
 0x29c   : > { %5757 = vmatprep.subr.bf16.mxu0 %v8493_v13  ;;  %v8550_v45 = vpack.c.bf16 %v2127_v14, %v2125_v61  ;;  %v2136_v14 = vld [vmem:[%s9639_s5 + $0x3d8] sm:$0xff] }
 0x29d   : > { %9795 = vst [vmem:[#allocation50_spill] sm:$0xff] %v8533_v2 }
 0x29e   : > { %5535 = vmatpush1.bf16.msra.mxu1 %v8342_v17  ;;  %v2130_v17 = vld [vmem:[%s9639_s5 + $0x3a8] sm:$0xff]  ;;  %9796 = vst [vmem:[#allocation51_spill] sm:$0xff] %v8550_v45 }
 0x29f   : > { %5759 = vmatpush1.bf16.msra.mxu0 %v8510_v5  ;;  %5537 = vmatprep.subr.bf16.mxu1 %v8345_v28  ;;  %v8553_v62 = vpack.c.bf16 %v2132_v52, %v2130_v17  ;;  %v2131_v28 = vld [vmem:[%s9639_s5 + $0x3b0] sm:$0xff]  ;;  %v2133_v52 = vld [vmem:[%s9639_s5 + $0x3c0] sm:$0xff] }
 0x2a0   : > { %5761 = vmatprep.subr.bf16.mxu0 %v8513_v49  ;;  %v8570_v17 = vpack.c.bf16 %v2131_v28, %v2129_v21  ;;  %v2140_v28 = vld [vmem:[%s9639_s5 + $0x3f8] sm:$0xff] }
 0x2a1   : > { %9797 = vst [vmem:[#allocation52_spill] sm:$0xff] %v8553_v62 }
 0x2a2   : > { %5539 = vmatpush1.bf16.msra.mxu1 %v8362_v18  ;;  %v2134_v18 = vld [vmem:[%s9639_s5 + $0x3c8] sm:$0xff]  ;;  %9798 = vst [vmem:[#allocation53_spill] sm:$0xff] %v8570_v17 }
 0x2a3   : > { %5763 = vmatpush1.bf16.msra.mxu0 %v8530_v22  ;;  %5541 = vmatprep.subr.bf16.mxu1 %v8365_v37  ;;  %v8573_v61 = vpack.c.bf16 %v2136_v14, %v2134_v18  ;;  %v2135_v37 = vld [vmem:[%s9639_s5 + $0x3d0] sm:$0xff]  ;;  %v2137_v14 = vld [vmem:[%s9639_s5 + $0x3e0] sm:$0xff] }
 0x2a4   : > { %5765 = vmatprep.subr.bf16.mxu0 %v8533_v2  ;;  %v8590_v18 = vpack.c.bf16 %v2135_v37, %v2133_v52  ;;  %v2144_v37 = vld [vmem:[%s9639_s5 + $0x418] sm:$0xff] }
 0x2a5   : > { %9799 = vst [vmem:[#allocation54_spill] sm:$0xff] %v8573_v61 }
 0x2a6   : > { %5543 = vmatpush1.bf16.msra.mxu1 %v8382_v25  ;;  %v2138_v25 = vld [vmem:[%s9639_s5 + $0x3e8] sm:$0xff]  ;;  %9800 = vst [vmem:[#allocation55_spill] sm:$0xff] %v8590_v18 }
 0x2a7   : > { %5767 = vmatpush1.bf16.msra.mxu0 %v8550_v45  ;;  %5545 = vmatprep.subr.bf16.mxu1 %v8385_v20  ;;  %v8593_v21 = vpack.c.bf16 %v2140_v28, %v2138_v25  ;;  %v2139_v20 = vld [vmem:[%s9639_s5 + $0x3f0] sm:$0xff]  ;;  %v6490_v25 = vadd.f32 %v7936_v27, %v7680_v59  ;;  %v2146_v27 = vld [vmem:[%s9639_s5 + $0x428] sm:$0xff] }
 0x2a8   : > { %5769 = vmatprep.subr.bf16.mxu0 %v8553_v62  ;;  %v8612_v52 = vpack.c.bf16 %v2139_v20, %v2137_v14  ;;  %v2148_v20 = vld [vmem:[%s9639_s5 + $0x438] sm:$0xff] }
 0x2a9   : > { %9801 = vst [vmem:[#allocation56_spill] sm:$0xff] %v8593_v21  ;;  %v1434_v14 = vmax.f32 %v6490_v25, 0.0  ;;  %v2147_v25 = vld [vmem:[%s9639_s5 + $0x430] sm:$0xff] }
 0x2aa   : > { %5547 = vmatpush1.bf16.msra.mxu1 %v8402_v39  ;;  %v2142_v39 = vld [vmem:[%s9639_s5 + $0x408] sm:$0xff]  ;;  %9802 = vst [vmem:[#allocation57_spill] sm:$0xff] %v8612_v52 }
 0x2ab   : > { %5771 = vmatpush1.bf16.msra.mxu0 %v8570_v17  ;;  %5549 = vmatprep.subr.bf16.mxu1 %v8405_v40  ;;  %v8615_v28 = vpack.c.bf16 %v2144_v37, %v2142_v39  ;;  %v2141_v40 = vld [vmem:[%s9639_s5 + $0x400] sm:$0xff]  ;;  %v8635_v37 = vpack.c.bf16 %v2148_v20, %v2146_v27 }
 0x2ac   : > { %5773 = vmatprep.subr.bf16.mxu0 %v8573_v61  ;;  %v2149_v20 = vld [vmem:[%s9639_s5 + $0x440] sm:$0xff] }
 0x2ad   : > { %9803 = vst [vmem:[#allocation58_spill] sm:$0xff] %v8615_v28  ;;  %9805 = vst [vmem:[#allocation60_spill] sm:$0xff] %v8635_v37 }
 0x2ae   : > { %5551 = vmatpush1.bf16.msra.mxu1 %v8426_v10  ;;  %v2143_v10 = vld [vmem:[%s9639_s5 + $0x410] sm:$0xff] }
 0x2af   : > { %5775 = vmatpush1.bf16.msra.mxu0 %v8590_v18  ;;  %5553 = vmatprep.subr.bf16.mxu1 %v8429_v57  ;;  %v8632_v39 = vpack.c.bf16 %v2143_v10, %v2141_v40  ;;  %v2145_v57 = vld [vmem:[%s9639_s5 + $0x420] sm:$0xff]  ;;  %v2152_v40 = vld [vmem:[%s9639_s5 + $0x458] sm:$0xff] }
 0x2b0   : > { %5777 = vmatprep.subr.bf16.mxu0 %v8593_v21  ;;  %v8652_v10 = vpack.c.bf16 %v2147_v25, %v2145_v57  ;;  %v2156_v57 = vld [vmem:[%s9639_s5 + $0x478] sm:$0xff] }
 0x2b1   : > { %9804 = vst [vmem:[#allocation59_spill] sm:$0xff] %v8632_v39 }
 0x2b2   : > { %5555 = vmatpush1.bf16.msra.mxu1 %v8446_v30  ;;  %v2150_v30 = vld [vmem:[%s9639_s5 + $0x448] sm:$0xff]  ;;  %9806 = vst [vmem:[#allocation61_spill] sm:$0xff] %v8652_v10 }
 0x2b3   : > { %5779 = vmatpush1.bf16.msra.mxu0 %v8612_v52  ;;  %5557 = vmatprep.subr.bf16.mxu1 %v8451_v48  ;;  %v8655_v27 = vpack.c.bf16 %v2152_v40, %v2150_v30  ;;  %v2151_v48 = vld [vmem:[%s9639_s5 + $0x450] sm:$0xff]  ;;  %v2153_v40 = vld [vmem:[%s9639_s5 + $0x460] sm:$0xff] }
 0x2b4   : > { %5781 = vmatprep.subr.bf16.mxu0 %v8615_v28  ;;  %v8672_v30 = vpack.c.bf16 %v2151_v48, %v2149_v20  ;;  %v2160_v48 = vld [vmem:[%s9639_s5 + $0x498] sm:$0xff] }
 0x2b5   : > { %9807 = vst [vmem:[#allocation62_spill] sm:$0xff] %v8655_v27 }
 0x2b6   : > { %5559 = vmatpush1.bf16.msra.mxu1 %v8468_v41  ;;  %2732 = vmatmul.mubr.f32.vlgmr.msra.gmra.mrb[8].mxu0 %v1434_v14  ;;  %v2154_v14 = vld [vmem:[%s9639_s5 + $0x468] sm:$0xff]  ;;  %9808 = vst [vmem:[#allocation63_spill] sm:$0xff] %v8672_v30 }
 0x2b7   : > { %5783 = vmatpush1.bf16.msra.mxu0 %v8632_v39  ;;  %5561 = vmatprep.subr.bf16.mxu1 %v8471_v8  ;;  %v8675_v25 = vpack.c.bf16 %v2156_v57, %v2154_v14  ;;  %v2155_v8 = vld [vmem:[%s9639_s5 + $0x470] sm:$0xff]  ;;  %v2157_v57 = vld [vmem:[%s9639_s5 + $0x480] sm:$0xff] }
 0x2b8   : > { %5785 = vmatprep.subr.bf16.mxu0 %v8635_v37  ;;  %v8692_v20 = vpack.c.bf16 %v2155_v8, %v2153_v40  ;;  %v2164_v8 = vld [vmem:[%s9639_s5 + $0x4b8] sm:$0xff] }
 0x2b9   : > { %9809 = vst [vmem:[#allocation64_spill] sm:$0xff] %v8675_v25 }
 0x2ba   : > { %5563 = vmatpush1.bf16.msra.mxu1 %v8490_v26  ;;  %v2158_v26 = vld [vmem:[%s9639_s5 + $0x488] sm:$0xff]  ;;  %9810 = vst [vmem:[#allocation65_spill] sm:$0xff] %v8692_v20 }
 0x2bb   : > { %5787 = vmatpush1.bf16.msra.mxu0 %v8652_v10  ;;  %5565 = vmatprep.subr.bf16.mxu1 %v8493_v13  ;;  %v8695_v14 = vpack.c.bf16 %v2160_v48, %v2158_v26  ;;  %v2159_v13 = vld [vmem:[%s9639_s5 + $0x490] sm:$0xff]  ;;  %v2161_v48 = vld [vmem:[%s9639_s5 + $0x4a0] sm:$0xff] }
 0x2bc   : > { %5789 = vmatprep.subr.bf16.mxu0 %v8655_v27  ;;  %v8712_v26 = vpack.c.bf16 %v2159_v13, %v2157_v57  ;;  %v2168_v13 = vld [vmem:[%s9639_s5 + $0x4d8] sm:$0xff] }
 0x2bd   : > { %9811 = vst [vmem:[#allocation66_spill] sm:$0xff] %v8695_v14 }
 0x2be   : > { %5567 = vmatpush1.bf16.msra.mxu1 %v8510_v5  ;;  %v2162_v5 = vld [vmem:[%s9639_s5 + $0x4a8] sm:$0xff]  ;;  %9812 = vst [vmem:[#allocation67_spill] sm:$0xff] %v8712_v26 }
 0x2bf   : > { %5791 = vmatpush1.bf16.msra.mxu0 %v8672_v30  ;;  %5569 = vmatprep.subr.bf16.mxu1 %v8513_v49  ;;  %v8715_v40 = vpack.c.bf16 %v2164_v8, %v2162_v5  ;;  %v2163_v49 = vld [vmem:[%s9639_s5 + $0x4b0] sm:$0xff] }
 0x2c0   : > { %5793 = vmatprep.subr.bf16.mxu0 %v8675_v25  ;;  %v8732_v5 = vpack.c.bf16 %v2163_v49, %v2161_v48  ;;  %v2170_v49 = vld [vmem:[%s9639_s5 + $0x4e8] sm:$0xff]  ;;  %v2172_v48 = vld [vmem:[%s9639_s5 + $0x4f8] sm:$0xff] }
 0x2c1   : > { %9813 = vst [vmem:[#allocation68_spill] sm:$0xff] %v8715_v40  ;;  %v8761_v19 = vpack.c.bf16 %v2172_v48, %v2170_v49 }
 0x2c2   : > { %5571 = vmatpush1.bf16.msra.mxu1 %v8530_v22  ;;  %v2166_v22 = vld [vmem:[%s9639_s5 + $0x4c8] sm:$0xff]  ;;  %9814 = vst [vmem:[#allocation69_spill] sm:$0xff] %v8732_v5 }
 0x2c3   : > { %5795 = vmatpush1.bf16.msra.mxu0 %v8692_v20  ;;  %5573 = vmatprep.subr.bf16.mxu1 %v8533_v2  ;;  %v8737_v8 = vpack.c.bf16 %v2168_v13, %v2166_v22  ;;  %v2165_v2 = vld [vmem:[%s9639_s5 + $0x4c0] sm:$0xff]  ;;  %9817 = vst [vmem:[#allocation72_spill] sm:$0xff] %v8761_v19 }
 0x2c4   : > { %5797 = vmatprep.subr.bf16.mxu0 %v8695_v14 }
 0x2c5   : > { %9815 = vst [vmem:[#allocation70_spill] sm:$0xff] %v8737_v8 }
 0x2c6   : > { %5575 = vmatpush1.bf16.msra.mxu1 %v8550_v45  ;;  %v2167_v45 = vld [vmem:[%s9639_s5 + $0x4d0] sm:$0xff] }
 0x2c7   : > { %5799 = vmatpush1.bf16.msra.mxu0 %v8712_v26  ;;  %5577 = vmatprep.subr.bf16.mxu1 %v8553_v62  ;;  %v8757_v13 = vpack.c.bf16 %v2167_v45, %v2165_v2  ;;  %v2176_v2 = vld [vmem:[%s9639_s5 + $0x518] sm:$0xff]  ;;  %v6486_v45 = vadd.f32 %v7776_v58, %v7680_v59  ;;  %v2178_v58 = vld [vmem:[%s9639_s5 + $0x528] sm:$0xff] }
 0x2c8   : > { %v8734_v57 = vpop.f32.mrb[6].mxu1  ;;  %5801 = vmatprep.subr.bf16.mxu0 %v8715_v40 }
 0x2c9   : > { %v1580_v41 = vpop.f32.mrb[7].mxu1  ;;  %9816 = vst [vmem:[#allocation71_spill] sm:$0xff] %v8757_v13 }
 0x2ca   : > { %v8752_v22 = vadd.f32 %v1580_v41, %v7445_v46  ;;  %5579 = vmatpush1.bf16.msra.mxu1 %v8570_v17  ;;  %v2171_v41 = vld [vmem:[%s9639_s5 + $0x4f0] sm:$0xff] }
 0x2cb   : > { %5803 = vmatpush1.bf16.msra.mxu0 %v8732_v5  ;;  %5581 = vmatprep.subr.bf16.mxu1 %v8573_v61  ;;  %v2174_v61 = vld [vmem:[%s9639_s5 + $0x508] sm:$0xff]  ;;  %v8782_v49 = vpack.c.bf16 %v2171_v41, %v2169_v0  ;;  %v2180_v0 = vld [vmem:[%s9639_s5 + $0x538] sm:$0xff]  ;;  %v2179_v17 = vld [vmem:[%s9639_s5 + $0x530] sm:$0xff] }
 0x2cc   : > { %v9704_v62 = vmax.f32 %v8752_v22, 0.0  ;;  %5805 = vmatprep.subr.bf16.mxu0 %v8737_v8  ;;  %v8785_v48 = vpack.c.bf16 %v2176_v2, %v2174_v61  ;;  %v1136_v61 = vmax.f32 %v6486_v45, 0.0  ;;  %v8805_v2 = vpack.c.bf16 %v2180_v0, %v2178_v58  ;;  %v2182_v45 = vld [vmem:[%s9639_s5 + $0x548] sm:$0xff] }
 0x2cd   : > { %9818 = vst [vmem:[#allocation73_spill] sm:$0xff] %v8782_v49 }
 0x2ce   : > { %5583 = vmatpush1.bf16.msra.mxu1 %v8590_v18  ;;  %2802 = vmatprep.mubr.f32.mxu0 %v9704_v62  ;;  %9819 = vst [vmem:[#allocation74_spill] sm:$0xff] %v8785_v48  ;;  %v2173_v18 = vld [vmem:[%s9639_s5 + $0x500] sm:$0xff]  ;;  %v2175_v62 = vld [vmem:[%s9639_s5 + $0x510] sm:$0xff] }
 0x2cf   : > { %5807 = vmatpush1.bf16.msra.mxu0 %v8757_v13  ;;  %5585 = vmatprep.subr.bf16.mxu1 %v8593_v21  ;;  %v8802_v41 = vpack.c.bf16 %v2175_v62, %v2173_v18  ;;  %v2177_v21 = vld [vmem:[%s9639_s5 + $0x520] sm:$0xff]  ;;  %v2184_v62 = vld [vmem:[%s9639_s5 + $0x558] sm:$0xff]  ;;  %v9821_v18 = vmax.f32 %v8246_v54, 0.0  ;;  %v2186_v54 = vld [vmem:[%s9639_s5 + $0x568] sm:$0xff] }
 0x2d0   : > { %5809 = vmatprep.subr.bf16.mxu0 %v8761_v19  ;;  %v8824_v58 = vpack.c.bf16 %v2179_v17, %v2177_v21  ;;  %v8827_v0 = vpack.c.bf16 %v2184_v62, %v2182_v45  ;;  %v2188_v17 = vld [vmem:[%s9639_s5 + $0x578] sm:$0xff]  ;;  %v2185_v62 = vld [vmem:[%s9639_s5 + $0x560] sm:$0xff] }
 0x2d1   : > { %9820 = vst [vmem:[#allocation75_spill] sm:$0xff] %v8802_v41  ;;  %v8847_v45 = vpack.c.bf16 %v2188_v17, %v2186_v54  ;;  %v2189_v17 = vld [vmem:[%s9639_s5 + $0x580] sm:$0xff] }
 0x2d2   : > { %5587 = vmatpush1.bf16.msra.mxu1 %v8612_v52  ;;  %v3055_v52 = vld [vmem:[#allocation9 + $0x98] sm:$0xff] }
 0x2d3   : > { %5811 = vmatpush1.bf16.msra.mxu0 %v8782_v49  ;;  %5589 = vmatprep.subr.bf16.mxu1 %v8615_v28  ;;  %v3054_v28 = vld [vmem:[#allocation9 + $0x90] sm:$0xff] }
 0x2d4   : > { %5813 = vmatprep.subr.bf16.mxu0 %v8785_v48 }
 0x2d5   : > { %2509 = vmatmul.mubr.f32.vlgmr.msra.gmra.mrb[10].mxu1 %v1136_v61  ;;  %v2181_v61 = vld [vmem:[%s9639_s5 + $0x540] sm:$0xff] }
 0x2d6   : > { %5591 = vmatpush1.bf16.msra.mxu1 %v8632_v39  ;;  %2579 = vmatprep.mubr.f32.mxu1 %v9821_v18  ;;  %v2183_v39 = vld [vmem:[%s9639_s5 + $0x550] sm:$0xff] }
 0x2d7   : > { %5815 = vmatpush1.bf16.msra.mxu0 %v8802_v41  ;;  %5593 = vmatprep.subr.bf16.mxu1 %v8635_v37  ;;  %v8844_v21 = vpack.c.bf16 %v2183_v39, %v2181_v61  ;;  %v2187_v18 = vld [vmem:[%s9639_s5 + $0x570] sm:$0xff]  ;;  %v2192_v39 = vld [vmem:[%s9639_s5 + $0x598] sm:$0xff]  ;;  %v3052_v37 = vld [vmem:[#allocation9 + $0x80] sm:$0xff] }
 0x2d8   : > { %5817 = vmatprep.subr.bf16.mxu0 %v8805_v2  ;;  %v8864_v61 = vpack.c.bf16 %v2187_v18, %v2185_v62  ;;  %v2196_v62 = vld [vmem:[%s9639_s5 + $0x5b8] sm:$0xff] }
 0x2da   : > { %5595 = vmatpush1.bf16.msra.mxu1 %v8652_v10  ;;  %v2190_v10 = vld [vmem:[%s9639_s5 + $0x588] sm:$0xff] }
 0x2db   : > { %5819 = vmatpush1.bf16.msra.mxu0 %v8824_v58  ;;  %5597 = vmatprep.subr.bf16.mxu1 %v8655_v27  ;;  %v8867_v54 = vpack.c.bf16 %v2192_v39, %v2190_v10  ;;  %v2191_v27 = vld [vmem:[%s9639_s5 + $0x590] sm:$0xff]  ;;  %v2193_v39 = vld [vmem:[%s9639_s5 + $0x5a0] sm:$0xff] }
 0x2dc   : > { %5821 = vmatprep.subr.bf16.mxu0 %v8827_v0  ;;  %v8884_v10 = vpack.c.bf16 %v2191_v27, %v2189_v17  ;;  %v2200_v27 = vld [vmem:[%s9639_s5 + $0x5d8] sm:$0xff] }
 0x2dd   : > { %9822 = vst [vmem:[#allocation76_spill] sm:$0xff] %v8867_v54 }
 0x2de   : > { %5599 = vmatpush1.bf16.msra.mxu1 %v8672_v30  ;;  %v2194_v30 = vld [vmem:[%s9639_s5 + $0x5a8] sm:$0xff] }
 0x2df   : > { %5823 = vmatpush1.bf16.msra.mxu0 %v8844_v21  ;;  %5601 = vmatprep.subr.bf16.mxu1 %v8675_v25  ;;  %v8887_v18 = vpack.c.bf16 %v2196_v62, %v2194_v30  ;;  %v2195_v25 = vld [vmem:[%s9639_s5 + $0x5b0] sm:$0xff]  ;;  %v2197_v62 = vld [vmem:[%s9639_s5 + $0x5c0] sm:$0xff] }
 0x2e0   : > { %5825 = vmatprep.subr.bf16.mxu0 %v8847_v45  ;;  %v8904_v30 = vpack.c.bf16 %v2195_v25, %v2193_v39  ;;  %v2204_v25 = vld [vmem:[%s9639_s5 + $0x5f8] sm:$0xff] }
 0x2e2   : > { %5603 = vmatpush1.bf16.msra.mxu1 %v8692_v20  ;;  %v2198_v20 = vld [vmem:[%s9639_s5 + $0x5c8] sm:$0xff]  ;;  %9823 = vst [vmem:[#allocation77_spill] sm:$0xff] %v8904_v30 }
 0x2e3   : > { %5827 = vmatpush1.bf16.msra.mxu0 %v8864_v61  ;;  %5605 = vmatprep.subr.bf16.mxu1 %v8695_v14  ;;  %v8907_v17 = vpack.c.bf16 %v2200_v27, %v2198_v20  ;;  %v2199_v14 = vld [vmem:[%s9639_s5 + $0x5d0] sm:$0xff]  ;;  %v2201_v27 = vld [vmem:[%s9639_s5 + $0x5e0] sm:$0xff] }
 0x2e4   : > { %5829 = vmatprep.subr.bf16.mxu0 %v8867_v54  ;;  %v8924_v20 = vpack.c.bf16 %v2199_v14, %v2197_v62 }
 0x2e6   : > { %5607 = vmatpush1.bf16.msra.mxu1 %v8712_v26  ;;  %v2202_v26 = vld [vmem:[%s9639_s5 + $0x5e8] sm:$0xff] }
 0x2e7   : > { %5831 = vmatpush1.bf16.msra.mxu0 %v8884_v10  ;;  %5609 = vmatprep.subr.bf16.mxu1 %v8715_v40  ;;  %v8927_v39 = vpack.c.bf16 %v2204_v25, %v2202_v26  ;;  %v2203_v40 = vld [vmem:[%s9639_s5 + $0x5f0] sm:$0xff]  ;;  %v8942_v26 = vadd.f32 %v8734_v57, %v7680_v59  ;;  %v3036_v25 = vld [vmem:[#allocation9] sm:$0xff] }
 0x2e8   : > { %5833 = vmatprep.subr.bf16.mxu0 %v8887_v18  ;;  %v8938_v14 = vpack.c.bf16 %v2203_v40, %v2201_v27  ;;  %v6040_v27 = vpack.c.bf16 %v3055_v52, %v3054_v28  ;;  %v3038_v57 = vld [vmem:[#allocation9 + $0x10] sm:$0xff]  ;;  %v3056_v59 = vld [vmem:[#allocation9 + $0xa0] sm:$0xff] }
 0x2e9   : > { %v9727_v40 = vmax.f32 %v8942_v26, 0.0 }
 0x2ea   : > { %5611 = vmatpush1.bf16.msra.mxu1 %v8732_v5  ;;  %v3053_v5 = vld [vmem:[#allocation9 + $0x88] sm:$0xff] }
 0x2eb   : > { %5835 = vmatpush1.bf16.msra.mxu0 %v8904_v30  ;;  %5613 = vmatprep.subr.bf16.mxu1 %v8737_v8  ;;  %v6036_v62 = vpack.c.bf16 %v3053_v5, %v3052_v37  ;;  %v3037_v8 = vld [vmem:[#allocation9 + $0x8] sm:$0xff]  ;;  %v6044_v5 = vpack.c.bf16 %v3057_v12, %v3056_v59 }
 0x2ec   : > { %5837 = vmatprep.subr.bf16.mxu0 %v8907_v17 }
 0x2ee   : > { %5615 = vmatpush1.bf16.msra.mxu1 %v8757_v13  ;;  %v3039_v13 = vld [vmem:[#allocation9 + $0x18] sm:$0xff] }
 0x2ef   : > { %5839 = vmatpush1.bf16.msra.mxu0 %v8924_v20  ;;  %5617 = vmatprep.subr.bf16.mxu1 %v8761_v19  ;;  %v6038_v19 = vpack.c.bf16 %v3037_v8, %v3036_v25  ;;  %v6042_v37 = vpack.c.bf16 %v3039_v13, %v3038_v57  ;;  %v3040_v8 = vld [vmem:[#allocation9 + $0x20] sm:$0xff]  ;;  %v3041_v25 = vld [vmem:[#allocation9 + $0x28] sm:$0xff]  ;;  %v3062_v57 = vld [vmem:[#allocation9 + $0xd0] sm:$0xff] }
 0x2f0   : > { %5841 = vmatprep.subr.bf16.mxu0 %v8927_v39  ;;  %v6046_v52 = vpack.c.bf16 %v3041_v25, %v3040_v8  ;;  %v3044_v13 = vld [vmem:[#allocation9 + $0x40] sm:$0xff]  ;;  %v3046_v25 = vld [vmem:[#allocation9 + $0x50] sm:$0xff] }
 0x2f2   : > { %5619 = vmatpush1.bf16.msra.mxu1 %v8782_v49  ;;  %v3061_v49 = vld [vmem:[#allocation9 + $0xc8] sm:$0xff] }
 0x2f3   : > { %5843 = vmatpush1.bf16.msra.mxu0 %v8938_v14  ;;  %5621 = vmatprep.subr.bf16.mxu1 %v8785_v48  ;;  %v3058_v48 = vld [vmem:[#allocation9 + $0xb0] sm:$0xff] }
 0x2f4   : > { %6037 = vmatprep.subr.bf16.mxu0 %v6036_v62  ;;  %v3059_v62 = vld [vmem:[#allocation9 + $0xb8] sm:$0xff] }
 0x2f5   : > { %v6048_v28 = vpack.c.bf16 %v3059_v62, %v3058_v48  ;;  %v9824_v62 = vld [vmem:[#allocation22_spill] sm:$0xff] }
 0x2f6   : > { %2803 = vmatmul.mubr.f32.vlgmr.msra.gmra.mrb[8].mxu0 %v9727_v40  ;;  %5623 = vmatpush1.bf16.msra.mxu1 %v8802_v41  ;;  %v3042_v40 = vld [vmem:[#allocation9 + $0x30] sm:$0xff]  ;;  %v3043_v41 = vld [vmem:[#allocation9 + $0x38] sm:$0xff] }
 0x2f7   : > { %6039 = vmatpush3.bf16.msra.mxu0 %v6038_v19  ;;  %5625 = vmatprep.subr.bf16.mxu1 %v8805_v2  ;;  %v3060_v19 = vld [vmem:[#allocation9 + $0xc0] sm:$0xff]  ;;  %v6050_v59 = vpack.c.bf16 %v3043_v41, %v3042_v40  ;;  %v3047_v41 = vld [vmem:[#allocation9 + $0x58] sm:$0xff] }
 0x2f8   : > { %6041 = vmatprep.subr.bf16.mxu0 %v6040_v27  ;;  %v6052_v12 = vpack.c.bf16 %v3061_v49, %v3060_v19  ;;  %v3045_v27 = vld [vmem:[#allocation9 + $0x48] sm:$0xff]  ;;  %v3064_v40 = vld [vmem:[#allocation9 + $0xe0] sm:$0xff] }
 0x2f9   : > { %v6054_v48 = vpack.c.bf16 %v3045_v27, %v3044_v13  ;;  %v3065_v49 = vld [vmem:[#allocation9 + $0xe8] sm:$0xff]  ;;  %v3066_v27 = vld [vmem:[#allocation9 + $0xf0] sm:$0xff] }
 0x2fa   : > { %5627 = vmatpush1.bf16.msra.mxu1 %v8824_v58  ;;  %v6060_v19 = vpack.c.bf16 %v3065_v49, %v3064_v40 }
 0x2fb   : > { %6043 = vmatpush3.bf16.msra.mxu0 %v6042_v37  ;;  %5629 = vmatprep.subr.bf16.mxu1 %v8827_v0  ;;  %v3063_v37 = vld [vmem:[#allocation9 + $0xd8] sm:$0xff] }
 0x2fc   : > { %6045 = vmatprep.subr.bf16.mxu0 %v6044_v5  ;;  %v2205_v5 = vld [vmem:[%s9640_s6] sm:$0x3]  ;;  %v6056_v8 = vpack.c.bf16 %v3063_v37, %v3062_v57  ;;  %v3067_v57 = vld [vmem:[#allocation9 + $0xf8] sm:$0xff] }
 0x2fe   : > { %5631 = vmatpush1.bf16.msra.mxu1 %v8844_v21 }
 0x2ff   : > { %6047 = vmatpush3.bf16.msra.mxu0 %v6046_v52  ;;  %5633 = vmatprep.subr.bf16.mxu1 %v8847_v45  ;;  %v8964_v52 = vrot.slane %v2205_v5, %v9824_v62  ;;  %v8971_v62 = vrot.slane %v2205_v5, %v7662_v47 }
 0x300   : > { %6049 = vmatprep.subr.bf16.mxu0 %v6048_v28  ;;  %v6058_v28 = vpack.c.bf16 %v3047_v41, %v3046_v25  ;;  %v3050_v25 = vld [vmem:[#allocation9 + $0x70] sm:$0xff]  ;;  %v3051_v41 = vld [vmem:[#allocation9 + $0x78] sm:$0xff] }
 0x301   : > { %v6066_v49 = vpack.c.bf16 %v3051_v41, %v3050_v25  ;;  %v3077_v25 = vld [vmem:[#allocation9 + $0x148] sm:$0xff]  ;;  %v9836_v41 = vld [vmem:[#allocation27_spill] sm:$0xff] }
 0x302   : > { %5635 = vmatpush1.bf16.msra.mxu1 %v8864_v61 }
 0x303   : > { %6051 = vmatpush3.bf16.msra.mxu0 %v6050_v59  ;;  %5637 = vmatprep.subr.bf16.mxu1 %v8867_v54  ;;  %v3048_v59 = vld [vmem:[#allocation9 + $0x60] sm:$0xff] }
 0x304   : > { %6053 = vmatprep.subr.bf16.mxu0 %v6052_v12  ;;  %v3049_v12 = vld [vmem:[#allocation9 + $0x68] sm:$0xff] }
 0x306   : > { %5639 = vmatpush1.bf16.msra.mxu1 %v8884_v10 }
 0x307   : > { %6055 = vmatpush3.bf16.msra.mxu0 %v6054_v48  ;;  %5641 = vmatprep.subr.bf16.mxu1 %v8887_v18  ;;  %v6062_v48 = vpack.c.bf16 %v3049_v12, %v3048_v59  ;;  %v3074_v59 = vld [vmem:[#allocation9 + $0x130] sm:$0xff]  ;;  %v3075_v12 = vld [vmem:[#allocation9 + $0x138] sm:$0xff] }
 0x308   : > { %6057 = vmatprep.subr.bf16.mxu0 %v6056_v8  ;;  %v6064_v8 = vpack.c.bf16 %v3067_v57, %v3066_v27  ;;  %v3092_v57 = vld [vmem:[#allocation9 + $0x1c0] sm:$0xff] }
 0x309   : > { %v2358_v13 = vpop.f32.mrb[6].mxu0 }
 0x30a   : > { %v2360_v37 = vpop.f32.mrb[7].mxu0  ;;  %5643 = vmatpush1.bf16.msra.mxu1 %v8904_v30  ;;  %v6498_v30 = vadd.f32 %v2358_v13, %v8971_v62  ;;  %v9835_v13 = vld [vmem:[#allocation26_spill] sm:$0xff] }
 0x30b   : > { %v6499_v54 = vadd.f32 %v2360_v37, %v8964_v52  ;;  %6059 = vmatpush3.bf16.msra.mxu0 %v6058_v28  ;;  %5645 = vmatprep.subr.bf16.mxu1 %v8907_v17  ;;  %v9825_v28 = vmax.f32 %v8277_v9, 0.0  ;;  %v3090_v9 = vld [vmem:[#allocation9 + $0x1b0] sm:$0xff]  ;;  %v3093_v37 = vld [vmem:[#allocation9 + $0x1c8] sm:$0xff] }
 0x30c   : > { %6061 = vmatprep.subr.bf16.mxu0 %v6060_v19  ;;  %v2363_v5 = vmax.f32 %v6498_v30, 0.0  ;;  %v3091_v19 = vld [vmem:[#allocation9 + $0x1b8] sm:$0xff] }
 0x30d   : > { %v2364_v40 = vmax.f32 %v6499_v54, 0.0  ;;  %v9826_v54 = vmax.f32 %v8752_v22, 0.0  ;;  %v9834_v22 = vld [vmem:[#allocation25_spill] sm:$0xff]  ;;  %v6080_v27 = vpack.c.bf16 %v3091_v19, %v3090_v9  ;;  %v9846_v9 = vld [vmem:[#allocation39_spill] sm:$0xff]  ;;  %v9849_v19 = vld [vmem:[#allocation42_spill] sm:$0xff] }
 0x30e   : > { %5647 = vmatpush1.bf16.msra.mxu1 %v8924_v20 }
 0x30f   : > { %6063 = vmatpush3.bf16.msra.mxu0 %v6062_v48  ;;  %3271 = vmatprep.mubr.f32.mxu0 %v2364_v40  ;;  %v6084_v48 = vpack.c.bf16 %v3093_v37, %v3092_v57  ;;  %v3094_v40 = vld [vmem:[#allocation9 + $0x1d0] sm:$0xff]  ;;  %v9855_v37 = vld [vmem:[#allocation48_spill] sm:$0xff] }
 0x310   : > { %5649 = vmatprep.subr.bf16.mxu1 %v8927_v39  ;;  %6065 = vmatprep.subr.bf16.mxu0 %v6064_v8  ;;  %v3076_v8 = vld [vmem:[#allocation9 + $0x140] sm:$0xff]  ;;  %v9854_v57 = vld [vmem:[#allocation47_spill] sm:$0xff] }
 0x312   : > { %5651 = vmatpush1.bf16.msra.mxu1 %v8938_v14 }
 0x313   : > { %6067 = vmatpush3.bf16.msra.mxu0 %v6066_v49  ;;  %5845 = vmatprep.subr.bf16.mxu1 %v7942_v55  ;;  %v3095_v49 = vld [vmem:[#allocation9 + $0x1d8] sm:$0xff] }
 0x315   : > { %2580 = vmatmul.mubr.f32.vlgmr.msra.gmra.mrb[10].mxu1 %v9825_v28  ;;  %v6086_v28 = vpack.c.bf16 %v3077_v25, %v3076_v8  ;;  %v9858_v8 = vld [vmem:[#allocation51_spill] sm:$0xff]  ;;  %v9859_v25 = vld [vmem:[#allocation52_spill] sm:$0xff] }
 0x316   : > { %3272 = vmatmul.mubr.f32.vlgmr.msra.gmra.mrb[10].mxu0 %v2363_v5  ;;  %5847 = vmatpush1.bf16.msra.mxu1 %v7960_v33  ;;  %v9837_v5 = vld [vmem:[#allocation28_spill] sm:$0xff] }
 0x317   : > { %2883 = vmatprep.mubr.f32.mxu1 %v9826_v54  ;;  %5849 = vmatprep.subr.bf16.mxu1 %v7964_v38  ;;  %v9827_v38 = vld [vmem:[#allocation17_spill] sm:$0xff]  ;;  %v6088_v54 = vpack.c.bf16 %v3095_v49, %v3094_v40  ;;  %v9861_v40 = vld [vmem:[#allocation54_spill] sm:$0xff]  ;;  %v9862_v49 = vld [vmem:[#allocation55_spill] sm:$0xff] }
 0x31a   : > { %5851 = vmatpush1.bf16.msra.mxu1 %v7984_v43  ;;  %v3084_v43 = vld [vmem:[#allocation9 + $0x180] sm:$0xff] }
 0x31b   : > { %5853 = vmatprep.subr.bf16.mxu1 %v7987_v53  ;;  %v3085_v53 = vld [vmem:[#allocation9 + $0x188] sm:$0xff] }
 0x31e   : > { %5855 = vmatpush1.bf16.msra.mxu1 %v8005_v11  ;;  %v6068_v11 = vpack.c.bf16 %v3085_v53, %v3084_v43  ;;  %v3079_v43 = vld [vmem:[#allocation9 + $0x158] sm:$0xff]  ;;  %v9838_v53 = vld [vmem:[#allocation29_spill] sm:$0xff] }
 0x31f   : > { %5857 = vmatprep.subr.bf16.mxu1 %v8008_v24  ;;  %v3068_v24 = vld [vmem:[#allocation9 + $0x100] sm:$0xff] }
 0x320   : > { %6069 = vmatprep.subr.bf16.mxu0 %v6068_v11  ;;  %v3096_v11 = vld [vmem:[#allocation9 + $0x1e0] sm:$0xff] }
 0x322   : > { %5859 = vmatpush1.bf16.msra.mxu1 %v8025_v51  ;;  %v3069_v51 = vld [vmem:[#allocation9 + $0x108] sm:$0xff] }
 0x323   : > { %5861 = vmatprep.subr.bf16.mxu1 %v8028_v56  ;;  %v9828_v56 = vld [vmem:[#allocation18_spill] sm:$0xff] }
 0x326   : > { %5863 = vmatpush1.bf16.msra.mxu1 %v8045_v44  ;;  %v6070_v44 = vpack.c.bf16 %v3069_v51, %v3068_v24  ;;  %v3097_v24 = vld [vmem:[#allocation9 + $0x1e8] sm:$0xff] }
 0x327   : > { %5865 = vmatprep.subr.bf16.mxu1 %v8048_v50  ;;  %v9829_v50 = vld [vmem:[#allocation19_spill] sm:$0xff]  ;;  %v9839_v51 = vld [vmem:[#allocation30_spill] sm:$0xff] }
 0x328   : > { %v8992_v55 = vpop.f32.mrb[8].mxu1  ;;  %6071 = vmatpush3.bf16.msra.mxu0 %v6070_v44  ;;  %v6092_v44 = vpack.c.bf16 %v3097_v24, %v3096_v11  ;;  %v9867_v24 = vld [vmem:[#allocation58_spill] sm:$0xff] }
 0x329   : > { %v8994_v33 = vpop.f32.mrb[9].mxu1 }
 0x32a   : > { %5867 = vmatpush1.bf16.msra.mxu1 %v8065_v36  ;;  %v9830_v36 = vld [vmem:[#allocation38_spill] sm:$0xff] }
 0x32b   : > { %5869 = vmatprep.subr.bf16.mxu1 %v8068_v63  ;;  %v6495_v63 = vadd.f32 %v9830_v36, %v7445_v46  ;;  %v3081_v36 = vld [vmem:[#allocation9 + $0x168] sm:$0xff] }
 0x32e   : > { %5871 = vmatpush1.bf16.msra.mxu1 %v8085_v4  ;;  %v3086_v4 = vld [vmem:[#allocation9 + $0x190] sm:$0xff] }
 0x32f   : > { %5873 = vmatprep.subr.bf16.mxu1 %v8088_v1  ;;  %v3087_v1 = vld [vmem:[#allocation9 + $0x198] sm:$0xff] }
 0x332   : > { %5875 = vmatpush1.bf16.msra.mxu1 %v8105_v16  ;;  %v6072_v16 = vpack.c.bf16 %v3087_v1, %v3086_v4  ;;  %v9841_v4 = vld [vmem:[#allocation32_spill] sm:$0xff] }
 0x333   : > { %5877 = vmatprep.subr.bf16.mxu1 %v8108_v23  ;;  %v3070_v23 = vld [vmem:[#allocation9 + $0x110] sm:$0xff] }
 0x334   : > { %6073 = vmatprep.subr.bf16.mxu0 %v6072_v16  ;;  %v9842_v16 = vld [vmem:[#allocation33_spill] sm:$0xff] }
 0x336   : > { %5879 = vmatpush1.bf16.msra.mxu1 %v8126_v31  ;;  %v3071_v31 = vld [vmem:[#allocation9 + $0x118] sm:$0xff] }
 0x337   : > { %5881 = vmatprep.subr.bf16.mxu1 %v8129_v6  ;;  %v9831_v6 = vld [vmem:[#allocation20_spill] sm:$0xff] }
 0x33a   : > { %5883 = vmatpush1.bf16.msra.mxu1 %v8148_v7  ;;  %v6074_v7 = vpack.c.bf16 %v3071_v31, %v3070_v23  ;;  %v9843_v23 = vld [vmem:[#allocation34_spill] sm:$0xff]  ;;  %v3098_v31 = vld [vmem:[#allocation9 + $0x1f0] sm:$0xff] }
 0x33b   : > { %5885 = vmatprep.subr.bf16.mxu1 %v8151_v42  ;;  %v9832_v42 = vld [vmem:[#allocation24_spill] sm:$0xff] }
 0x33c   : > { %6075 = vmatpush3.bf16.msra.mxu0 %v6074_v7 }
 0x33e   : > { %5887 = vmatpush1.bf16.msra.mxu1 %v8168_v29  ;;  %v1733_v29 = vmax.f32 %v6495_v63, 0.0  ;;  %v9840_v63 = vld [vmem:[#allocation31_spill] sm:$0xff] }
 0x33f   : > { %5889 = vmatprep.subr.bf16.mxu1 %v8171_v32  ;;  %v3088_v32 = vld [vmem:[#allocation9 + $0x1a0] sm:$0xff] }
 0x342   : > { %5891 = vmatpush1.bf16.msra.mxu1 %v8188_v34  ;;  %v3089_v34 = vld [vmem:[#allocation9 + $0x1a8] sm:$0xff] }
 0x343   : > { %5893 = vmatprep.subr.bf16.mxu1 %v8191_v35  ;;  %v9833_v35 = vmax.f32 %v8942_v26, 0.0  ;;  %v6082_v26 = vpack.c.bf16 %v3075_v12, %v3074_v59  ;;  %v9850_v59 = vld [vmem:[#allocation43_spill] sm:$0xff]  ;;  %v9851_v12 = vld [vmem:[#allocation44_spill] sm:$0xff] }
 0x346   : > { %5895 = vmatpush1.bf16.msra.mxu1 %v8208_v60  ;;  %v6076_v60 = vpack.c.bf16 %v3089_v34, %v3088_v32  ;;  %v9844_v32 = vld [vmem:[#allocation35_spill] sm:$0xff] }
 0x347   : > { %5897 = vmatprep.subr.bf16.mxu1 %v8211_v3  ;;  %v3072_v3 = vld [vmem:[#allocation9 + $0x120] sm:$0xff] }
 0x348   : > { %6077 = vmatprep.subr.bf16.mxu0 %v6076_v60  ;;  %v3116_v60 = vld [vmem:[#allocation10 + $0x80] sm:$0xff] }
 0x34a   : > { %5899 = vmatpush1.bf16.msra.mxu1 %v8228_v15  ;;  %v3073_v15 = vld [vmem:[#allocation9 + $0x128] sm:$0xff] }
 0x34b   : > { %5901 = vmatprep.subr.bf16.mxu1 %v9827_v38  ;;  %v6078_v30 = vpack.c.bf16 %v3073_v15, %v3072_v3  ;;  %v3078_v38 = vld [vmem:[#allocation9 + $0x150] sm:$0xff]  ;;  %v3117_v3 = vld [vmem:[#allocation10 + $0x88] sm:$0xff] }
 0x34c   : > { %v6100_v15 = vpack.c.bf16 %v3117_v3, %v3116_v60  ;;  %v3183_v3 = vld [vmem:[#allocation10 + $0x298] sm:$0xff] }
 0x34d   : > { %6079 = vmatpush3.bf16.msra.mxu0 %v6078_v30  ;;  %v9848_v30 = vld [vmem:[#allocation41_spill] sm:$0xff] }
 0x34e   : > { %5903 = vmatpush1.bf16.msra.mxu1 %v9828_v56  ;;  %6081 = vmatprep.subr.bf16.mxu0 %v6080_v27  ;;  %v6090_v56 = vpack.c.bf16 %v3079_v43, %v3078_v38  ;;  %v9853_v27 = vld [vmem:[#allocation46_spill] sm:$0xff]  ;;  %v9865_v38 = vld [vmem:[#allocation56_spill] sm:$0xff]  ;;  %v6497_v43 = vadd.f32 %v8994_v33, %v7445_v46  ;;  %v9874_v46 = vld [vmem:[#allocation65_spill] sm:$0xff] }
 0x34f   : > { %5905 = vmatprep.subr.bf16.mxu1 %v9829_v50  ;;  %v3080_v50 = vld [vmem:[#allocation9 + $0x160] sm:$0xff]  ;;  %v9875_v33 = vld [vmem:[#allocation66_spill] sm:$0xff] }
 0x350   : > { %v6094_v1 = vpack.c.bf16 %v3081_v36, %v3080_v50  ;;  %v9870_v50 = vld [vmem:[#allocation61_spill] sm:$0xff]  ;;  %v9871_v36 = vld [vmem:[#allocation62_spill] sm:$0xff] }
 0x351   : > { %6083 = vmatpush3.bf16.msra.mxu0 %v6082_v26  ;;  %v9856_v26 = vld [vmem:[#allocation49_spill] sm:$0xff] }
 0x352   : > { %5907 = vmatpush1.bf16.msra.mxu1 %v9831_v6  ;;  %6085 = vmatprep.subr.bf16.mxu0 %v6084_v48  ;;  %v3099_v6 = vld [vmem:[#allocation9 + $0x1f8] sm:$0xff]  ;;  %v9857_v48 = vld [vmem:[#allocation50_spill] sm:$0xff] }
 0x353   : > { %5909 = vmatprep.subr.bf16.mxu1 %v9832_v42  ;;  %v6096_v7 = vpack.c.bf16 %v3099_v6, %v3098_v31  ;;  %v3082_v42 = vld [vmem:[#allocation9 + $0x170] sm:$0xff]  ;;  %v9879_v31 = vld [vmem:[#allocation70_spill] sm:$0xff] }
 0x354   : > { %v9880_v6 = vld [vmem:[#allocation71_spill] sm:$0xff] }
 0x355   : > { %2884 = vmatmul.mubr.f32.vlgmr.msra.gmra.mrb[12].mxu1 %v9833_v35  ;;  %6087 = vmatpush3.bf16.msra.mxu0 %v6086_v28  ;;  %v9845_v35 = vld [vmem:[#allocation36_spill] sm:$0xff]  ;;  %v9864_v28 = vld [vmem:[#allocation37_spill] sm:$0xff] }
 0x356   : > { %5911 = vmatpush1.bf16.msra.mxu1 %v9834_v22  ;;  %2954 = vmatprep.mubr.f32.mxu1 %v1733_v29  ;;  %v3083_v29 = vld [vmem:[#allocation9 + $0x178] sm:$0xff] }
 0x357   : > { %5913 = vmatprep.subr.bf16.mxu1 %v9835_v13  ;;  %6089 = vmatprep.subr.bf16.mxu0 %v6088_v54  ;;  %v6098_v34 = vpack.c.bf16 %v3083_v29, %v3082_v42  ;;  %v9847_v22 = vld [vmem:[#allocation40_spill] sm:$0xff]  ;;  %v9852_v13 = vld [vmem:[#allocation45_spill] sm:$0xff]  ;;  %v9883_v29 = vld [vmem:[#allocation74_spill] sm:$0xff] }
 0x358   : > { %v9882_v42 = vld [vmem:[#allocation73_spill] sm:$0xff] }
 0x359   : > { %6091 = vmatpush3.bf16.msra.mxu0 %v6090_v56  ;;  %v9868_v56 = vld [vmem:[#allocation59_spill] sm:$0xff] }
 0x35a   : > { %5915 = vmatpush1.bf16.msra.mxu1 %v9836_v41  ;;  %6093 = vmatprep.subr.bf16.mxu0 %v6092_v44  ;;  %v9860_v41 = vld [vmem:[#allocation53_spill] sm:$0xff]  ;;  %v9869_v44 = vld [vmem:[#allocation60_spill] sm:$0xff] }
 0x35b   : > { %5917 = vmatprep.subr.bf16.mxu1 %v9837_v5  ;;  %v9863_v5 = vld [vmem:[#allocation23_spill] sm:$0xff] }
 0x35c   : > { %v6494_v54 = vadd.f32 %v9864_v28, %v9863_v5  ;;  %v3191_v28 = vld [vmem:[#allocation10 + $0x2d8] sm:$0xff] }
 0x35d   : > { %6095 = vmatpush3.bf16.msra.mxu0 %v6094_v1  ;;  %v9876_v1 = vld [vmem:[#allocation67_spill] sm:$0xff] }
 0x35e   : > { %5919 = vmatpush1.bf16.msra.mxu1 %v9838_v53  ;;  %6097 = vmatprep.subr.bf16.mxu0 %v6096_v7  ;;  %v9866_v53 = vld [vmem:[#allocation57_spill] sm:$0xff]  ;;  %v1732_v11 = vmax.f32 %v6494_v54, 0.0  ;;  %v9881_v7 = vld [vmem:[#allocation72_spill] sm:$0xff] }
 0x35f   : > { %5921 = vmatprep.subr.bf16.mxu1 %v9839_v51  ;;  %v1882_v51 = vmax.f32 %v6497_v43, 0.0  ;;  %v3174_v43 = vld [vmem:[#allocation10 + $0x250] sm:$0xff] }
 0x361   : > { %6099 = vmatpush3.bf16.msra.mxu0 %v6098_v34  ;;  %v9885_v34 = vld [vmem:[#allocation76_spill] sm:$0xff] }
 0x362   : > { %5923 = vmatpush1.bf16.msra.mxu1 %v9840_v63  ;;  %6101 = vmatprep.subr.bf16.mxu0 %v6100_v15  ;;  %v9872_v63 = vld [vmem:[#allocation63_spill] sm:$0xff] }
 0x363   : > { %5925 = vmatprep.subr.bf16.mxu1 %v9841_v4  ;;  %v9873_v4 = vld [vmem:[#allocation64_spill] sm:$0xff] }
 0x366   : > { %5927 = vmatpush1.bf16.msra.mxu1 %v9842_v16  ;;  %v9877_v16 = vld [vmem:[#allocation68_spill] sm:$0xff] }
 0x367   : > { %5929 = vmatprep.subr.bf16.mxu1 %v9843_v23  ;;  %v9878_v23 = vld [vmem:[#allocation69_spill] sm:$0xff] }
 0x36a   : > { %5931 = vmatpush1.bf16.msra.mxu1 %v9844_v32  ;;  %v9884_v32 = vld [vmem:[#allocation75_spill] sm:$0xff] }
 0x36b   : > { %5933 = vmatprep.subr.bf16.mxu1 %v9845_v35 }
 0x36e   : > { %5935 = vmatpush1.bf16.msra.mxu1 %v9846_v9 }
 0x36f   : > { %5937 = vmatprep.subr.bf16.mxu1 %v9847_v22  ;;  %v3166_v22 = vld [vmem:[#allocation10 + $0x210] sm:$0xff] }
 0x372   : > { %5939 = vmatpush1.bf16.msra.mxu1 %v9848_v30  ;;  %v3167_v30 = vld [vmem:[#allocation10 + $0x218] sm:$0xff] }
 0x373   : > { %5941 = vmatprep.subr.bf16.mxu1 %v9849_v19  ;;  %v3184_v19 = vld [vmem:[#allocation10 + $0x2a0] sm:$0xff] }
 0x376   : > { %5943 = vmatpush1.bf16.msra.mxu1 %v9850_v59  ;;  %v3168_v59 = vld [vmem:[#allocation10 + $0x220] sm:$0xff] }
 0x377   : > { %5945 = vmatprep.subr.bf16.mxu1 %v9851_v12  ;;  %v3169_v12 = vld [vmem:[#allocation10 + $0x228] sm:$0xff] }
 0x37a   : > { %5947 = vmatpush1.bf16.msra.mxu1 %v9852_v13  ;;  %v3186_v13 = vld [vmem:[#allocation10 + $0x2b0] sm:$0xff] }
 0x37b   : > { %5949 = vmatprep.subr.bf16.mxu1 %v9853_v27  ;;  %v3187_v27 = vld [vmem:[#allocation10 + $0x2b8] sm:$0xff] }
 0x37e   : > { %5951 = vmatpush1.bf16.msra.mxu1 %v9854_v57  ;;  %v6174_v57 = vpack.c.bf16 %v3169_v12, %v3168_v59  ;;  %v3126_v59 = vld [vmem:[#allocation10 + $0xd0] sm:$0xff]  ;;  %v3127_v12 = vld [vmem:[#allocation10 + $0xd8] sm:$0xff] }
 0x37f   : > { %5953 = vmatprep.subr.bf16.mxu1 %v9855_v37  ;;  %v3170_v37 = vld [vmem:[#allocation10 + $0x230] sm:$0xff] }
 0x382   : > { %5955 = vmatpush1.bf16.msra.mxu1 %v9856_v26  ;;  %v3171_v26 = vld [vmem:[#allocation10 + $0x238] sm:$0xff] }
 0x383   : > { %5957 = vmatprep.subr.bf16.mxu1 %v9857_v48  ;;  %v3188_v48 = vld [vmem:[#allocation10 + $0x2c0] sm:$0xff] }
 0x386   : > { %5959 = vmatpush1.bf16.msra.mxu1 %v9858_v8  ;;  %v3189_v8 = vld [vmem:[#allocation10 + $0x2c8] sm:$0xff] }
 0x387   : > { %5961 = vmatprep.subr.bf16.mxu1 %v9859_v25  ;;  %v6178_v25 = vpack.c.bf16 %v3171_v26, %v3170_v37  ;;  %v3128_v37 = vld [vmem:[#allocation10 + $0xe0] sm:$0xff]  ;;  %v3129_v26 = vld [vmem:[#allocation10 + $0xe8] sm:$0xff] }
 0x38a   : > { %5963 = vmatpush1.bf16.msra.mxu1 %v9860_v41  ;;  %v6180_v41 = vpack.c.bf16 %v3189_v8, %v3188_v48  ;;  %v6124_v8 = vpack.c.bf16 %v3129_v26, %v3128_v37  ;;  %v3146_v26 = vld [vmem:[#allocation10 + $0x170] sm:$0xff] }
 0x38b   : > { %5965 = vmatprep.subr.bf16.mxu1 %v9861_v40  ;;  %v3172_v40 = vld [vmem:[#allocation10 + $0x240] sm:$0xff] }
 0x38e   : > { %5967 = vmatpush1.bf16.msra.mxu1 %v9862_v49  ;;  %v3173_v49 = vld [vmem:[#allocation10 + $0x248] sm:$0xff] }
 0x38f   : > { %5969 = vmatprep.subr.bf16.mxu1 %v9865_v38  ;;  %v6182_v54 = vpack.c.bf16 %v3173_v49, %v3172_v40  ;;  %v3130_v40 = vld [vmem:[#allocation10 + $0xf0] sm:$0xff]  ;;  %v3131_v49 = vld [vmem:[#allocation10 + $0xf8] sm:$0xff] }
 0x392   : > { %5971 = vmatpush1.bf16.msra.mxu1 %v9866_v53  ;;  %v3175_v53 = vld [vmem:[#allocation10 + $0x258] sm:$0xff] }
 0x393   : > { %5973 = vmatprep.subr.bf16.mxu1 %v9867_v24  ;;  %v3193_v24 = vld [vmem:[#allocation10 + $0x2e8] sm:$0xff] }
 0x395   : > { %2955 = vmatmul.mubr.f32.vlgmr.msra.gmra.mrb[12].mxu1 %v1732_v11  ;;  %v3192_v11 = vld [vmem:[#allocation10 + $0x2e0] sm:$0xff] }
 0x396   : > { %5975 = vmatpush1.bf16.msra.mxu1 %v9868_v56  ;;  %3025 = vmatprep.mubr.f32.mxu1 %v1882_v51  ;;  %v6186_v51 = vpack.c.bf16 %v3175_v53, %v3174_v43  ;;  %v6188_v56 = vpack.c.bf16 %v3193_v24, %v3192_v11  ;;  %v3148_v43 = vld [vmem:[#allocation10 + $0x180] sm:$0xff]  ;;  %v3149_v53 = vld [vmem:[#allocation10 + $0x188] sm:$0xff] }
 0x397   : > { %5977 = vmatprep.subr.bf16.mxu1 %v9869_v44  ;;  %v6132_v24 = vpack.c.bf16 %v3149_v53, %v3148_v43  ;;  %v3179_v43 = vld [vmem:[#allocation10 + $0x278] sm:$0xff] }
 0x39a   : > { %5979 = vmatpush1.bf16.msra.mxu1 %v9870_v50 }
 0x39b   : > { %5981 = vmatprep.subr.bf16.mxu1 %v9871_v36 }
 0x39e   : > { %5983 = vmatpush1.bf16.msra.mxu1 %v9872_v63 }
 0x39f   : > { %5985 = vmatprep.subr.bf16.mxu1 %v9873_v4  ;;  %v3100_v4 = vld [vmem:[#allocation10] sm:$0xff] }
 0x3a2   : > { %5987 = vmatpush1.bf16.msra.mxu1 %v9874_v46  ;;  %v3101_v46 = vld [vmem:[#allocation10 + $0x8] sm:$0xff] }
 0x3a3   : > { %5989 = vmatprep.subr.bf16.mxu1 %v9875_v33 }
 0x3a6   : > { %5991 = vmatpush1.bf16.msra.mxu1 %v9876_v1 }
 0x3a7   : > { %5993 = vmatprep.subr.bf16.mxu1 %v9877_v16  ;;  %v3118_v16 = vld [vmem:[#allocation10 + $0x90] sm:$0xff] }
 0x3aa   : > { %5995 = vmatpush1.bf16.msra.mxu1 %v9878_v23  ;;  %v3119_v23 = vld [vmem:[#allocation10 + $0x98] sm:$0xff] }
 0x3ab   : > { %5997 = vmatprep.subr.bf16.mxu1 %v9879_v31 }
 0x3ae   : > { %5999 = vmatpush1.bf16.msra.mxu1 %v9880_v6 }
 0x3af   : > { %6001 = vmatprep.subr.bf16.mxu1 %v9881_v7  ;;  %v6102_v7 = vpack.c.bf16 %v3101_v46, %v3100_v4 }
 0x3b2   : > { %6003 = vmatpush1.bf16.msra.mxu1 %v9882_v42 }
 0x3b3   : > { %6005 = vmatprep.subr.bf16.mxu1 %v9883_v29  ;;  %v6104_v29 = vpack.c.bf16 %v3119_v23, %v3118_v16  ;;  %v3152_v23 = vld [vmem:[#allocation10 + $0x1a0] sm:$0xff] }
 0x3b6   : > { %6007 = vmatpush1.bf16.msra.mxu1 %v9884_v32  ;;  %v3102_v32 = vld [vmem:[#allocation10 + $0x10] sm:$0xff] }
 0x3b7   : > { %6009 = vmatprep.subr.bf16.mxu1 %v8805_v2  ;;  %v9886_v2 = vld [vmem:[#allocation77_spill] sm:$0xff] }
 0x3ba   : > { %6011 = vmatpush1.bf16.msra.mxu1 %v8824_v58  ;;  %v3180_v58 = vld [vmem:[#allocation10 + $0x280] sm:$0xff] }
 0x3bb   : > { %6013 = vmatprep.subr.bf16.mxu1 %v8827_v0  ;;  %v3181_v0 = vld [vmem:[#allocation10 + $0x288] sm:$0xff] }
 0x3be   : > { %6015 = vmatpush1.bf16.msra.mxu1 %v8844_v21  ;;  %v6496_v21 = vadd.f32 %v8992_v55, %v9863_v5  ;;  %v6170_v55 = vpack.c.bf16 %v3167_v30, %v3166_v22  ;;  %v3190_v5 = vld [vmem:[#allocation10 + $0x2d0] sm:$0xff]  ;;  %v3124_v22 = vld [vmem:[#allocation10 + $0xc0] sm:$0xff]  ;;  %v3125_v30 = vld [vmem:[#allocation10 + $0xc8] sm:$0xff] }
 0x3bf   : > { %6017 = vmatprep.subr.bf16.mxu1 %v8847_v45  ;;  %v6164_v45 = vpack.c.bf16 %v3181_v0, %v3180_v58  ;;  %v6184_v38 = vpack.c.bf16 %v3191_v28, %v3190_v5  ;;  %v3121_v58 = vld [vmem:[#allocation10 + $0xa8] sm:$0xff]  ;;  %v6128_v28 = vpack.c.bf16 %v3131_v49, %v3130_v40 }
 0x3c0   : > { %v1881_v9 = vmax.f32 %v6496_v21, 0.0 }
 0x3c2   : > { %6019 = vmatpush1.bf16.msra.mxu1 %v8864_v61  ;;  %v3164_v61 = vld [vmem:[#allocation10 + $0x200] sm:$0xff] }
 0x3c3   : > { %6021 = vmatprep.subr.bf16.mxu1 %v9885_v34  ;;  %v3103_v34 = vld [vmem:[#allocation10 + $0x18] sm:$0xff] }
 0x3c4   : > { %v6106_v0 = vpack.c.bf16 %v3103_v34, %v3102_v32  ;;  %v3137_v32 = vld [vmem:[#allocation10 + $0x128] sm:$0xff]  ;;  %v3154_v34 = vld [vmem:[#allocation10 + $0x1b0] sm:$0xff] }
 0x3c6   : > { %6023 = vmatpush1.bf16.msra.mxu1 %v8884_v10  ;;  %v3165_v10 = vld [vmem:[#allocation10 + $0x208] sm:$0xff] }
 0x3c7   : > { %6025 = vmatprep.subr.bf16.mxu1 %v8887_v18  ;;  %v3182_v18 = vld [vmem:[#allocation10 + $0x290] sm:$0xff]  ;;  %v6166_v15 = vpack.c.bf16 %v3165_v10, %v3164_v61  ;;  %v3105_v61 = vld [vmem:[#allocation10 + $0x28] sm:$0xff] }
 0x3c8   : > { %v3122_v10 = vld [vmem:[#allocation10 + $0xb0] sm:$0xff] }
 0x3c9   : > { %v9084_v35 = vpop.f32.mrb[8].mxu0 }
 0x3ca   : > { %v9086_v60 = vpop.f32.mrb[9].mxu0  ;;  %6027 = vmatpush1.bf16.msra.mxu1 %v9886_v2  ;;  %v3120_v2 = vld [vmem:[#allocation10 + $0xa0] sm:$0xff]  ;;  %v6502_v49 = vadd.f32 %v9084_v35, %v8971_v62  ;;  %v3574_v35 = vld [vmem:[%s9644_s10 + $0x28] sm:$0xff] }
 0x3cb   : > { %6029 = vmatprep.subr.bf16.mxu1 %v8907_v17  ;;  %v6168_v17 = vpack.c.bf16 %v3183_v3, %v3182_v18  ;;  %v6108_v21 = vpack.c.bf16 %v3121_v58, %v3120_v2  ;;  %v3123_v18 = vld [vmem:[#allocation10 + $0xb8] sm:$0xff] }
 0x3cc   : > { %v3155_v2 = vld [vmem:[#allocation10 + $0x1b8] sm:$0xff] }
 0x3ce   : > { %6031 = vmatpush1.bf16.msra.mxu1 %v8924_v20  ;;  %v3185_v20 = vld [vmem:[#allocation10 + $0x2a8] sm:$0xff] }
 0x3cf   : > { %6033 = vmatprep.subr.bf16.mxu1 %v8927_v39  ;;  %v6172_v39 = vpack.c.bf16 %v3185_v20, %v3184_v19  ;;  %v6116_v20 = vpack.c.bf16 %v3125_v30, %v3124_v22  ;;  %v3142_v30 = vld [vmem:[#allocation10 + $0x150] sm:$0xff] }
 0x3d2   : > { %6035 = vmatpush1.bf16.msra.mxu1 %v8938_v14  ;;  %v6176_v14 = vpack.c.bf16 %v3187_v27, %v3186_v13  ;;  %v6120_v27 = vpack.c.bf16 %v3127_v12, %v3126_v59  ;;  %v3144_v12 = vld [vmem:[#allocation10 + $0x160] sm:$0xff] }
 0x3d3   : > { %6165 = vmatprep.subr.bf16.mxu1 %v6164_v45  ;;  %v3104_v45 = vld [vmem:[#allocation10 + $0x20] sm:$0xff] }
 0x3d4   : > { %v6110_v3 = vpack.c.bf16 %v3105_v61, %v3104_v45  ;;  %v3139_v45 = vld [vmem:[#allocation10 + $0x138] sm:$0xff]  ;;  %v3156_v61 = vld [vmem:[#allocation10 + $0x1c0] sm:$0xff] }
 0x3d5   : > { %3026 = vmatmul.mubr.f32.vlgmr.msra.gmra.mrb[12].mxu1 %v1881_v9  ;;  %v3106_v9 = vld [vmem:[#allocation10 + $0x30] sm:$0xff] }
 0x3d6   : > { %6167 = vmatpush3.bf16.msra.mxu1 %v6166_v15  ;;  %v6112_v15 = vpack.c.bf16 %v3123_v18, %v3122_v10  ;;  %v3157_v10 = vld [vmem:[#allocation10 + $0x1c8] sm:$0xff]  ;;  %v3140_v18 = vld [vmem:[#allocation10 + $0x140] sm:$0xff] }
 0x3d7   : > { %6169 = vmatprep.subr.bf16.mxu1 %v6168_v17  ;;  %v3107_v17 = vld [vmem:[#allocation10 + $0x38] sm:$0xff] }
 0x3d8   : > { %v6114_v19 = vpack.c.bf16 %v3107_v17, %v3106_v9  ;;  %v3159_v9 = vld [vmem:[#allocation10 + $0x1d8] sm:$0xff] }
 0x3da   : > { %6171 = vmatpush3.bf16.msra.mxu1 %v6170_v55  ;;  %v3108_v55 = vld [vmem:[#allocation10 + $0x40] sm:$0xff] }
 0x3db   : > { %6173 = vmatprep.subr.bf16.mxu1 %v6172_v39  ;;  %v3109_v39 = vld [vmem:[#allocation10 + $0x48] sm:$0xff] }
 0x3dc   : > { %v6118_v13 = vpack.c.bf16 %v3109_v39, %v3108_v55  ;;  %v3161_v55 = vld [vmem:[#allocation10 + $0x1e8] sm:$0xff] }
 0x3de   : > { %6175 = vmatpush3.bf16.msra.mxu1 %v6174_v57  ;;  %v3110_v57 = vld [vmem:[#allocation10 + $0x50] sm:$0xff] }
 0x3df   : > { %6177 = vmatprep.subr.bf16.mxu1 %v6176_v14  ;;  %v3111_v14 = vld [vmem:[#allocation10 + $0x58] sm:$0xff] }
 0x3e0   : > { %v6122_v48 = vpack.c.bf16 %v3111_v14, %v3110_v57  ;;  %v3163_v57 = vld [vmem:[#allocation10 + $0x1f8] sm:$0xff] }
 0x3e2   : > { %6179 = vmatpush3.bf16.msra.mxu1 %v6178_v25  ;;  %v3112_v25 = vld [vmem:[#allocation10 + $0x60] sm:$0xff] }
 0x3e3   : > { %6181 = vmatprep.subr.bf16.mxu1 %v6180_v41  ;;  %v3113_v41 = vld [vmem:[#allocation10 + $0x68] sm:$0xff] }
 0x3e4   : > { %v6126_v5 = vpack.c.bf16 %v3113_v41, %v3112_v25  ;;  %v3177_v25 = vld [vmem:[#allocation10 + $0x268] sm:$0xff] }
 0x3e6   : > { %6183 = vmatpush3.bf16.msra.mxu1 %v6182_v54  ;;  %v3114_v54 = vld [vmem:[#allocation10 + $0x70] sm:$0xff] }
 0x3e7   : > { %6185 = vmatprep.subr.bf16.mxu1 %v6184_v38  ;;  %v3115_v38 = vld [vmem:[#allocation10 + $0x78] sm:$0xff] }
 0x3e8   : > { %v2581_v44 = vpop.f32.mrb[10].mxu1  ;;  %v6130_v11 = vpack.c.bf16 %v3115_v38, %v3114_v54  ;;  %v3178_v38 = vld [vmem:[#allocation10 + $0x270] sm:$0xff] }
 0x3e9   : > { %v9096_v50 = vadd.f32 %v2581_v44, %v8971_v62  ;;  %v4418_v36 = vpop.f32.mrb[10].mxu0  ;;  %v2583_v63 = vpop.f32.mrb[11].mxu1  ;;  %v6503_v44 = vadd.f32 %v9086_v60, %v8964_v52  ;;  %v3136_v60 = vld [vmem:[#allocation10 + $0x120] sm:$0xff]  ;;  %v6194_v53 = vpack.c.bf16 %v3179_v43, %v3178_v38  ;;  %v3642_v38 = vld [vmem:[%s9644_s10 + $0x248] sm:$0xff] }
 0x3ea   : > { %v6501_v33 = vadd.f32 %v2583_v63, %v8964_v52  ;;  %v4419_v1 = vpop.f32.mrb[11].mxu0  ;;  %6187 = vmatpush3.bf16.msra.mxu1 %v6186_v51  ;;  %v3132_v51 = vld [vmem:[#allocation10 + $0x100] sm:$0xff]  ;;  %v3151_v63 = vld [vmem:[#allocation10 + $0x198] sm:$0xff]  ;;  %v6142_v58 = vpack.c.bf16 %v3137_v32, %v3136_v60  ;;  %v3590_v60 = vld [vmem:[%s9644_s10 + $0xa8] sm:$0xff] }
 0x3eb   : > { %v9099_v31 = vadd.f32 %v4419_v1, %v4418_v36  ;;  %6189 = vmatprep.subr.bf16.mxu1 %v6188_v56  ;;  %v2586_v42 = vmax.f32 %v9096_v50, 0.0  ;;  %v3133_v56 = vld [vmem:[#allocation10 + $0x108] sm:$0xff]  ;;  %v3150_v36 = vld [vmem:[#allocation10 + $0x190] sm:$0xff]  ;;  %v3135_v1 = vld [vmem:[#allocation10 + $0x118] sm:$0xff]  ;;  %v2810_v16 = vmax.f32 %v6503_v44, 0.0 }
 0x3ec   : > { %v2587_v6 = vmax.f32 %v6501_v33, 0.0  ;;  %v6134_v4 = vpack.c.bf16 %v3133_v56, %v3132_v51  ;;  %v6136_v46 = vpack.c.bf16 %v3151_v63, %v3150_v36  ;;  %v3134_v33 = vld [vmem:[#allocation10 + $0x110] sm:$0xff]  ;;  %v3572_v51 = vld [vmem:[%s9644_s10 + $0x18] sm:$0xff]  ;;  %v3569_v36 = vld [vmem:[%s9644_s10] sm:$0xff] }
 0x3ed   : > { %v3576_v44 = vld [vmem:[%s9644_s10 + $0x38] sm:$0xff]  ;;  %v3573_v63 = vld [vmem:[%s9644_s10 + $0x20] sm:$0xff]  ;;  %v3646_v43 = vld [vmem:[%s9644_s10 + $0x268] sm:$0xff] }
 0x3ee   : > { %3341 = vmatprep.mubr.f32.mxu0 %v2587_v6 }
 0x3ef   : > { %3342 = vmatmul.mubr.f32.vlgmr.msra.gmra.mrb[12].mxu0 %v2586_v42 }
 0x3f0   : > { %6103 = vmatpush3.bf16.msra.mxu0 %v6102_v7  ;;  %3419 = vmatprep.mubr.f32.mxu0 %v2587_v6  ;;  %v3153_v6 = vld [vmem:[#allocation10 + $0x1a8] sm:$0xff]  ;;  %v6138_v7 = vpack.c.bf16 %v3135_v1, %v3134_v33 }
 0x3f1   : > { %6105 = vmatprep.subr.bf16.mxu0 %v6104_v29  ;;  %v6140_v29 = vpack.c.bf16 %v3153_v6, %v3152_v23  ;;  %v3578_v33 = vld [vmem:[%s9644_s10 + $0x48] sm:$0xff]  ;;  %v3577_v23 = vld [vmem:[%s9644_s10 + $0x40] sm:$0xff] }
 0x3f2   : > { %v3582_v1 = vld [vmem:[%s9644_s10 + $0x68] sm:$0xff]  ;;  %v3581_v6 = vld [vmem:[%s9644_s10 + $0x60] sm:$0xff] }
 0x3f4   : > { %6107 = vmatpush3.bf16.msra.mxu0 %v6106_v0  ;;  %v6144_v0 = vpack.c.bf16 %v3155_v2, %v3154_v34  ;;  %v3585_v34 = vld [vmem:[%s9644_s10 + $0x80] sm:$0xff] }
 0x3f5   : > { %6109 = vmatprep.subr.bf16.mxu0 %v6108_v21  ;;  %v3138_v21 = vld [vmem:[#allocation10 + $0x130] sm:$0xff]  ;;  %v3589_v2 = vld [vmem:[%s9644_s10 + $0xa0] sm:$0xff] }
 0x3f6   : > { %v6146_v50 = vpack.c.bf16 %v3139_v45, %v3138_v21  ;;  %v3598_v21 = vld [vmem:[%s9644_s10 + $0xe8] sm:$0xff] }
 0x3f8   : > { %6111 = vmatpush3.bf16.msra.mxu0 %v6110_v3  ;;  %v3141_v3 = vld [vmem:[#allocation10 + $0x148] sm:$0xff] }
 0x3f9   : > { %6113 = vmatprep.subr.bf16.mxu0 %v6112_v15  ;;  %v3158_v15 = vld [vmem:[#allocation10 + $0x1d0] sm:$0xff]  ;;  %v6150_v17 = vpack.c.bf16 %v3141_v3, %v3140_v18 }
 0x3fa   : > { %v6152_v22 = vpack.c.bf16 %v3159_v9, %v3158_v15  ;;  %v3601_v15 = vld [vmem:[%s9644_s10 + $0x100] sm:$0xff] }
 0x3fb   : > { %v3605_v9 = vld [vmem:[%s9644_s10 + $0x120] sm:$0xff] }
 0x3fc   : > { %6115 = vmatpush3.bf16.msra.mxu0 %v6114_v19  ;;  %v3143_v19 = vld [vmem:[#allocation10 + $0x158] sm:$0xff] }
 0x3fd   : > { %6117 = vmatprep.subr.bf16.mxu0 %v6116_v20  ;;  %v3160_v20 = vld [vmem:[#allocation10 + $0x1e0] sm:$0xff]  ;;  %v6154_v39 = vpack.c.bf16 %v3143_v19, %v3142_v30  ;;  %v6214_v30 = vpack.c.bf16 %v3605_v9, %v3601_v15  ;;  %v3670_v15 = vld [vmem:[%s9644_s10 + $0x328] sm:$0xff] }
 0x3fe   : > { %v6156_v59 = vpack.c.bf16 %v3161_v55, %v3160_v20  ;;  %v3609_v20 = vld [vmem:[%s9644_s10 + $0x140] sm:$0xff] }
 0x3ff   : > { %v3613_v55 = vld [vmem:[%s9644_s10 + $0x160] sm:$0xff] }
 0x400   : > { %6119 = vmatpush3.bf16.msra.mxu0 %v6118_v13  ;;  %v3145_v13 = vld [vmem:[#allocation10 + $0x168] sm:$0xff] }
 0x401   : > { %6121 = vmatprep.subr.bf16.mxu0 %v6120_v27  ;;  %v3162_v27 = vld [vmem:[#allocation10 + $0x1f0] sm:$0xff]  ;;  %v6158_v14 = vpack.c.bf16 %v3145_v13, %v3144_v12  ;;  %v6218_v12 = vpack.c.bf16 %v3613_v55, %v3609_v20 }
 0x402   : > { %v6160_v37 = vpack.c.bf16 %v3163_v57, %v3162_v27  ;;  %v3617_v27 = vld [vmem:[%s9644_s10 + $0x180] sm:$0xff] }
 0x403   : > { %v3621_v57 = vld [vmem:[%s9644_s10 + $0x1a0] sm:$0xff] }
 0x404   : > { %6123 = vmatpush3.bf16.msra.mxu0 %v6122_v48  ;;  %v3147_v48 = vld [vmem:[#allocation10 + $0x178] sm:$0xff] }
 0x405   : > { %6125 = vmatprep.subr.bf16.mxu0 %v6124_v8  ;;  %v3176_v8 = vld [vmem:[#allocation10 + $0x260] sm:$0xff]  ;;  %v6162_v40 = vpack.c.bf16 %v3147_v48, %v3146_v26  ;;  %v6222_v26 = vpack.c.bf16 %v3621_v57, %v3617_v27  ;;  %v3678_v27 = vld [vmem:[%s9644_s10 + $0x368] sm:$0xff] }
 0x406   : > { %v6190_v41 = vpack.c.bf16 %v3177_v25, %v3176_v8  ;;  %v3625_v8 = vld [vmem:[%s9644_s10 + $0x1c0] sm:$0xff] }
 0x407   : > { %v3629_v25 = vld [vmem:[%s9644_s10 + $0x1e0] sm:$0xff] }
 0x408   : > { %6127 = vmatpush3.bf16.msra.mxu0 %v6126_v5  ;;  %6191 = vmatpush3.bf16.msra.mxu1 %v6190_v41  ;;  %v3194_v5 = vld [vmem:[#allocation10 + $0x2f0] sm:$0xff]  ;;  %v3634_v41 = vld [vmem:[%s9644_s10 + $0x208] sm:$0xff] }
 0x409   : > { %6129 = vmatprep.subr.bf16.mxu0 %v6128_v28  ;;  %v3195_v28 = vld [vmem:[#allocation10 + $0x2f8] sm:$0xff] }
 0x40a   : > { %v6192_v54 = vpack.c.bf16 %v3195_v28, %v3194_v5  ;;  %v3633_v28 = vld [vmem:[%s9644_s10 + $0x200] sm:$0xff] }
 0x40c   : > { %6131 = vmatpush3.bf16.msra.mxu0 %v6130_v11  ;;  %6193 = vmatprep.subr.bf16.mxu1 %v6192_v54  ;;  %v2809_v11 = vmax.f32 %v6502_v49, 0.0  ;;  %v6226_v49 = vpack.c.bf16 %v3629_v25, %v3625_v8  ;;  %v3637_v54 = vld [vmem:[%s9644_s10 + $0x220] sm:$0xff] }
 0x40d   : > { %6133 = vmatprep.subr.bf16.mxu0 %v6132_v24  ;;  %6195 = vmatpush3.bf16.msra.mxu1 %v6194_v53  ;;  %v3570_v24 = vld [vmem:[%s9644_s10 + $0x8] sm:$0xff]  ;;  %v6230_v53 = vpack.c.bf16 %v3637_v54, %v3633_v28  ;;  %v3603_v28 = vld [vmem:[%s9644_s10 + $0x110] sm:$0xff] }
 0x40e   : > { %v6196_v56 = vpack.c.bf16 %v3574_v35, %v3570_v24  ;;  %v3641_v24 = vld [vmem:[%s9644_s10 + $0x240] sm:$0xff]  ;;  %v3607_v54 = vld [vmem:[%s9644_s10 + $0x130] sm:$0xff] }
 0x40f   : > { %3420 = vmatmul.mubr.f32.vlgmr.msra.gmra.mrb[14].mxu0 %v2586_v42  ;;  %v6148_v42 = vpack.c.bf16 %v3157_v10, %v3156_v61  ;;  %v3593_v61 = vld [vmem:[%s9644_s10 + $0xc0] sm:$0xff] }
 0x410   : > { %6135 = vmatpush3.bf16.msra.mxu0 %v6134_v4  ;;  %3489 = vmatprep.mubr.f32.mxu0 %v2810_v16  ;;  %v6260_v4 = vpack.c.bf16 %v3576_v44, %v3572_v51  ;;  %v6200_v16 = vpack.c.bf16 %v3582_v1, %v3578_v33  ;;  %v3597_v10 = vld [vmem:[%s9644_s10 + $0xe0] sm:$0xff]  ;;  %v3654_v44 = vld [vmem:[%s9644_s10 + $0x2a8] sm:$0xff]  ;;  %v3580_v1 = vld [vmem:[%s9644_s10 + $0x58] sm:$0xff] }
 0x411   : > { %6137 = vmatprep.subr.bf16.mxu0 %v6136_v46  ;;  %v6198_v46 = vpack.c.bf16 %v3573_v63, %v3569_v36  ;;  %v6210_v18 = vpack.c.bf16 %v3597_v10, %v3593_v61  ;;  %v3645_v35 = vld [vmem:[%s9644_s10 + $0x260] sm:$0xff] }
 0x412   : > { %6261 = vmatprep.subr.bf16.mxu1 %v6260_v4  ;;  %v3571_v4 = vld [vmem:[%s9644_s10 + $0x10] sm:$0xff] }
 0x414   : > { %6139 = vmatpush3.bf16.msra.mxu0 %v6138_v7  ;;  %v6202_v7 = vpack.c.bf16 %v3581_v6, %v3577_v23  ;;  %v3649_v6 = vld [vmem:[%s9644_s10 + $0x280] sm:$0xff] }
 0x415   : > { %6141 = vmatprep.subr.bf16.mxu0 %v6140_v29  ;;  %v3586_v29 = vld [vmem:[%s9644_s10 + $0x88] sm:$0xff] }
 0x416   : > { %v6204_v32 = vpack.c.bf16 %v3590_v60, %v3586_v29  ;;  %v3658_v60 = vld [vmem:[%s9644_s10 + $0x2c8] sm:$0xff] }
 0x418   : > { %6143 = vmatpush3.bf16.msra.mxu0 %v6142_v58  ;;  %v6206_v58 = vpack.c.bf16 %v3589_v2, %v3585_v34 }
 0x419   : > { %6145 = vmatprep.subr.bf16.mxu0 %v6144_v0  ;;  %v3594_v0 = vld [vmem:[%s9644_s10 + $0xc8] sm:$0xff] }
 0x41a   : > { %v6208_v45 = vpack.c.bf16 %v3598_v21, %v3594_v0  ;;  %v3583_v0 = vld [vmem:[%s9644_s10 + $0x70] sm:$0xff]  ;;  %v3588_v21 = vld [vmem:[%s9644_s10 + $0x98] sm:$0xff] }
 0x41c   : > { %6147 = vmatpush3.bf16.msra.mxu0 %v6146_v50  ;;  %v3602_v50 = vld [vmem:[%s9644_s10 + $0x108] sm:$0xff] }
 0x41d   : > { %6149 = vmatprep.subr.bf16.mxu0 %v6148_v42  ;;  %v3606_v42 = vld [vmem:[%s9644_s10 + $0x128] sm:$0xff] }
 0x41e   : > { %v6212_v3 = vpack.c.bf16 %v3606_v42, %v3602_v50  ;;  %v3657_v50 = vld [vmem:[%s9644_s10 + $0x2c0] sm:$0xff] }
 0x41f   : > { %v3661_v42 = vld [vmem:[%s9644_s10 + $0x2e0] sm:$0xff] }
 0x420   : > { %6151 = vmatpush3.bf16.msra.mxu0 %v6150_v17  ;;  %v3610_v17 = vld [vmem:[%s9644_s10 + $0x148] sm:$0xff]  ;;  %v6242_v20 = vpack.c.bf16 %v3661_v42, %v3657_v50 }
 0x421   : > { %6153 = vmatprep.subr.bf16.mxu0 %v6152_v22  ;;  %v3614_v22 = vld [vmem:[%s9644_s10 + $0x168] sm:$0xff] }
 0x422   : > { %v6216_v19 = vpack.c.bf16 %v3614_v22, %v3610_v17  ;;  %v3587_v17 = vld [vmem:[%s9644_s10 + $0x90] sm:$0xff] }
 0x423   : > { %v3591_v22 = vld [vmem:[%s9644_s10 + $0xb0] sm:$0xff] }
 0x424   : > { %6155 = vmatpush3.bf16.msra.mxu0 %v6154_v39  ;;  %v3618_v39 = vld [vmem:[%s9644_s10 + $0x188] sm:$0xff] }
 0x425   : > { %6157 = vmatprep.subr.bf16.mxu0 %v6156_v59  ;;  %v3622_v59 = vld [vmem:[%s9644_s10 + $0x1a8] sm:$0xff] }
 0x426   : > { %v6220_v13 = vpack.c.bf16 %v3622_v59, %v3618_v39  ;;  %v3665_v39 = vld [vmem:[%s9644_s10 + $0x300] sm:$0xff] }
 0x427   : > { %v3669_v59 = vld [vmem:[%s9644_s10 + $0x320] sm:$0xff] }
 0x428   : > { %6159 = vmatpush3.bf16.msra.mxu0 %v6158_v14  ;;  %v3626_v14 = vld [vmem:[%s9644_s10 + $0x1c8] sm:$0xff]  ;;  %v6246_v8 = vpack.c.bf16 %v3669_v59, %v3665_v39 }
 0x429   : > { %6161 = vmatprep.subr.bf16.mxu0 %v6160_v37  ;;  %v3630_v37 = vld [vmem:[%s9644_s10 + $0x1e8] sm:$0xff] }
 0x42a   : > { %v6224_v48 = vpack.c.bf16 %v3630_v37, %v3626_v14  ;;  %v3595_v14 = vld [vmem:[%s9644_s10 + $0xd0] sm:$0xff] }
 0x42b   : > { %v3599_v37 = vld [vmem:[%s9644_s10 + $0xf0] sm:$0xff] }
 0x42c   : > { %6163 = vmatpush3.bf16.msra.mxu0 %v6162_v40  ;;  %v3638_v40 = vld [vmem:[%s9644_s10 + $0x228] sm:$0xff] }
 0x42d   : > { %6197 = vmatprep.subr.bf16.mxu0 %v6196_v56  ;;  %v6228_v5 = vpack.c.bf16 %v3638_v40, %v3634_v41  ;;  %v3650_v56 = vld [vmem:[%s9644_s10 + $0x288] sm:$0xff]  ;;  %v3673_v41 = vld [vmem:[%s9644_s10 + $0x340] sm:$0xff] }
 0x42e   : > { %v6236_v23 = vpack.c.bf16 %v3654_v44, %v3650_v56  ;;  %v3677_v40 = vld [vmem:[%s9644_s10 + $0x360] sm:$0xff]  ;;  %v3620_v56 = vld [vmem:[%s9644_s10 + $0x198] sm:$0xff] }
 0x42f   : > { %3490 = vmatmul.mubr.f32.vlgmr.msra.gmra.mrb[16].mxu0 %v2809_v11  ;;  %v6232_v11 = vpack.c.bf16 %v3646_v43, %v3642_v38  ;;  %v3612_v38 = vld [vmem:[%s9644_s10 + $0x158] sm:$0xff] }
 0x430   : > { %6199 = vmatpush1.bf16.msra.mxu0 %v6198_v46  ;;  %v3575_v46 = vld [vmem:[%s9644_s10 + $0x30] sm:$0xff]  ;;  %v3616_v43 = vld [vmem:[%s9644_s10 + $0x178] sm:$0xff] }
 0x431   : > { %6201 = vmatprep.subr.bf16.mxu0 %v6200_v16  ;;  %v3584_v16 = vld [vmem:[%s9644_s10 + $0x78] sm:$0xff]  ;;  %v6262_v29 = vpack.c.bf16 %v3575_v46, %v3571_v4  ;;  %v3619_v46 = vld [vmem:[%s9644_s10 + $0x190] sm:$0xff] }
 0x432   : > { %v6264_v2 = vpack.c.bf16 %v3584_v16, %v3580_v1  ;;  %v3624_v44 = vld [vmem:[%s9644_s10 + $0x1b8] sm:$0xff] }
 0x433   : > { %v6284_v4 = vpack.c.bf16 %v3624_v44, %v3620_v56  ;;  %v3628_v16 = vld [vmem:[%s9644_s10 + $0x1d8] sm:$0xff]  ;;  %v3681_v44 = vld [vmem:[%s9644_s10 + $0x380] sm:$0xff] }
 0x434   : > { %6203 = vmatpush1.bf16.msra.mxu0 %v6202_v7  ;;  %v3688_v56 = vld [vmem:[%s9644_s10 + $0x3b8] sm:$0xff] }
 0x435   : > { %6205 = vmatprep.subr.bf16.mxu0 %v6204_v32  ;;  %v3662_v32 = vld [vmem:[%s9644_s10 + $0x2e8] sm:$0xff] }
 0x436   : > { %v6240_v10 = vpack.c.bf16 %v3662_v32, %v3658_v60  ;;  %v3627_v60 = vld [vmem:[%s9644_s10 + $0x1d0] sm:$0xff] }
 0x437   : > { %v3631_v32 = vld [vmem:[%s9644_s10 + $0x1f0] sm:$0xff] }
 0x438   : > { %6207 = vmatpush1.bf16.msra.mxu0 %v6206_v58  ;;  %v3579_v58 = vld [vmem:[%s9644_s10 + $0x50] sm:$0xff] }
 0x439   : > { %6209 = vmatprep.subr.bf16.mxu0 %v6208_v45  ;;  %v3592_v45 = vld [vmem:[%s9644_s10 + $0xb8] sm:$0xff] }
 0x43a   : > { %v6268_v9 = vpack.c.bf16 %v3592_v45, %v3588_v21  ;;  %v3635_v21 = vld [vmem:[%s9644_s10 + $0x210] sm:$0xff] }
 0x43b   : > { %v3639_v45 = vld [vmem:[%s9644_s10 + $0x230] sm:$0xff] }
 0x43c   : > { %6211 = vmatpush1.bf16.msra.mxu0 %v6210_v18  ;;  %v6266_v18 = vpack.c.bf16 %v3583_v0, %v3579_v58  ;;  %v6290_v58 = vpack.c.bf16 %v3631_v32, %v3627_v60  ;;  %v6294_v50 = vpack.c.bf16 %v3639_v45, %v3635_v21  ;;  %v3696_v32 = vld [vmem:[%s9644_s10 + $0x3f8] sm:$0xff]  ;;  %v3691_v21 = vld [vmem:[%s9644_s10 + $0x3d0] sm:$0xff] }
 0x43d   : > { %6213 = vmatprep.subr.bf16.mxu0 %v6212_v3  ;;  %v3666_v3 = vld [vmem:[%s9644_s10 + $0x308] sm:$0xff]  ;;  %v3695_v45 = vld [vmem:[%s9644_s10 + $0x3f0] sm:$0xff] }
 0x43e   : > { %v6244_v55 = vpack.c.bf16 %v3670_v15, %v3666_v3  ;;  %v3647_v3 = vld [vmem:[%s9644_s10 + $0x270] sm:$0xff]  ;;  %v3652_v15 = vld [vmem:[%s9644_s10 + $0x298] sm:$0xff] }
 0x440   : > { %6215 = vmatpush1.bf16.msra.mxu0 %v6214_v30  ;;  %v3596_v30 = vld [vmem:[%s9644_s10 + $0xd8] sm:$0xff] }
 0x441   : > { %6217 = vmatprep.subr.bf16.mxu0 %v6216_v19  ;;  %v3600_v19 = vld [vmem:[%s9644_s10 + $0xf8] sm:$0xff] }
 0x442   : > { %v6272_v57 = vpack.c.bf16 %v3600_v19, %v3596_v30  ;;  %v3651_v30 = vld [vmem:[%s9644_s10 + $0x290] sm:$0xff] }
 0x443   : > { %v3655_v19 = vld [vmem:[%s9644_s10 + $0x2b0] sm:$0xff] }
 0x444   : > { %6219 = vmatpush1.bf16.msra.mxu0 %v6218_v12  ;;  %v6270_v12 = vpack.c.bf16 %v3591_v22, %v3587_v17  ;;  %v6302_v39 = vpack.c.bf16 %v3655_v19, %v3651_v30  ;;  %v3870_v30 = vld [vmem:[#allocation12 + $0x28] sm:$0xff]  ;;  %v3872_v19 = vld [vmem:[#allocation12 + $0x38] sm:$0xff] }
 0x445   : > { %6221 = vmatprep.subr.bf16.mxu0 %v6220_v13  ;;  %v3674_v13 = vld [vmem:[%s9644_s10 + $0x348] sm:$0xff] }
 0x446   : > { %v6248_v25 = vpack.c.bf16 %v3678_v27, %v3674_v13  ;;  %v3663_v13 = vld [vmem:[%s9644_s10 + $0x2f0] sm:$0xff]  ;;  %v3668_v27 = vld [vmem:[%s9644_s10 + $0x318] sm:$0xff] }
 0x448   : > { %6223 = vmatpush1.bf16.msra.mxu0 %v6222_v26  ;;  %v3604_v26 = vld [vmem:[%s9644_s10 + $0x118] sm:$0xff] }
 0x449   : > { %6225 = vmatprep.subr.bf16.mxu0 %v6224_v48  ;;  %v3608_v48 = vld [vmem:[%s9644_s10 + $0x138] sm:$0xff] }
 0x44c   : > { %6227 = vmatpush1.bf16.msra.mxu0 %v6226_v49  ;;  %v6274_v49 = vpack.c.bf16 %v3599_v37, %v3595_v14 }
 0x44d   : > { %6229 = vmatprep.subr.bf16.mxu0 %v6228_v5  ;;  %v6276_v5 = vpack.c.bf16 %v3608_v48, %v3604_v26  ;;  %v3667_v26 = vld [vmem:[%s9644_s10 + $0x310] sm:$0xff] }
 0x44e   : > { %v3671_v48 = vld [vmem:[%s9644_s10 + $0x330] sm:$0xff] }
 0x450   : > { %6231 = vmatpush1.bf16.msra.mxu0 %v6230_v53  ;;  %v6250_v53 = vpack.c.bf16 %v3677_v40, %v3673_v41  ;;  %v6310_v41 = vpack.c.bf16 %v3671_v48, %v3667_v26  ;;  %v3873_v26 = vld [vmem:[#allocation12 + $0x40] sm:$0xff]  ;;  %v3875_v48 = vld [vmem:[#allocation12 + $0x50] sm:$0xff] }
 0x451   : > { %6233 = vmatprep.subr.bf16.mxu0 %v6232_v11  ;;  %v6278_v11 = vpack.c.bf16 %v3607_v54, %v3603_v28 }
 0x4a8   : > { %v3027_v51 = vpop.f32.mrb[12].mxu1 }
 0x4a9   : > { %v6504_v36 = vadd.f32 %v3027_v51, %v8971_v62  ;;  %v3029_v63 = vpop.f32.mrb[13].mxu1  ;;  %v6234_v62 = vpack.c.bf16 %v3645_v35, %v3641_v24  ;;  %v6280_v24 = vpack.c.bf16 %v3616_v43, %v3612_v38  ;;  %v3611_v35 = vld [vmem:[%s9644_s10 + $0x150] sm:$0xff] }
 0x4aa   : > { %v6505_v33 = vadd.f32 %v3029_v63, %v8964_v52  ;;  %v3653_v52 = vld [vmem:[%s9644_s10 + $0x2a0] sm:$0xff]  ;;  %v3615_v51 = vld [vmem:[%s9644_s10 + $0x170] sm:$0xff] }
 0x4ab   : > { %v3032_v34 = vmax.f32 %v6504_v36, 0.0  ;;  %6235 = vmatpush1.bf16.msra.mxu0 %v6234_v62  ;;  %v6238_v61 = vpack.c.bf16 %v3653_v52, %v3649_v6  ;;  %v6282_v36 = vpack.c.bf16 %v3615_v51, %v3611_v35  ;;  %v9361_v63 = vld [vmem:[%s9643_s9] ss:$0 sm:$0xff]  ;;  %v3632_v62 = vld [vmem:[%s9644_s10 + $0x1f8] sm:$0xff] }
 0x4ac   : > { %v3033_v7 = vmax.f32 %v6505_v33, 0.0  ;;  %6237 = vmatprep.subr.bf16.mxu0 %v6236_v23  ;;  %v3623_v33 = vld [vmem:[%s9644_s10 + $0x1b0] sm:$0xff]  ;;  %v3274_v6 = vadd.f32 %v9099_v31, %v9361_v63  ;;  %v3640_v31 = vld [vmem:[%s9644_s10 + $0x238] sm:$0xff] }
 0x4ae   : > { %3559 = vmatprep.mubr.f32.mxu1 %v3033_v7  ;;  %v6286_v7 = vpack.c.bf16 %v3623_v33, %v3619_v46 }
 0x4af   : > { %3560 = vmatmul.mubr.f32.vlgmr.msra.gmra.mrb[14].mxu1 %v3032_v34  ;;  %6239 = vmatpush1.bf16.msra.mxu0 %v6238_v61  ;;  %v3644_v61 = vld [vmem:[%s9644_s10 + $0x258] sm:$0xff] }
 0x4b0   : > { %6263 = vmatpush1.bf16.msra.mxu1 %v6262_v29  ;;  %6241 = vmatprep.subr.bf16.mxu0 %v6240_v10  ;;  %v6288_v29 = vpack.c.bf16 %v3632_v62, %v3628_v16  ;;  %v3648_v10 = vld [vmem:[%s9644_s10 + $0x278] sm:$0xff]  ;;  %v3687_v16 = vld [vmem:[%s9644_s10 + $0x3b0] sm:$0xff] }
 0x4b1   : > { %6265 = vmatprep.subr.bf16.mxu1 %v6264_v2  ;;  %v3636_v2 = vld [vmem:[%s9644_s10 + $0x218] sm:$0xff]  ;;  %v6296_v42 = vpack.c.bf16 %v3648_v10, %v3644_v61  ;;  %v6322_v61 = vpack.c.bf16 %v3695_v45, %v3691_v21  ;;  %v3866_v10 = vld [vmem:[#allocation12 + $0x8] sm:$0xff] }
 0x4b2   : > { %v6292_v0 = vpack.c.bf16 %v3640_v31, %v3636_v2  ;;  %v3689_v2 = vld [vmem:[%s9644_s10 + $0x3c0] sm:$0xff]  ;;  %v3904_v21 = vld [vmem:[#allocation12 + $0x138] sm:$0xff] }
 0x4b3   : > { %6243 = vmatpush1.bf16.msra.mxu0 %v6242_v20  ;;  %v3660_v20 = vld [vmem:[%s9644_s10 + $0x2d8] sm:$0xff]  ;;  %v3693_v31 = vld [vmem:[%s9644_s10 + $0x3e0] sm:$0xff] }
 0x4b4   : > { %6267 = vmatpush1.bf16.msra.mxu1 %v6266_v18  ;;  %6245 = vmatprep.subr.bf16.mxu0 %v6244_v55  ;;  %v3643_v18 = vld [vmem:[%s9644_s10 + $0x250] sm:$0xff]  ;;  %v3664_v55 = vld [vmem:[%s9644_s10 + $0x2f8] sm:$0xff] }
 0x4b5   : > { %6269 = vmatprep.subr.bf16.mxu1 %v6268_v9  ;;  %v3656_v9 = vld [vmem:[%s9644_s10 + $0x2b8] sm:$0xff]  ;;  %v6298_v17 = vpack.c.bf16 %v3647_v3, %v3643_v18  ;;  %v6304_v59 = vpack.c.bf16 %v3664_v55, %v3660_v20 }
 0x4b6   : > { %v6300_v22 = vpack.c.bf16 %v3656_v9, %v3652_v15  ;;  %v3865_v9 = vld [vmem:[#allocation12] sm:$0xff] }
 0x4b7   : > { %6247 = vmatpush1.bf16.msra.mxu0 %v6246_v8  ;;  %v3676_v8 = vld [vmem:[%s9644_s10 + $0x358] sm:$0xff] }
 0x4b8   : > { %6271 = vmatpush1.bf16.msra.mxu1 %v6270_v12  ;;  %6249 = vmatprep.subr.bf16.mxu0 %v6248_v25  ;;  %v3659_v12 = vld [vmem:[%s9644_s10 + $0x2d0] sm:$0xff]  ;;  %v3680_v25 = vld [vmem:[%s9644_s10 + $0x378] sm:$0xff] }
 0x4b9   : > { %6273 = vmatprep.subr.bf16.mxu1 %v6272_v57  ;;  %v3672_v57 = vld [vmem:[%s9644_s10 + $0x338] sm:$0xff]  ;;  %v6306_v14 = vpack.c.bf16 %v3663_v13, %v3659_v12  ;;  %v6312_v40 = vpack.c.bf16 %v3680_v25, %v3676_v8  ;;  %v3869_v12 = vld [vmem:[#allocation12 + $0x20] sm:$0xff]  ;;  %v3871_v13 = vld [vmem:[#allocation12 + $0x30] sm:$0xff] }
 0x4ba   : > { %v6308_v37 = vpack.c.bf16 %v3672_v57, %v3668_v27  ;;  %v3874_v27 = vld [vmem:[#allocation12 + $0x48] sm:$0xff]  ;;  %v3876_v57 = vld [vmem:[#allocation12 + $0x58] sm:$0xff] }
 0x4bb   : > { %6251 = vmatpush1.bf16.msra.mxu0 %v6250_v53  ;;  %v3682_v53 = vld [vmem:[%s9644_s10 + $0x388] sm:$0xff]  ;;  %v3880_v25 = vld [vmem:[#allocation12 + $0x78] sm:$0xff] }
 0x4bc   : > { %6275 = vmatpush1.bf16.msra.mxu1 %v6274_v49  ;;  %v3675_v49 = vld [vmem:[%s9644_s10 + $0x350] sm:$0xff]  ;;  %v3878_v8 = vld [vmem:[#allocation12 + $0x68] sm:$0xff] }
 0x4bd   : > { %6277 = vmatprep.subr.bf16.mxu1 %v6276_v5  ;;  %v3679_v5 = vld [vmem:[%s9644_s10 + $0x370] sm:$0xff] }
 0x4be   : > { %v6314_v28 = vpack.c.bf16 %v3679_v5, %v3675_v49  ;;  %v3879_v49 = vld [vmem:[#allocation12 + $0x70] sm:$0xff]  ;;  %v3882_v5 = vld [vmem:[#allocation12 + $0x88] sm:$0xff] }
 0x4c0   : > { %6279 = vmatpush1.bf16.msra.mxu1 %v6278_v11  ;;  %v3686_v11 = vld [vmem:[%s9644_s10 + $0x3a8] sm:$0xff] }
 0x4c1   : > { %6281 = vmatprep.subr.bf16.mxu1 %v6280_v24  ;;  %v3684_v24 = vld [vmem:[%s9644_s10 + $0x398] sm:$0xff]  ;;  %v6252_v51 = vpack.c.bf16 %v3686_v11, %v3682_v53  ;;  %v3883_v53 = vld [vmem:[#allocation12 + $0x90] sm:$0xff]  ;;  %v3886_v11 = vld [vmem:[#allocation12 + $0xa8] sm:$0xff] }
 0x4c2   : > { %v4453_v1 = vpop.f32.mrb[12].mxu0  ;;  %v6316_v46 = vpack.c.bf16 %v3688_v56, %v3684_v24  ;;  %v3888_v24 = vld [vmem:[#allocation12 + $0xb8] sm:$0xff]  ;;  %v3885_v56 = vld [vmem:[#allocation12 + $0xa0] sm:$0xff] }
 0x4c3   : > { %v4454_v23 = vpop.f32.mrb[13].mxu0  ;;  %6253 = vmatprep.subr.bf16.mxu0 %v6252_v51  ;;  %v6344_v51 = vpack.c.bf16 %v3888_v24, %v3886_v11  ;;  %v3925_v24 = vld [vmem:[#allocation12 + $0x1e0] sm:$0xff] }
 0x4c4   : > { %v4455_v52 = vadd.f32 %v4454_v23, %v4453_v1  ;;  %6283 = vmatpush1.bf16.msra.mxu1 %v6282_v36  ;;  %v3685_v36 = vld [vmem:[%s9644_s10 + $0x3a0] sm:$0xff]  ;;  %v3683_v1 = vld [vmem:[%s9644_s10 + $0x390] sm:$0xff] }
 0x4c5   : > { %6285 = vmatprep.subr.bf16.mxu1 %v6284_v4  ;;  %v6254_v33 = vpack.c.bf16 %v3685_v36, %v3681_v44  ;;  %v3887_v44 = vld [vmem:[#allocation12 + $0xb0] sm:$0xff]  ;;  %v3890_v36 = vld [vmem:[#allocation12 + $0xc8] sm:$0xff] }
 0x4c6   : > { %v9383_v34 = vadd.f32 %v4455_v52, %v3274_v6  ;;  %v6318_v6 = vpack.c.bf16 %v3687_v16, %v3683_v1  ;;  %v3690_v52 = vld [vmem:[%s9644_s10 + $0x3c8] sm:$0xff]  ;;  %v3889_v1 = vld [vmem:[#allocation12 + $0xc0] sm:$0xff]  ;;  %v3891_v16 = vld [vmem:[#allocation12 + $0xd0] sm:$0xff] }
 0x4c7   : > { %6255 = vmatpush1.bf16.msra.mxu0 %v6254_v33 }
 0x4c8   : > { %6287 = vmatpush1.bf16.msra.mxu1 %v6286_v7  ;;  %v3694_v7 = vld [vmem:[%s9644_s10 + $0x3e8] sm:$0xff] }
 0x4c9   : > { %6289 = vmatprep.subr.bf16.mxu1 %v6288_v29  ;;  %v3692_v29 = vld [vmem:[%s9644_s10 + $0x3d8] sm:$0xff] }
 0x4cc   : > { %6291 = vmatpush1.bf16.msra.mxu1 %v6290_v58  ;;  %v6320_v58 = vpack.c.bf16 %v3696_v32, %v3692_v29  ;;  %v3895_v29 = vld [vmem:[#allocation12 + $0xf0] sm:$0xff] }
 0x4cd   : > { %6293 = vmatprep.subr.bf16.mxu1 %v6292_v0  ;;  %v6258_v0 = vpack.c.bf16 %v3693_v31, %v3689_v2  ;;  %v3897_v31 = vld [vmem:[#allocation12 + $0x100] sm:$0xff] }
 0x4d0   : > { %6295 = vmatpush1.bf16.msra.mxu1 %v6294_v50  ;;  %v3868_v50 = vld [vmem:[#allocation12 + $0x18] sm:$0xff] }
 0x4d1   : > { %6297 = vmatprep.subr.bf16.mxu1 %v6296_v42  ;;  %v6324_v42 = vpack.c.bf16 %v3868_v50, %v3866_v10  ;;  %v3901_v10 = vld [vmem:[#allocation12 + $0x120] sm:$0xff]  ;;  %v3903_v50 = vld [vmem:[#allocation12 + $0x130] sm:$0xff] }
 0x4d4   : > { %6299 = vmatpush1.bf16.msra.mxu1 %v6298_v17  ;;  %v3867_v17 = vld [vmem:[#allocation12 + $0x10] sm:$0xff] }
 0x4d5   : > { %6301 = vmatprep.subr.bf16.mxu1 %v6300_v22  ;;  %v6326_v55 = vpack.c.bf16 %v3867_v17, %v3865_v9  ;;  %v3905_v9 = vld [vmem:[#allocation12 + $0x140] sm:$0xff]  ;;  %v3907_v17 = vld [vmem:[#allocation12 + $0x150] sm:$0xff] }
 0x4d8   : > { %6303 = vmatpush1.bf16.msra.mxu1 %v6302_v39  ;;  %v3347_v39 = vmax.f32 %v9383_v34, 0.0  ;;  %v6336_v34 = vpack.c.bf16 %v3880_v25, %v3878_v8  ;;  %v3917_v25 = vld [vmem:[#allocation12 + $0x1a0] sm:$0xff] }
 0x4d9   : > { %6305 = vmatprep.subr.bf16.mxu1 %v6304_v59  ;;  %v6328_v59 = vpack.c.bf16 %v3872_v19, %v3870_v30  ;;  %v3912_v30 = vld [vmem:[#allocation12 + $0x178] sm:$0xff]  ;;  %v6366_v19 = vpack.c.bf16 %v3907_v17, %v3905_v9  ;;  %v4157_v9 = vld [vmem:[%s9648_s14 + $0x40] sm:$0xff]  ;;  %v4158_v17 = vld [vmem:[%s9648_s14 + $0x48] sm:$0xff] }
 0x4dc   : > { %6307 = vmatpush1.bf16.msra.mxu1 %v6306_v14  ;;  %v6330_v14 = vpack.c.bf16 %v3871_v13, %v3869_v12  ;;  %v3916_v12 = vld [vmem:[#allocation12 + $0x198] sm:$0xff] }
 0x4dd   : > { %6309 = vmatprep.subr.bf16.mxu1 %v6308_v37  ;;  %v6332_v37 = vpack.c.bf16 %v3876_v57, %v3874_v27  ;;  %v3913_v57 = vld [vmem:[#allocation12 + $0x180] sm:$0xff] }
 0x4e0   : > { %6311 = vmatpush1.bf16.msra.mxu1 %v6310_v41  ;;  %v6334_v41 = vpack.c.bf16 %v3875_v48, %v3873_v26  ;;  %v3920_v26 = vld [vmem:[#allocation12 + $0x1b8] sm:$0xff] }
 0x4e1   : > { %6313 = vmatprep.subr.bf16.mxu1 %v6312_v40  ;;  %v3877_v40 = vld [vmem:[#allocation12 + $0x60] sm:$0xff] }
 0x4e2   : > { %v4488_v54 = vpop.f32.mrb[14].mxu0 }
 0x4e3   : > { %v4489_v38 = vpop.f32.mrb[15].mxu0 }
 0x4e4   : > { %v4490_v43 = vadd.f32 %v4489_v38, %v4488_v54  ;;  %6315 = vmatpush1.bf16.msra.mxu1 %v6314_v28  ;;  %v3884_v28 = vld [vmem:[#allocation12 + $0x98] sm:$0xff]  ;;  %v6338_v54 = vpack.c.bf16 %v3879_v49, %v3877_v40 }
 0x4e5   : > { %6317 = vmatprep.subr.bf16.mxu1 %v6316_v46  ;;  %v6340_v38 = vpack.c.bf16 %v3884_v28, %v3882_v5  ;;  %v6346_v46 = vpack.c.bf16 %v3887_v44, %v3885_v56  ;;  %v3924_v40 = vld [vmem:[#allocation12 + $0x1d8] sm:$0xff]  ;;  %v3921_v28 = vld [vmem:[#allocation12 + $0x1c0] sm:$0xff]  ;;  %v3930_v56 = vld [vmem:[#allocation12 + $0x208] sm:$0xff] }
 0x4e6   : > { %v3422_v62 = vadd.f32 %v4490_v43, %v9361_v63  ;;  %v6256_v63 = vpack.c.bf16 %v3694_v7, %v3690_v52  ;;  %v3881_v43 = vld [vmem:[#allocation12 + $0x80] sm:$0xff]  ;;  %v3932_v44 = vld [vmem:[#allocation12 + $0x218] sm:$0xff] }
 0x4e7   : > { %v3893_v7 = vld [vmem:[#allocation12 + $0xe0] sm:$0xff] }
 0x4e8   : > { %6319 = vmatpush1.bf16.msra.mxu1 %v6318_v6  ;;  %6257 = vmatprep.subr.bf16.mxu0 %v6256_v63  ;;  %v6350_v6 = vpack.c.bf16 %v3891_v16, %v3889_v1  ;;  %v3900_v63 = vld [vmem:[#allocation12 + $0x118] sm:$0xff]  ;;  %v6354_v32 = vpack.c.bf16 %v3895_v29, %v3893_v7  ;;  %v4150_v16 = vld [vmem:[%s9648_s14 + $0x8] sm:$0xff]  ;;  %v4151_v7 = vld [vmem:[%s9648_s14 + $0x10] sm:$0xff] }
 0x4e9   : > { %6321 = vmatprep.subr.bf16.mxu1 %v6320_v58  ;;  %6259 = vmatpush1.bf16.msra.mxu0 %v6258_v0  ;;  %v3899_v58 = vld [vmem:[#allocation12 + $0x110] sm:$0xff]  ;;  %v3902_v0 = vld [vmem:[#allocation12 + $0x128] sm:$0xff]  ;;  %v4152_v29 = vld [vmem:[%s9648_s14 + $0x18] sm:$0xff] }
 0x4ea   : > { %6325 = vmatprep.subr.bf16.mxu0 %v6324_v42  ;;  %v6358_v45 = vpack.c.bf16 %v3899_v58, %v3897_v31  ;;  %v3906_v42 = vld [vmem:[#allocation12 + $0x148] sm:$0xff]  ;;  %v4153_v31 = vld [vmem:[%s9648_s14 + $0x20] sm:$0xff] }
 0x4eb   : > { %v4154_v58 = vld [vmem:[%s9648_s14 + $0x28] sm:$0xff] }
 0x4ec   : > { %6323 = vmatpush1.bf16.msra.mxu1 %v6322_v61  ;;  %v6360_v61 = vpack.c.bf16 %v3904_v21, %v3902_v0  ;;  %v4171_v0 = vld [vmem:[%s9648_s14 + $0xb0] sm:$0xff]  ;;  %v4172_v21 = vld [vmem:[%s9648_s14 + $0xb8] sm:$0xff] }
 0x502   : > { %v4523_v35 = vpop.f32.mrb[16].mxu0 }
 0x503   : > { %v4524_v4 = vpop.f32.mrb[17].mxu0 }
 0x504   : > { %v4525_v23 = vadd.f32 %v4524_v4, %v4523_v35  ;;  %v6342_v35 = vpack.c.bf16 %v3883_v53, %v3881_v43  ;;  %v3892_v4 = vld [vmem:[#allocation12 + $0xd8] sm:$0xff]  ;;  %v3926_v43 = vld [vmem:[#allocation12 + $0x1e8] sm:$0xff] }
 0x505   : > { %v6348_v33 = vpack.c.bf16 %v3892_v4, %v3890_v36  ;;  %v3928_v53 = vld [vmem:[#allocation12 + $0x1f8] sm:$0xff]  ;;  %v6388_v36 = vpack.c.bf16 %v3932_v44, %v3930_v56  ;;  %v4165_v4 = vld [vmem:[%s9648_s14 + $0x80] sm:$0xff] }
 0x506   : > { %v3492_v60 = vadd.f32 %v4525_v23, %v3422_v62  ;;  %v3894_v62 = vld [vmem:[#allocation12 + $0xe8] sm:$0xff]  ;;  %v3896_v23 = vld [vmem:[#allocation12 + $0xf8] sm:$0xff]  ;;  %v6384_v11 = vpack.c.bf16 %v3928_v53, %v3926_v43  ;;  %v3933_v44 = vld [vmem:[#allocation12 + $0x220] sm:$0xff] }
 0x507   : > { %v6352_v52 = vpack.c.bf16 %v3896_v23, %v3894_v62  ;;  %v4167_v62 = vld [vmem:[%s9648_s14 + $0x90] sm:$0xff]  ;;  %v4168_v23 = vld [vmem:[%s9648_s14 + $0x98] sm:$0xff]  ;;  %v3934_v53 = vld [vmem:[#allocation12 + $0x228] sm:$0xff] }
 0x582   : > { %v4558_v18 = vpop.f32.mrb[14].mxu1 }
 0x583   : > { %v4559_v3 = vpop.f32.mrb[15].mxu1 }
 0x584   : > { %v4560_v15 = vadd.f32 %v4559_v3, %v4558_v18  ;;  %v3908_v18 = vld [vmem:[#allocation12 + $0x158] sm:$0xff]  ;;  %v6362_v3 = vpack.c.bf16 %v3903_v50, %v3901_v10  ;;  %v4155_v10 = vld [vmem:[%s9648_s14 + $0x30] sm:$0xff] }
 0x585   : > { %v4156_v50 = vld [vmem:[%s9648_s14 + $0x38] sm:$0xff] }
 0x586   : > { %v3562_v22 = vadd.f32 %v4560_v15, %v3492_v60  ;;  %v3898_v60 = vld [vmem:[#allocation12 + $0x108] sm:$0xff]  ;;  %v6364_v15 = vpack.c.bf16 %v3908_v18, %v3906_v42  ;;  %v4173_v42 = vld [vmem:[%s9648_s14 + $0xc0] sm:$0xff] }
 0x587   : > { %v6356_v2 = vpack.c.bf16 %v3900_v63, %v3898_v60  ;;  %v4169_v60 = vld [vmem:[%s9648_s14 + $0xa0] sm:$0xff]  ;;  %v4170_v63 = vld [vmem:[%s9648_s14 + $0xa8] sm:$0xff] }
 0x588   : > { %v3565_v20 = vmax.f32 %v3562_v22, 0.0  ;;  %v3910_v22 = vld [vmem:[#allocation12 + $0x168] sm:$0xff] }
 0x589   : > { %v4174_v18 = vld [vmem:[%s9648_s14 + $0xc8] sm:$0xff] }
 0x58a   : > { %3783 = vmatprep.mubr.f32.mxu0 %v3565_v20  ;;  %3854 = vmatprep.mubr.f32.mxu1 %v3565_v20  ;;  %v6368_v20 = vpack.c.bf16 %v3912_v30, %v3910_v22  ;;  %v4175_v22 = vld [vmem:[%s9648_s14 + $0xd0] sm:$0xff]  ;;  %v4176_v30 = vld [vmem:[%s9648_s14 + $0xd8] sm:$0xff] }
 0x58b   : > { %3784 = vmatmul.mubr.f32.vlgmr.msra.gmra.mrb[18].mxu0 %v3347_v39  ;;  %3855 = vmatmul.mubr.f32.vlgmr.msra.gmra.mrb[16].mxu1 %v3347_v39  ;;  %v3911_v39 = vld [vmem:[#allocation12 + $0x170] sm:$0xff] }
 0x58c   : > { %6327 = vmatpush1.bf16.msra.mxu0 %v6326_v55  ;;  %v3909_v55 = vld [vmem:[#allocation12 + $0x160] sm:$0xff] }
 0x58d   : > { %6329 = vmatprep.subr.bf16.mxu0 %v6328_v59  ;;  %v3914_v59 = vld [vmem:[#allocation12 + $0x188] sm:$0xff]  ;;  %v6370_v13 = vpack.c.bf16 %v3911_v39, %v3909_v55  ;;  %v4159_v55 = vld [vmem:[%s9648_s14 + $0x50] sm:$0xff]  ;;  %v4160_v39 = vld [vmem:[%s9648_s14 + $0x58] sm:$0xff] }
 0x58e   : > { %v6372_v27 = vpack.c.bf16 %v3916_v12, %v3914_v59  ;;  %v4177_v59 = vld [vmem:[%s9648_s14 + $0xe0] sm:$0xff]  ;;  %v4178_v12 = vld [vmem:[%s9648_s14 + $0xe8] sm:$0xff] }
 0x590   : > { %6331 = vmatpush1.bf16.msra.mxu0 %v6330_v14  ;;  %v3915_v14 = vld [vmem:[#allocation12 + $0x190] sm:$0xff] }
 0x591   : > { %6333 = vmatprep.subr.bf16.mxu0 %v6332_v37  ;;  %v3918_v37 = vld [vmem:[#allocation12 + $0x1a8] sm:$0xff]  ;;  %v6374_v48 = vpack.c.bf16 %v3915_v14, %v3913_v57  ;;  %v9588_v57 = vld [vmem:[%s9645_s11] sm:$0xf] }
 0x592   : > { %v6376_v8 = vpack.c.bf16 %v3920_v26, %v3918_v37  ;;  %v9887_v14 = vld [vmem:[#allocation21_spill] sm:$0xff]  ;;  %v3702_v26 = vrot.slane %v9588_v57, %v7662_v47 }
 0x593   : > { %v3713_v37 = vsub.s32 3, %v9887_v14 }
 0x594   : > { %6335 = vmatpush1.bf16.msra.mxu0 %v6334_v41  ;;  %v3919_v41 = vld [vmem:[#allocation12 + $0x1b0] sm:$0xff] }
 0x595   : > { %6337 = vmatprep.subr.bf16.mxu0 %v6336_v34  ;;  %v3922_v34 = vld [vmem:[#allocation12 + $0x1c8] sm:$0xff]  ;;  %v6378_v49 = vpack.c.bf16 %v3919_v41, %v3917_v25  ;;  %v3714_v25 = vrot.slane %v9588_v57, %v3713_v37 }
 0x596   : > { %v6380_v5 = vpack.c.bf16 %v3924_v40, %v3922_v34 }
 0x598   : > { %6339 = vmatpush1.bf16.msra.mxu0 %v6338_v54  ;;  %v3923_v54 = vld [vmem:[#allocation12 + $0x1d0] sm:$0xff] }
 0x599   : > { %6341 = vmatprep.subr.bf16.mxu0 %v6340_v38  ;;  %v6382_v38 = vpack.c.bf16 %v3923_v54, %v3921_v28  ;;  %v3929_v28 = vld [vmem:[#allocation12 + $0x200] sm:$0xff]  ;;  %v3931_v54 = vld [vmem:[#allocation12 + $0x210] sm:$0xff] }
 0x59c   : > { %6343 = vmatpush1.bf16.msra.mxu0 %v6342_v35  ;;  %v3927_v35 = vld [vmem:[#allocation12 + $0x1f0] sm:$0xff] }
 0x59d   : > { %6345 = vmatprep.subr.bf16.mxu0 %v6344_v51  ;;  %v6386_v51 = vpack.c.bf16 %v3927_v35, %v3925_v24  ;;  %v6390_v35 = vpack.c.bf16 %v3931_v54, %v3929_v28  ;;  %v3965_v28 = vld [vmem:[#allocation12 + $0x320] sm:$0xff]  ;;  %v3967_v54 = vld [vmem:[#allocation12 + $0x330] sm:$0xff] }
 0x5a0   : > { %6347 = vmatpush1.bf16.msra.mxu0 %v6346_v46  ;;  %v4166_v46 = vld [vmem:[%s9648_s14 + $0x88] sm:$0xff] }
 0x5a1   : > { %6349 = vmatprep.subr.bf16.mxu0 %v6348_v33  ;;  %v4149_v33 = vld [vmem:[%s9648_s14] sm:$0xff]  ;;  %v6452_v1 = vpack.c.bf16 %v4166_v46, %v4165_v4  ;;  %v3938_v46 = vld [vmem:[#allocation12 + $0x248] sm:$0xff] }
 0x5a3   : > { %6453 = vmatprep.subr.bf16.mxu1 %v6452_v1 }
 0x5a4   : > { %6351 = vmatpush1.bf16.msra.mxu0 %v6350_v6  ;;  %v6454_v6 = vpack.c.bf16 %v4150_v16, %v4149_v33  ;;  %v3940_v33 = vld [vmem:[#allocation12 + $0x258] sm:$0xff] }
 0x5a5   : > { %6353 = vmatprep.subr.bf16.mxu0 %v6352_v52  ;;  %v6456_v52 = vpack.c.bf16 %v4168_v23, %v4167_v62  ;;  %v6396_v16 = vpack.c.bf16 %v3940_v33, %v3938_v46  ;;  %v3937_v62 = vld [vmem:[#allocation12 + $0x240] sm:$0xff]  ;;  %v3939_v23 = vld [vmem:[#allocation12 + $0x250] sm:$0xff]  ;;  %v3978_v33 = vld [vmem:[#allocation12 + $0x388] sm:$0xff] }
 0x5a6   : > { %6455 = vmatpush3.bf16.msra.mxu1 %v6454_v6  ;;  %v3942_v6 = vld [vmem:[#allocation12 + $0x268] sm:$0xff]  ;;  %v3975_v46 = vld [vmem:[#allocation12 + $0x370] sm:$0xff] }
 0x5a7   : > { %6457 = vmatprep.subr.bf16.mxu1 %v6456_v52  ;;  %v3944_v52 = vld [vmem:[#allocation12 + $0x278] sm:$0xff] }
 0x5a8   : > { %6355 = vmatpush1.bf16.msra.mxu0 %v6354_v32  ;;  %v6458_v32 = vpack.c.bf16 %v4152_v29, %v4151_v7  ;;  %v6398_v7 = vpack.c.bf16 %v3939_v23, %v3937_v62  ;;  %v6400_v29 = vpack.c.bf16 %v3944_v52, %v3942_v6  ;;  %v3977_v23 = vld [vmem:[#allocation12 + $0x380] sm:$0xff]  ;;  %v3979_v6 = vld [vmem:[#allocation12 + $0x390] sm:$0xff]  ;;  %v3982_v52 = vld [vmem:[#allocation12 + $0x3a8] sm:$0xff] }
 0x5a9   : > { %6357 = vmatprep.subr.bf16.mxu0 %v6356_v2  ;;  %v6460_v2 = vpack.c.bf16 %v4170_v63, %v4169_v60  ;;  %v3941_v60 = vld [vmem:[#allocation12 + $0x260] sm:$0xff]  ;;  %v3943_v63 = vld [vmem:[#allocation12 + $0x270] sm:$0xff] }
 0x5aa   : > { %6459 = vmatpush3.bf16.msra.mxu1 %v6458_v32  ;;  %v3946_v32 = vld [vmem:[#allocation12 + $0x288] sm:$0xff] }
 0x5ab   : > { %6461 = vmatprep.subr.bf16.mxu1 %v6460_v2  ;;  %v3948_v2 = vld [vmem:[#allocation12 + $0x298] sm:$0xff] }
 0x5ac   : > { %6359 = vmatpush1.bf16.msra.mxu0 %v6358_v45  ;;  %v6462_v45 = vpack.c.bf16 %v4154_v58, %v4153_v31  ;;  %v6402_v31 = vpack.c.bf16 %v3943_v63, %v3941_v60  ;;  %v6404_v58 = vpack.c.bf16 %v3948_v2, %v3946_v32  ;;  %v3981_v63 = vld [vmem:[#allocation12 + $0x3a0] sm:$0xff]  ;;  %v3983_v32 = vld [vmem:[#allocation12 + $0x3b0] sm:$0xff]  ;;  %v3986_v2 = vld [vmem:[#allocation12 + $0x3c8] sm:$0xff] }
 0x5ad   : > { %6361 = vmatprep.subr.bf16.mxu0 %v6360_v61  ;;  %v6464_v61 = vpack.c.bf16 %v4172_v21, %v4171_v0  ;;  %v3945_v0 = vld [vmem:[#allocation12 + $0x280] sm:$0xff]  ;;  %v3947_v21 = vld [vmem:[#allocation12 + $0x290] sm:$0xff] }
 0x5ae   : > { %6463 = vmatpush3.bf16.msra.mxu1 %v6462_v45  ;;  %v3950_v45 = vld [vmem:[#allocation12 + $0x2a8] sm:$0xff] }
 0x5af   : > { %6465 = vmatprep.subr.bf16.mxu1 %v6464_v61  ;;  %v3952_v61 = vld [vmem:[#allocation12 + $0x2b8] sm:$0xff] }
 0x5b0   : > { %6363 = vmatpush1.bf16.msra.mxu0 %v6362_v3  ;;  %v6466_v3 = vpack.c.bf16 %v4156_v50, %v4155_v10  ;;  %v6406_v10 = vpack.c.bf16 %v3947_v21, %v3945_v0  ;;  %v6408_v50 = vpack.c.bf16 %v3952_v61, %v3950_v45  ;;  %v3709_v0 = vsub.s32 2, %v9887_v14  ;;  %v3985_v45 = vld [vmem:[#allocation12 + $0x3c0] sm:$0xff]  ;;  %v3987_v61 = vld [vmem:[#allocation12 + $0x3d0] sm:$0xff] }
 0x5b1   : > { %6365 = vmatprep.subr.bf16.mxu0 %v6364_v15  ;;  %v6468_v15 = vpack.c.bf16 %v4174_v18, %v4173_v42  ;;  %v3949_v42 = vld [vmem:[#allocation12 + $0x2a0] sm:$0xff]  ;;  %v3951_v18 = vld [vmem:[#allocation12 + $0x2b0] sm:$0xff] }
 0x5b2   : > { %6467 = vmatpush3.bf16.msra.mxu1 %v6466_v3  ;;  %v3954_v3 = vld [vmem:[#allocation12 + $0x2c8] sm:$0xff] }
 0x5b3   : > { %6469 = vmatprep.subr.bf16.mxu1 %v6468_v15  ;;  %v3956_v15 = vld [vmem:[#allocation12 + $0x2d8] sm:$0xff] }
 0x5b4   : > { %6367 = vmatpush1.bf16.msra.mxu0 %v6366_v19  ;;  %v6470_v19 = vpack.c.bf16 %v4158_v17, %v4157_v9  ;;  %v6410_v9 = vpack.c.bf16 %v3951_v18, %v3949_v42  ;;  %v6412_v17 = vpack.c.bf16 %v3956_v15, %v3954_v3  ;;  %v6446_v42 = vpack.c.bf16 %v3987_v61, %v3985_v45  ;;  %v3989_v15 = vld [vmem:[#allocation12 + $0x3e0] sm:$0xff] }
 0x5b5   : > { %6369 = vmatprep.subr.bf16.mxu0 %v6368_v20  ;;  %v6472_v20 = vpack.c.bf16 %v4176_v30, %v4175_v22  ;;  %v3953_v22 = vld [vmem:[#allocation12 + $0x2c0] sm:$0xff]  ;;  %v3955_v30 = vld [vmem:[#allocation12 + $0x2d0] sm:$0xff]  ;;  %v3710_v18 = vrot.slane %v9588_v57, %v3709_v0 }
 0x5b6   : > { %6471 = vmatpush3.bf16.msra.mxu1 %v6470_v19  ;;  %v3958_v19 = vld [vmem:[#allocation12 + $0x2e8] sm:$0xff] }
 0x5b7   : > { %6473 = vmatprep.subr.bf16.mxu1 %v6472_v20  ;;  %v3960_v20 = vld [vmem:[#allocation12 + $0x2f8] sm:$0xff] }
 0x5b8   : > { %6371 = vmatpush1.bf16.msra.mxu0 %v6370_v13  ;;  %v6474_v13 = vpack.c.bf16 %v4160_v39, %v4159_v55  ;;  %v6414_v55 = vpack.c.bf16 %v3955_v30, %v3953_v22  ;;  %v6416_v39 = vpack.c.bf16 %v3960_v20, %v3958_v19  ;;  %v4161_v30 = vld [vmem:[%s9648_s14 + $0x60] sm:$0xff]  ;;  %v4179_v20 = vld [vmem:[%s9648_s14 + $0xf0] sm:$0xff] }
 0x5b9   : > { %6373 = vmatprep.subr.bf16.mxu0 %v6372_v27  ;;  %v6476_v27 = vpack.c.bf16 %v4178_v12, %v4177_v59  ;;  %v3957_v59 = vld [vmem:[#allocation12 + $0x2e0] sm:$0xff]  ;;  %v3959_v12 = vld [vmem:[#allocation12 + $0x2f0] sm:$0xff] }
 0x5ba   : > { %6475 = vmatpush3.bf16.msra.mxu1 %v6474_v13  ;;  %v3962_v13 = vld [vmem:[#allocation12 + $0x308] sm:$0xff]  ;;  %v6418_v37 = vpack.c.bf16 %v3959_v12, %v3957_v59  ;;  %v4164_v59 = vld [vmem:[%s9648_s14 + $0x78] sm:$0xff] }
 0x5bb   : > { %6477 = vmatprep.subr.bf16.mxu1 %v6476_v27  ;;  %v3964_v27 = vld [vmem:[#allocation12 + $0x318] sm:$0xff] }
 0x5bc   : > { %6375 = vmatpush1.bf16.msra.mxu0 %v6374_v48  ;;  %v9888_v48 = vld [vmem:[#allocation22_spill] sm:$0xff] }
 0x5bd   : > { %6377 = vmatprep.subr.bf16.mxu0 %v6376_v8  ;;  %v3706_v8 = vrot.slane %v9588_v57, %v9888_v48  ;;  %v4162_v57 = vld [vmem:[%s9648_s14 + $0x68] sm:$0xff] }
 0x5be   : > { %v6478_v19 = vpack.c.bf16 %v4162_v57, %v4161_v30 }
 0x5c0   : > { %6379 = vmatpush1.bf16.msra.mxu0 %v6378_v49  ;;  %6479 = vmatpush3.bf16.msra.mxu1 %v6478_v19 }
 0x5c1   : > { %6381 = vmatprep.subr.bf16.mxu0 %v6380_v5 }
 0x5c4   : > { %6383 = vmatpush1.bf16.msra.mxu0 %v6382_v38 }
 0x5c5   : > { %6385 = vmatprep.subr.bf16.mxu0 %v6384_v11  ;;  %v3936_v11 = vld [vmem:[#allocation12 + $0x238] sm:$0xff] }
 0x5c6   : > { %v6392_v56 = vpack.c.bf16 %v3936_v11, %v3934_v53  ;;  %v6426_v53 = vpack.c.bf16 %v3967_v54, %v3965_v28  ;;  %v4382_v28 = vld [vmem:[%s9890_s20] ss:$0 sm:$0xff] }
 0x5c8   : > { %6387 = vmatpush1.bf16.msra.mxu0 %v6386_v51 }
 0x5c9   : > { %6389 = vmatprep.subr.bf16.mxu0 %v6388_v36  ;;  %v3935_v36 = vld [vmem:[#allocation12 + $0x230] sm:$0xff] }
 0x5ca   : > { %v6394_v1 = vpack.c.bf16 %v3935_v36, %v3933_v44 }
 0x65e   : > { %v3785_v41 = vpop.f32.mrb[18].mxu0  ;;  %v9596_v34 = vpop.f32.mrb[16].mxu1 }
 0x65f   : > { %v3786_v40 = vadd.f32 %v3785_v41, %v3702_v26  ;;  %v3787_v49 = vpop.f32.mrb[19].mxu0  ;;  %v3858_v5 = vpop.f32.mrb[17].mxu1  ;;  %v6420_v26 = vpack.c.bf16 %v3964_v27, %v3962_v13  ;;  %v3966_v41 = vld [vmem:[#allocation12 + $0x328] sm:$0xff]  ;;  %v3857_v22 = vadd.f32 %v9596_v34, %v3710_v18  ;;  %v4180_v34 = vld [vmem:[%s9648_s14 + $0xf8] sm:$0xff]  ;;  %v3993_v13 = vld [vmem:[%s9889_s28] sm:$0x3] }
 0x660   : > { %v3788_v38 = vadd.f32 %v3787_v49, %v3706_v8  ;;  %v3859_v43 = vadd.f32 %v3858_v5, %v3714_v25  ;;  %v3961_v8 = vld [vmem:[#allocation12 + $0x300] sm:$0xff]  ;;  %v3963_v25 = vld [vmem:[#allocation12 + $0x310] sm:$0xff]  ;;  %v3998_v27 = vrot.slane %v3993_v13, %v7662_v47 }
 0x661   : > { %v3861_v51 = vmax.f32 %v3786_v40, 0.0  ;;  %v3968_v40 = vld [vmem:[#allocation12 + $0x338] sm:$0xff]  ;;  %v6422_v49 = vpack.c.bf16 %v3963_v25, %v3961_v8  ;;  %v3863_v14 = vmax.f32 %v3857_v22, 0.0 }
 0x662   : > { %v3862_v24 = vmax.f32 %v3788_v38, 0.0  ;;  %v3864_v4 = vmax.f32 %v3859_v43, 0.0  ;;  %v6424_v5 = vpack.c.bf16 %v3968_v40, %v3966_v41  ;;  %v3970_v38 = vld [vmem:[#allocation12 + $0x348] sm:$0xff]  ;;  %v3972_v43 = vld [vmem:[#allocation12 + $0x358] sm:$0xff] }
 0x663   : > { %v6428_v11 = vpack.c.bf16 %v3972_v43, %v3970_v38 }
 0x664   : > { %4069 = vmatprep.mubr.f32.mxu0 %v3862_v24  ;;  %v3969_v24 = vld [vmem:[#allocation12 + $0x340] sm:$0xff] }
 0x665   : > { %4070 = vmatmul.mubr.f32.vlgmr.msra.gmra.mrb[20].mxu0 %v3861_v51  ;;  %v3974_v51 = vld [vmem:[#allocation12 + $0x368] sm:$0xff] }
 0x666   : > { %6391 = vmatpush1.bf16.msra.mxu0 %v6390_v35  ;;  %4140 = vmatprep.mubr.f32.mxu0 %v3864_v4  ;;  %v3971_v35 = vld [vmem:[#allocation12 + $0x350] sm:$0xff]  ;;  %v3973_v4 = vld [vmem:[#allocation12 + $0x360] sm:$0xff] }
 0x667   : > { %6393 = vmatprep.subr.bf16.mxu0 %v6392_v56  ;;  %v3976_v56 = vld [vmem:[#allocation12 + $0x378] sm:$0xff]  ;;  %v6430_v44 = vpack.c.bf16 %v3971_v35, %v3969_v24 }
 0x668   : > { %v6432_v36 = vpack.c.bf16 %v3976_v56, %v3974_v51 }
 0x66a   : > { %6395 = vmatpush1.bf16.msra.mxu0 %v6394_v1  ;;  %v3980_v1 = vld [vmem:[#allocation12 + $0x398] sm:$0xff] }
 0x66b   : > { %6397 = vmatprep.subr.bf16.mxu0 %v6396_v16  ;;  %v6434_v16 = vpack.c.bf16 %v3975_v46, %v3973_v4  ;;  %v6436_v62 = vpack.c.bf16 %v3980_v1, %v3978_v33 }
 0x66e   : > { %6399 = vmatpush1.bf16.msra.mxu0 %v6398_v7  ;;  %v3984_v7 = vld [vmem:[#allocation12 + $0x3b8] sm:$0xff] }
 0x66f   : > { %6401 = vmatprep.subr.bf16.mxu0 %v6400_v29  ;;  %v6438_v29 = vpack.c.bf16 %v3979_v6, %v3977_v23  ;;  %v6440_v60 = vpack.c.bf16 %v3984_v7, %v3982_v52 }
 0x672   : > { %6403 = vmatpush1.bf16.msra.mxu0 %v6402_v31  ;;  %v3988_v31 = vld [vmem:[#allocation12 + $0x3d8] sm:$0xff] }
 0x673   : > { %6405 = vmatprep.subr.bf16.mxu0 %v6404_v58  ;;  %v6442_v58 = vpack.c.bf16 %v3983_v32, %v3981_v63  ;;  %v6444_v21 = vpack.c.bf16 %v3988_v31, %v3986_v2 }
 0x676   : > { %6407 = vmatpush1.bf16.msra.mxu0 %v6406_v10  ;;  %v3990_v10 = vld [vmem:[#allocation12 + $0x3e8] sm:$0xff] }
 0x677   : > { %6409 = vmatprep.subr.bf16.mxu0 %v6408_v50  ;;  %v3992_v50 = vld [vmem:[#allocation12 + $0x3f8] sm:$0xff] }
 0x678   : > { %v6448_v3 = vpack.c.bf16 %v3992_v50, %v3990_v10 }
 0x67a   : > { %6411 = vmatpush1.bf16.msra.mxu0 %v6410_v9  ;;  %v3991_v9 = vld [vmem:[#allocation12 + $0x3f0] sm:$0xff] }
 0x67b   : > { %6413 = vmatprep.subr.bf16.mxu0 %v6412_v17  ;;  %v6450_v17 = vpack.c.bf16 %v3991_v9, %v3989_v15 }
 0x67e   : > { %6415 = vmatpush1.bf16.msra.mxu0 %v6414_v55  ;;  %v6480_v55 = vpack.c.bf16 %v4180_v34, %v4179_v20 }
 0x67f   : > { %6417 = vmatprep.subr.bf16.mxu0 %v6416_v39  ;;  %v4163_v39 = vld [vmem:[%s9648_s14 + $0x70] sm:$0xff] }
 0x680   : > { %v6482_v12 = vpack.c.bf16 %v4164_v59, %v4163_v39  ;;  %6481 = vmatprep.subr.bf16.mxu1 %v6480_v55 }
 0x682   : > { %6419 = vmatpush1.bf16.msra.mxu0 %v6418_v37  ;;  %6483 = vmatpush3.bf16.msra.mxu1 %v6482_v12  ;;  %v4002_v37 = vrot.slane %v3993_v13, %v9888_v48 }
 0x683   : > { %6421 = vmatprep.subr.bf16.mxu0 %v6420_v26 }
 0x686   : > { %6423 = vmatpush1.bf16.msra.mxu0 %v6422_v49 }
 0x687   : > { %6425 = vmatprep.subr.bf16.mxu0 %v6424_v5 }
 0x68a   : > { %6427 = vmatpush1.bf16.msra.mxu0 %v6426_v53 }
 0x68b   : > { %6429 = vmatprep.subr.bf16.mxu0 %v6428_v11 }
 0x68e   : > { %6431 = vmatpush1.bf16.msra.mxu0 %v6430_v44 }
 0x68f   : > { %6433 = vmatprep.subr.bf16.mxu0 %v6432_v36 }
 0x692   : > { %6435 = vmatpush1.bf16.msra.mxu0 %v6434_v16 }
 0x693   : > { %6437 = vmatprep.subr.bf16.mxu0 %v6436_v62 }
 0x696   : > { %6439 = vmatpush1.bf16.msra.mxu0 %v6438_v29 }
 0x697   : > { %6441 = vmatprep.subr.bf16.mxu0 %v6440_v60 }
 0x69a   : > { %6443 = vmatpush1.bf16.msra.mxu0 %v6442_v58 }
 0x69b   : > { %6445 = vmatprep.subr.bf16.mxu0 %v6444_v21 }
 0x69e   : > { %6447 = vmatpush1.bf16.msra.mxu0 %v6446_v42 }
 0x69f   : > { %6449 = vmatprep.subr.bf16.mxu0 %v6448_v3 }
 0x6a2   : > { %6451 = vmatpush1.bf16.msra.mxu0 %v6450_v17 }
 0x6a5   : > { %4141 = vmatmul.mubr.f32.vlgmr.msra.gmra.mrb[20].mxu0 %v3863_v14 }
 0x778   : > { %v4142_v26 = vpop.f32.mrb[20].mxu0 }
 0x779   : > { %v6506_v8 = vadd.f32 %v4142_v26, %v3998_v27  ;;  %v4144_v25 = vpop.f32.mrb[21].mxu0 }
 0x77a   : > { %v6507_v41 = vadd.f32 %v4144_v25, %v4002_v37 }
 0x77b   : > { %v4147_v49 = vmax.f32 %v6506_v8, 0.0 }
 0x77c   : > { %v4148_v40 = vmax.f32 %v6507_v41, 0.0 }
 0x77e   : > { %4252 = vmatprep.mubr.f32.mxu1 %v4148_v40 }
 0x77f   : > { %4253 = vmatmul.mubr.f32.vlgmr.msra.gmra.mrb[18].mxu1 %v4147_v49 }
 0x852   : > { %v4593_v5 = vpop.f32.mrb[18].mxu1 }
 0x853   : > { %v4594_v54 = vpop.f32.mrb[19].mxu1 }
 0x854   : > { %v4595_v38 = vadd.f32 %v4594_v54, %v4593_v5 }
 0x856   : > { %v4255_v47 = vadd.f32 %v4595_v38, %v4382_v28 }
 0x858   : > { %4259 = vst.msk [vmem:[%s592_s23] sm:$0xff] %vm4258_vm0, %v4255_v47 }
 0x859 PF: > { %s9892_s26 = sld [smem:[#allocation16_spill]] }
 0x85f   : > { %s29_s21 = sadd.s32 1, %s9892_s26  }
 0x860   : > { %p26_p6 = scmp.ge.s32.totalorder %s29_s21, 4  }
 0x862   :  { %28 = sbr.rel (!%p26_p6) target bundleno = 8 (0x8), region = 135 }
 0x869   :  { %4279 = vsyncpa [#allocation6], 1 }
 0x86a   :  { %4281 = vsyncpa [#allocation6 + $0x1], 1 }
 0x86b   :  { %4282 = vsyncpa [#allocation8], 1 }
 0x86c   :  { %4283 = vsyncpa [#allocation11], 1 }

</bundles_post_ra>
